<compile_context>
chip_gen: v6e
topology: v6e:2x2x1
jax: 0.10.0
libtpu: 0.0.40
codegen_flags: <defaults>
</compile_context>

<pallas_src>
import functools

import numpy as np
import jax
import jax.numpy as jnp
from jax import lax
from jax.experimental import pallas as pl
from jax.experimental.pallas import tpu as pltpu


def _make_divisible(ch, divisor=8, min_ch=None):
    if min_ch is None:
        min_ch = divisor
    new_ch = max(min_ch, int(ch + divisor / 2) // divisor * divisor)
    if new_ch < 0.9 * ch:
        new_ch += divisor
    return new_ch


# ---------------- activations (elementwise, inside the kernel) ----------------
def _hardswish(x):
    return x * jnp.clip(x + 3.0, 0.0, 6.0) * (1.0 / 6.0)


def _hardsigmoid(x):
    return jnp.clip(x + 3.0, 0.0, 6.0) * (1.0 / 6.0)


def _build_tap_masks(H, W, K):
    """(K*K, H*W) float masks: 1.0 where the SAME-padded tap read is in-bounds."""
    pad = (K - 1) // 2
    hh, ww = np.meshgrid(np.arange(H), np.arange(W), indexing="ij")
    hh = hh.reshape(-1)
    ww = ww.reshape(-1)
    masks = np.zeros((K * K, H * W), np.float32)
    for kh in range(K):
        for kw in range(K):
            dh, dw = kh - pad, kw - pad
            valid = (hh + dh >= 0) & (hh + dh < H) & (ww + dw >= 0) & (ww + dw < W)
            masks[kh * K + kw] = valid.astype(np.float32)
    return masks


# ------- fused kernel: expand + depthwise + SE + project + residual (per image) -------
# Layout inside the kernel: channels on sublanes, flattened spatial (HW) on lanes.
def _fused_kernel(x_ref, w_exp_ref, shifts_ref, w_dw_ref, mask_ref,
                  w_se1_ref, b_se1_ref, w_se2_ref, w_proj_ref, bn3b_ref,
                  o_ref, *, H, W, K):
    HW = H * W
    pad = (K - 1) // 2

    x = x_ref[...].astype(jnp.float32)                                     # (Cin, HW)

    # 1) expand 1x1 conv (MXU): (Cexp,Cin)@(Cin,HW); BN1 scale pre-folded into weight
    h = jnp.dot(w_exp_ref[...], x, preferred_element_type=jnp.float32)     # (Cexp, HW)
    h = _hardswish(h + shifts_ref[:, 0:1])

    # 2) depthwise KxK, stride 1, SAME padding: lane rolls (XLU) + edge masks.
    #    BN2 scale is pre-folded into the per-tap weights.
    acc = None
    for kh in range(K):                                                    # statically unrolled taps
        for kw in range(K):
            t = kh * K + kw
            off = (kh - pad) * W + (kw - pad)                              # flat-lane offset of the tap
            w_tap = w_dw_ref[:, t:t + 1]                                   # (Cexp, 1)
            if off == 0:
                contrib = h * w_tap                                        # center tap: no roll, no mask
            else:
                shifted = pltpu.roll(h, shift=(-off) % HW, axis=1)         # result[i] = h[i + off]
                contrib = jnp.where(mask_ref[t:t + 1, :] > 0.5, shifted, 0.0) * w_tap
            acc = contrib if acc is None else acc + contrib
    h2 = _hardswish(acc + shifts_ref[:, 1:2])                              # (Cexp, HW)

    # 3) Squeeze-Excitation on the VMEM-resident activation
    pooled = jnp.mean(h2, axis=1, keepdims=True)                           # (Cexp, 1)
    s = jnp.dot(w_se1_ref[...], pooled, preferred_element_type=jnp.float32) + b_se1_ref[...]
    s = jnp.maximum(s, 0.0)                                                # (Csq, 1)
    s = jnp.dot(w_se2_ref[...], s, preferred_element_type=jnp.float32) + shifts_ref[:, 2:3]
    s = _hardsigmoid(s)                                                    # (Cexp, 1)
    h2 = h2 * s                                                            # per-channel (sublane) scale

    # 4) project 1x1 conv (MXU) + BN3 shift + residual; lane-dense (Cout, HW) store
    y = jnp.dot(w_proj_ref[...], h2, preferred_element_type=jnp.float32) + bn3b_ref[...]
    o_ref[...] = (y + x).astype(o_ref.dtype)                               # Cin == Cout


# ---------------- InvertedResidual forward (single fused Pallas call) ----------------
@functools.partial(jax.jit, static_argnames=("kernel", "stride"))
def inverted_residual_forward(x_nchw, p, *, kernel=3, stride=1):
    assert stride == 1, "only the stride=1 (residual) path is implemented"
    N, Cin, H, W = x_nchw.shape
    HW = H * W
    Cexp = p["w_expand"].shape[1]
    Csq = p["w_se1"].shape[1]
    Cout = p["w_proj"].shape[1]
    assert Cin == Cout, "use_res_connect requires input_c == out_c"

    # channels on sublanes, HW on lanes: a FREE reshape of NCHW (no transpose)
    x2 = x_nchw.reshape(N, Cin, HW)

    # fold BN scales into the (transposed) weights; keep shifts as adds
    w_exp_t = p["w_expand"].T * p["bn1_scale"].reshape(Cexp, 1)             # (Cexp, Cin)
    w_dw_t = (p["w_dw"] * p["bn2_scale"].reshape(1, 1, Cexp)) \
        .reshape(kernel * kernel, Cexp).T                                   # (Cexp, K*K)
    w_proj_t = p["w_proj"].T * p["bn3_scale"].reshape(Cout, 1)              # (Cout, Cexp)
    w_se1_t = p["w_se1"].T                                                  # (Csq, Cexp)
    w_se2_t = p["w_se2"].T                                                  # (Cexp, Csq)
    b_se1 = p["b_se1"].reshape(Csq, 1)                                      # (Csq, 1)
    bn3_shift = p["bn3_shift"].reshape(Cout, 1)                             # (Cout, 1)
    # consolidate the three (Cexp,1) shift/bias vectors into one block
    shifts_exp = jnp.concatenate([p["bn1_shift"].reshape(Cexp, 1),
                                  p["bn2_shift"].reshape(Cexp, 1),
                                  p["b_se2"].reshape(Cexp, 1)], axis=1)     # (Cexp, 3)

    masks = jnp.asarray(_build_tap_masks(H, W, kernel))                     # (K*K, HW)

    # advisory cost estimate (memory-bound block; MXU flops are tiny)
    flops = N * (2 * HW * Cin * Cexp + 2 * HW * kernel * kernel * Cexp
                 + 4 * Cexp * Csq + 2 * HW * Cexp * Cout + 10 * HW * Cexp)
    param_bytes = sum(int(v.size) * v.dtype.itemsize for v in p.values())
    bytes_accessed = int(x2.size) * 4 + param_bytes + N * HW * Cout * 4

    kern = functools.partial(_fused_kernel, H=H, W=W, K=kernel)
    y2 = pl.pallas_call(
        kern,
        out_shape=jax.ShapeDtypeStruct((N, Cout, HW), x_nchw.dtype),
        grid=(N,),
        in_specs=[
            pl.BlockSpec((None, Cin, HW), lambda n: (n, 0, 0)),             # x (per image)
            pl.BlockSpec((Cexp, Cin), lambda n: (0, 0)),                    # w_expand^T (BN1 folded)
            pl.BlockSpec((Cexp, 3), lambda n: (0, 0)),                      # [bn1_shift|bn2_shift|b_se2]
            pl.BlockSpec((Cexp, kernel * kernel), lambda n: (0, 0)),        # depthwise taps (BN2 folded)
            pl.BlockSpec((kernel * kernel, HW), lambda n: (0, 0)),          # SAME-padding tap masks
            pl.BlockSpec((Csq, Cexp), lambda n: (0, 0)),                    # w_se1^T
            pl.BlockSpec((Csq, 1), lambda n: (0, 0)),                       # b_se1
            pl.BlockSpec((Cexp, Csq), lambda n: (0, 0)),                    # w_se2^T
            pl.BlockSpec((Cout, Cexp), lambda n: (0, 0)),                   # w_proj^T (BN3 folded)
            pl.BlockSpec((Cout, 1), lambda n: (0, 0)),                      # bn3 shift
        ],
        out_specs=pl.BlockSpec((None, Cout, HW), lambda n: (n, 0, 0)),      # lane-dense (Cout, HW)
        compiler_params=pltpu.CompilerParams(dimension_semantics=("parallel",)),
        cost_estimate=pl.CostEstimate(flops=int(flops), transcendentals=0,
                                      bytes_accessed=int(bytes_accessed)),
    )(x2, w_exp_t, shifts_exp, w_dw_t, masks,
      w_se1_t, b_se1, w_se2_t, w_proj_t, bn3_shift)

    # (N, Cout, HW) -> NCHW is a free reshape; no transpose needed
    return y2.reshape(N, Cout, H, W)


# ---------------- pure-JAX reference (for verification) ----------------
def inverted_residual_reference(x_nchw, p):
    x = jnp.transpose(x_nchw, (0, 2, 3, 1))
    N, H, W, Cin = x.shape
    h = _hardswish((x.reshape(-1, Cin) @ p["w_expand"]) * p["bn1_scale"] + p["bn1_shift"])
    h = h.reshape(N, H, W, -1)
    dw = p["w_dw"][:, :, None, :]                          # (K,K,1,C) HWIO
    h = lax.conv_general_dilated(
        h, dw, window_strides=(1, 1), padding="SAME",
        dimension_numbers=("NHWC", "HWIO", "NHWC"),
        feature_group_count=h.shape[-1])
    h = _hardswish(h * p["bn2_scale"].reshape(1, 1, 1, -1)
                   + p["bn2_shift"].reshape(1, 1, 1, -1))
    pooled = jnp.mean(h, axis=(1, 2))
    s = jnp.maximum(pooled @ p["w_se1"] + p["b_se1"], 0.0)
    s = _hardsigmoid(s @ p["w_se2"] + p["b_se2"])
    h = h * s[:, None, None, :]
    y = (h.reshape(-1, h.shape[-1]) @ p["w_proj"]) * p["bn3_scale"] + p["bn3_shift"]
    y = y.reshape(N, H, W, -1) + x
    return jnp.transpose(y, (0, 3, 1, 2))


def _fold_bn(gamma, beta, mean, var, eps=1e-5):
    scale = gamma / jnp.sqrt(var + eps)
    shift = beta - mean * scale
    return scale, shift


if __name__ == "__main__":
    # config: input_c=16, kernel=3, expanded_c=64, out_c=16, use_se=True, 'HS', stride=1
    width_multi = 1.0
    input_c = _make_divisible(16 * width_multi, 8)      # 16
    expanded_c = _make_divisible(64 * width_multi, 8)   # 64
    out_c = _make_divisible(16 * width_multi, 8)        # 16
    squeeze_c = _make_divisible(expanded_c // 4, 8)     # 16
    kernel, stride = 3, 1
    N, H, W = 2, 16, 16

    key = jax.random.PRNGKey(0)
    ks = jax.random.split(key, 20)
    f32 = jnp.float32

    def nrm(k, shape, s=0.1):
        return (s * jax.random.normal(k, shape)).astype(f32)

    # expand conv (Cin -> Cexp) + BN1
    w_expand = nrm(ks[0], (input_c, expanded_c))
    bn1_scale, bn1_shift = _fold_bn(
        1.0 + nrm(ks[1], (expanded_c,)), nrm(ks[2], (expanded_c,)),
        nrm(ks[3], (expanded_c,), 0.01),
        jax.random.uniform(ks[4], (expanded_c,), f32, 0.5, 1.5))
    # depthwise conv (K,K,Cexp) + BN2
    w_dw = nrm(ks[5], (kernel, kernel, expanded_c))
    bn2_scale, bn2_shift = _fold_bn(
        1.0 + nrm(ks[6], (expanded_c,)), nrm(ks[7], (expanded_c,)),
        nrm(ks[8], (expanded_c,), 0.01),
        jax.random.uniform(ks[9], (expanded_c,), f32, 0.5, 1.5))
    # SE
    w_se1 = nrm(ks[10], (expanded_c, squeeze_c))
    b_se1 = nrm(ks[11], (squeeze_c,), 0.05)
    w_se2 = nrm(ks[12], (squeeze_c, expanded_c))
    b_se2 = nrm(ks[13], (expanded_c,), 0.05)
    # project conv (Cexp -> Cout) + BN3
    w_proj = nrm(ks[14], (expanded_c, out_c))
    bn3_scale, bn3_shift = _fold_bn(
        1.0 + nrm(ks[15], (out_c,)), nrm(ks[16], (out_c,)),
        nrm(ks[17], (out_c,), 0.01),
        jax.random.uniform(ks[18], (out_c,), f32, 0.5, 1.5))

    params = {
        "w_expand": w_expand,
        "bn1_scale": bn1_scale.reshape(1, expanded_c),
        "bn1_shift": bn1_shift.reshape(1, expanded_c),
        "w_dw": w_dw,
        "bn2_scale": bn2_scale.reshape(1, expanded_c),
        "bn2_shift": bn2_shift.reshape(1, expanded_c),
        "w_se1": w_se1,
        "b_se1": b_se1.reshape(1, squeeze_c),
        "w_se2": w_se2,
        "b_se2": b_se2.reshape(1, expanded_c),
        "w_proj": w_proj,
        "bn3_scale": bn3_scale.reshape(1, out_c),
        "bn3_shift": bn3_shift.reshape(1, out_c),
    }

    x = jax.random.normal(ks[19], (N, input_c, H, W)).astype(f32)   # NCHW input

    out = inverted_residual_forward(x, params, kernel=kernel, stride=stride)
    out = jax.block_until_ready(out)

    ref = inverted_residual_reference(x, params)
    assert out.shape == (N, out_c, H, W)
    assert jnp.allclose(out, ref, atol=1e-3, rtol=1e-3), float(jnp.max(jnp.abs(out - ref)))

    print("KERNEL_OK")
</pallas_src>

<mosaic_0001>
module attributes {stable_mosaic.version = 11 : i64} {
  func.func @_fused_kernel(%arg0: i32, %arg1: memref<1x16x256xf32, #tpu.memory_space<vmem>>, %arg2: memref<64x16xf32, #tpu.memory_space<vmem>>, %arg3: memref<64x3xf32, #tpu.memory_space<vmem>>, %arg4: memref<64x9xf32, #tpu.memory_space<vmem>>, %arg5: memref<9x256xf32, #tpu.memory_space<vmem>>, %arg6: memref<16x64xf32, #tpu.memory_space<vmem>>, %arg7: memref<16x1xf32, #tpu.memory_space<vmem>>, %arg8: memref<64x16xf32, #tpu.memory_space<vmem>>, %arg9: memref<16x64xf32, #tpu.memory_space<vmem>>, %arg10: memref<16x1xf32, #tpu.memory_space<vmem>>, %arg11: memref<1x16x256xf32, #tpu.memory_space<vmem>>) attributes {dimension_semantics = [#tpu.dimension_semantics<parallel>], iteration_bounds = array<i64: 2>, scalar_prefetch = 0 : i64, scratch_operands = 0 : i64, tpu.core_type = #tpu.core_type<tc>, window_params = [{transform_indices = @transform_0, window_bounds = array<i64: 1, 16, 256>}, {pipeline_mode = #tpu.pipeline_mode<synchronous>, transform_indices = @transform_1, window_bounds = array<i64: 64, 16>}, {pipeline_mode = #tpu.pipeline_mode<synchronous>, transform_indices = @transform_2, window_bounds = array<i64: 64, 3>}, {pipeline_mode = #tpu.pipeline_mode<synchronous>, transform_indices = @transform_3, window_bounds = array<i64: 64, 9>}, {pipeline_mode = #tpu.pipeline_mode<synchronous>, transform_indices = @transform_4, window_bounds = array<i64: 9, 256>}, {pipeline_mode = #tpu.pipeline_mode<synchronous>, transform_indices = @transform_5, window_bounds = array<i64: 16, 64>}, {pipeline_mode = #tpu.pipeline_mode<synchronous>, transform_indices = @transform_6, window_bounds = array<i64: 16, 1>}, {pipeline_mode = #tpu.pipeline_mode<synchronous>, transform_indices = @transform_7, window_bounds = array<i64: 64, 16>}, {pipeline_mode = #tpu.pipeline_mode<synchronous>, transform_indices = @transform_8, window_bounds = array<i64: 16, 64>}, {pipeline_mode = #tpu.pipeline_mode<synchronous>, transform_indices = @transform_9, window_bounds = array<i64: 16, 1>}, {transform_indices = @transform_10, window_bounds = array<i64: 1, 16, 256>}]} {
    %c0 = arith.constant 0 : index
    %c0_0 = arith.constant 0 : index
    %c0_1 = arith.constant 0 : index
    %0 = vector.load %arg1[%c0, %c0_0, %c0_1] : memref<1x16x256xf32, #tpu.memory_space<vmem>>, vector<1x16x256xf32>
    %1 = vector.shape_cast %0 : vector<1x16x256xf32> to vector<16x256xf32>
    %c0_2 = arith.constant 0 : index
    %c0_3 = arith.constant 0 : index
    %2 = vector.load %arg2[%c0_2, %c0_3] : memref<64x16xf32, #tpu.memory_space<vmem>>, vector<64x16xf32>
    %cst = arith.constant dense<0.000000e+00> : vector<64x256xf32>
    %3 = tpu.matmul %2, %1, %cst {dimension_numbers = #tpu.dot_dimension_numbers<[1], [0], [0], [1], [0, 0, 1, 1], [], []>} : vector<64x16xf32>, vector<16x256xf32>, vector<64x256xf32> -> vector<64x256xf32>
    %c0_4 = arith.constant 0 : index
    %c0_5 = arith.constant 0 : index
    %4 = vector.load %arg3[%c0_4, %c0_5] : memref<64x3xf32, #tpu.memory_space<vmem>>, vector<64x1xf32>
    %5 = vector.broadcast %4 : vector<64x1xf32> to vector<64x256xf32>
    %6 = arith.addf %3, %5 : vector<64x256xf32>
    %cst_6 = arith.constant 3.000000e+00 : f32
    %7 = vector.broadcast %cst_6 : f32 to vector<64x256xf32>
    %8 = arith.addf %6, %7 : vector<64x256xf32>
    %cst_7 = arith.constant 0.000000e+00 : f32
    %cst_8 = arith.constant 6.000000e+00 : f32
    %9 = vector.broadcast %cst_7 : f32 to vector<64x256xf32>
    %10 = arith.maximumf %9, %8 : vector<64x256xf32>
    %11 = vector.broadcast %cst_8 : f32 to vector<64x256xf32>
    %12 = arith.minimumf %11, %10 : vector<64x256xf32>
    %13 = arith.mulf %6, %12 : vector<64x256xf32>
    %cst_9 = arith.constant 0.166666672 : f32
    %14 = vector.broadcast %cst_9 : f32 to vector<64x256xf32>
    %15 = arith.mulf %13, %14 : vector<64x256xf32>
    %c0_10 = arith.constant 0 : index
    %c0_11 = arith.constant 0 : index
    %16 = vector.load %arg4[%c0_10, %c0_11] : memref<64x9xf32, #tpu.memory_space<vmem>>, vector<64x1xf32>
    %c17_i32 = arith.constant 17 : i32
    %17 = tpu.dynamic_rotate %15 by %c17_i32 dim 1 : vector<64x256xf32>, i32 -> vector<64x256xf32>
    %c0_12 = arith.constant 0 : index
    %c0_13 = arith.constant 0 : index
    %18 = vector.load %arg5[%c0_12, %c0_13] : memref<9x256xf32, #tpu.memory_space<vmem>>, vector<1x256xf32>
    %cst_14 = arith.constant 5.000000e-01 : f32
    %19 = vector.broadcast %cst_14 : f32 to vector<1x256xf32>
    %20 = arith.cmpf ogt, %18, %19 : vector<1x256xf32>
    %cst_15 = arith.constant 0.000000e+00 : f32
    %21 = vector.shape_cast %20 : vector<1x256xi1> to vector<1x256xi1>
    %22 = vector.broadcast %21 : vector<1x256xi1> to vector<64x256xi1>
    %23 = vector.broadcast %cst_15 : f32 to vector<64x256xf32>
    %24 = arith.select %22, %17, %23 : vector<64x256xi1>, vector<64x256xf32>
    %25 = vector.broadcast %16 : vector<64x1xf32> to vector<64x256xf32>
    %26 = arith.mulf %24, %25 : vector<64x256xf32>
    %c0_16 = arith.constant 0 : index
    %c1 = arith.constant 1 : index
    %27 = vector.load %arg4[%c0_16, %c1] : memref<64x9xf32, #tpu.memory_space<vmem>>, vector<64x1xf32>
    %c16_i32 = arith.constant 16 : i32
    %28 = tpu.dynamic_rotate %15 by %c16_i32 dim 1 : vector<64x256xf32>, i32 -> vector<64x256xf32>
    %c1_17 = arith.constant 1 : index
    %c0_18 = arith.constant 0 : index
    %29 = vector.load %arg5[%c1_17, %c0_18] : memref<9x256xf32, #tpu.memory_space<vmem>>, vector<1x256xf32>
    %cst_19 = arith.constant 5.000000e-01 : f32
    %30 = vector.broadcast %cst_19 : f32 to vector<1x256xf32>
    %31 = arith.cmpf ogt, %29, %30 : vector<1x256xf32>
    %cst_20 = arith.constant 0.000000e+00 : f32
    %32 = vector.shape_cast %31 : vector<1x256xi1> to vector<1x256xi1>
    %33 = vector.broadcast %32 : vector<1x256xi1> to vector<64x256xi1>
    %34 = vector.broadcast %cst_20 : f32 to vector<64x256xf32>
    %35 = arith.select %33, %28, %34 : vector<64x256xi1>, vector<64x256xf32>
    %36 = vector.broadcast %27 : vector<64x1xf32> to vector<64x256xf32>
    %37 = arith.mulf %35, %36 : vector<64x256xf32>
    %38 = arith.addf %26, %37 : vector<64x256xf32>
    %c0_21 = arith.constant 0 : index
    %c2 = arith.constant 2 : index
    %39 = vector.load %arg4[%c0_21, %c2] : memref<64x9xf32, #tpu.memory_space<vmem>>, vector<64x1xf32>
    %c15_i32 = arith.constant 15 : i32
    %40 = tpu.dynamic_rotate %15 by %c15_i32 dim 1 : vector<64x256xf32>, i32 -> vector<64x256xf32>
    %c2_22 = arith.constant 2 : index
    %c0_23 = arith.constant 0 : index
    %41 = vector.load %arg5[%c2_22, %c0_23] : memref<9x256xf32, #tpu.memory_space<vmem>>, vector<1x256xf32>
    %cst_24 = arith.constant 5.000000e-01 : f32
    %42 = vector.broadcast %cst_24 : f32 to vector<1x256xf32>
    %43 = arith.cmpf ogt, %41, %42 : vector<1x256xf32>
    %cst_25 = arith.constant 0.000000e+00 : f32
    %44 = vector.shape_cast %43 : vector<1x256xi1> to vector<1x256xi1>
    %45 = vector.broadcast %44 : vector<1x256xi1> to vector<64x256xi1>
    %46 = vector.broadcast %cst_25 : f32 to vector<64x256xf32>
    %47 = arith.select %45, %40, %46 : vector<64x256xi1>, vector<64x256xf32>
    %48 = vector.broadcast %39 : vector<64x1xf32> to vector<64x256xf32>
    %49 = arith.mulf %47, %48 : vector<64x256xf32>
    %50 = arith.addf %38, %49 : vector<64x256xf32>
    %c0_26 = arith.constant 0 : index
    %c3 = arith.constant 3 : index
    %51 = vector.load %arg4[%c0_26, %c3] : memref<64x9xf32, #tpu.memory_space<vmem>>, vector<64x1xf32>
    %c1_i32 = arith.constant 1 : i32
    %52 = tpu.dynamic_rotate %15 by %c1_i32 dim 1 : vector<64x256xf32>, i32 -> vector<64x256xf32>
    %c3_27 = arith.constant 3 : index
    %c0_28 = arith.constant 0 : index
    %53 = vector.load %arg5[%c3_27, %c0_28] : memref<9x256xf32, #tpu.memory_space<vmem>>, vector<1x256xf32>
    %cst_29 = arith.constant 5.000000e-01 : f32
    %54 = vector.broadcast %cst_29 : f32 to vector<1x256xf32>
    %55 = arith.cmpf ogt, %53, %54 : vector<1x256xf32>
    %cst_30 = arith.constant 0.000000e+00 : f32
    %56 = vector.shape_cast %55 : vector<1x256xi1> to vector<1x256xi1>
    %57 = vector.broadcast %56 : vector<1x256xi1> to vector<64x256xi1>
    %58 = vector.broadcast %cst_30 : f32 to vector<64x256xf32>
    %59 = arith.select %57, %52, %58 : vector<64x256xi1>, vector<64x256xf32>
    %60 = vector.broadcast %51 : vector<64x1xf32> to vector<64x256xf32>
    %61 = arith.mulf %59, %60 : vector<64x256xf32>
    %62 = arith.addf %50, %61 : vector<64x256xf32>
    %c0_31 = arith.constant 0 : index
    %c4 = arith.constant 4 : index
    %63 = vector.load %arg4[%c0_31, %c4] : memref<64x9xf32, #tpu.memory_space<vmem>>, vector<64x1xf32>
    %64 = vector.broadcast %63 : vector<64x1xf32> to vector<64x256xf32>
    %65 = arith.mulf %15, %64 : vector<64x256xf32>
    %66 = arith.addf %62, %65 : vector<64x256xf32>
    %c0_32 = arith.constant 0 : index
    %c5 = arith.constant 5 : index
    %67 = vector.load %arg4[%c0_32, %c5] : memref<64x9xf32, #tpu.memory_space<vmem>>, vector<64x1xf32>
    %c255_i32 = arith.constant 255 : i32
    %68 = tpu.dynamic_rotate %15 by %c255_i32 dim 1 : vector<64x256xf32>, i32 -> vector<64x256xf32>
    %c5_33 = arith.constant 5 : index
    %c0_34 = arith.constant 0 : index
    %69 = vector.load %arg5[%c5_33, %c0_34] : memref<9x256xf32, #tpu.memory_space<vmem>>, vector<1x256xf32>
    %cst_35 = arith.constant 5.000000e-01 : f32
    %70 = vector.broadcast %cst_35 : f32 to vector<1x256xf32>
    %71 = arith.cmpf ogt, %69, %70 : vector<1x256xf32>
    %cst_36 = arith.constant 0.000000e+00 : f32
    %72 = vector.shape_cast %71 : vector<1x256xi1> to vector<1x256xi1>
    %73 = vector.broadcast %72 : vector<1x256xi1> to vector<64x256xi1>
    %74 = vector.broadcast %cst_36 : f32 to vector<64x256xf32>
    %75 = arith.select %73, %68, %74 : vector<64x256xi1>, vector<64x256xf32>
    %76 = vector.broadcast %67 : vector<64x1xf32> to vector<64x256xf32>
    %77 = arith.mulf %75, %76 : vector<64x256xf32>
    %78 = arith.addf %66, %77 : vector<64x256xf32>
    %c0_37 = arith.constant 0 : index
    %c6 = arith.constant 6 : index
    %79 = vector.load %arg4[%c0_37, %c6] : memref<64x9xf32, #tpu.memory_space<vmem>>, vector<64x1xf32>
    %c241_i32 = arith.constant 241 : i32
    %80 = tpu.dynamic_rotate %15 by %c241_i32 dim 1 : vector<64x256xf32>, i32 -> vector<64x256xf32>
    %c6_38 = arith.constant 6 : index
    %c0_39 = arith.constant 0 : index
    %81 = vector.load %arg5[%c6_38, %c0_39] : memref<9x256xf32, #tpu.memory_space<vmem>>, vector<1x256xf32>
    %cst_40 = arith.constant 5.000000e-01 : f32
    %82 = vector.broadcast %cst_40 : f32 to vector<1x256xf32>
    %83 = arith.cmpf ogt, %81, %82 : vector<1x256xf32>
    %cst_41 = arith.constant 0.000000e+00 : f32
    %84 = vector.shape_cast %83 : vector<1x256xi1> to vector<1x256xi1>
    %85 = vector.broadcast %84 : vector<1x256xi1> to vector<64x256xi1>
    %86 = vector.broadcast %cst_41 : f32 to vector<64x256xf32>
    %87 = arith.select %85, %80, %86 : vector<64x256xi1>, vector<64x256xf32>
    %88 = vector.broadcast %79 : vector<64x1xf32> to vector<64x256xf32>
    %89 = arith.mulf %87, %88 : vector<64x256xf32>
    %90 = arith.addf %78, %89 : vector<64x256xf32>
    %c0_42 = arith.constant 0 : index
    %c7 = arith.constant 7 : index
    %91 = vector.load %arg4[%c0_42, %c7] : memref<64x9xf32, #tpu.memory_space<vmem>>, vector<64x1xf32>
    %c240_i32 = arith.constant 240 : i32
    %92 = tpu.dynamic_rotate %15 by %c240_i32 dim 1 : vector<64x256xf32>, i32 -> vector<64x256xf32>
    %c7_43 = arith.constant 7 : index
    %c0_44 = arith.constant 0 : index
    %93 = vector.load %arg5[%c7_43, %c0_44] : memref<9x256xf32, #tpu.memory_space<vmem>>, vector<1x256xf32>
    %cst_45 = arith.constant 5.000000e-01 : f32
    %94 = vector.broadcast %cst_45 : f32 to vector<1x256xf32>
    %95 = arith.cmpf ogt, %93, %94 : vector<1x256xf32>
    %cst_46 = arith.constant 0.000000e+00 : f32
    %96 = vector.shape_cast %95 : vector<1x256xi1> to vector<1x256xi1>
    %97 = vector.broadcast %96 : vector<1x256xi1> to vector<64x256xi1>
    %98 = vector.broadcast %cst_46 : f32 to vector<64x256xf32>
    %99 = arith.select %97, %92, %98 : vector<64x256xi1>, vector<64x256xf32>
    %100 = vector.broadcast %91 : vector<64x1xf32> to vector<64x256xf32>
    %101 = arith.mulf %99, %100 : vector<64x256xf32>
    %102 = arith.addf %90, %101 : vector<64x256xf32>
    %c0_47 = arith.constant 0 : index
    %c8 = arith.constant 8 : index
    %103 = vector.load %arg4[%c0_47, %c8] : memref<64x9xf32, #tpu.memory_space<vmem>>, vector<64x1xf32>
    %c239_i32 = arith.constant 239 : i32
    %104 = tpu.dynamic_rotate %15 by %c239_i32 dim 1 : vector<64x256xf32>, i32 -> vector<64x256xf32>
    %c8_48 = arith.constant 8 : index
    %c0_49 = arith.constant 0 : index
    %105 = vector.load %arg5[%c8_48, %c0_49] : memref<9x256xf32, #tpu.memory_space<vmem>>, vector<1x256xf32>
    %cst_50 = arith.constant 5.000000e-01 : f32
    %106 = vector.broadcast %cst_50 : f32 to vector<1x256xf32>
    %107 = arith.cmpf ogt, %105, %106 : vector<1x256xf32>
    %cst_51 = arith.constant 0.000000e+00 : f32
    %108 = vector.shape_cast %107 : vector<1x256xi1> to vector<1x256xi1>
    %109 = vector.broadcast %108 : vector<1x256xi1> to vector<64x256xi1>
    %110 = vector.broadcast %cst_51 : f32 to vector<64x256xf32>
    %111 = arith.select %109, %104, %110 : vector<64x256xi1>, vector<64x256xf32>
    %112 = vector.broadcast %103 : vector<64x1xf32> to vector<64x256xf32>
    %113 = arith.mulf %111, %112 : vector<64x256xf32>
    %114 = arith.addf %102, %113 : vector<64x256xf32>
    %c0_52 = arith.constant 0 : index
    %c1_53 = arith.constant 1 : index
    %115 = vector.load %arg3[%c0_52, %c1_53] : memref<64x3xf32, #tpu.memory_space<vmem>>, vector<64x1xf32>
    %116 = vector.broadcast %115 : vector<64x1xf32> to vector<64x256xf32>
    %117 = arith.addf %114, %116 : vector<64x256xf32>
    %cst_54 = arith.constant 3.000000e+00 : f32
    %118 = vector.broadcast %cst_54 : f32 to vector<64x256xf32>
    %119 = arith.addf %117, %118 : vector<64x256xf32>
    %cst_55 = arith.constant 0.000000e+00 : f32
    %cst_56 = arith.constant 6.000000e+00 : f32
    %120 = vector.broadcast %cst_55 : f32 to vector<64x256xf32>
    %121 = arith.maximumf %120, %119 : vector<64x256xf32>
    %122 = vector.broadcast %cst_56 : f32 to vector<64x256xf32>
    %123 = arith.minimumf %122, %121 : vector<64x256xf32>
    %124 = arith.mulf %117, %123 : vector<64x256xf32>
    %cst_57 = arith.constant 0.166666672 : f32
    %125 = vector.broadcast %cst_57 : f32 to vector<64x256xf32>
    %126 = arith.mulf %124, %125 : vector<64x256xf32>
    %cst_58 = arith.constant dense<0.000000e+00> : vector<64xf32>
    %127 = vector.multi_reduction <add>, %126, %cst_58 [1] : vector<64x256xf32> to vector<64xf32>
    %128 = vector.shape_cast %127 : vector<64xf32> to vector<64x1xf32>
    %cst_59 = arith.constant 2.560000e+02 : f32
    %129 = vector.broadcast %cst_59 : f32 to vector<64x1xf32>
    %130 = arith.divf %128, %129 : vector<64x1xf32>
    %c0_60 = arith.constant 0 : index
    %c0_61 = arith.constant 0 : index
    %131 = vector.load %arg6[%c0_60, %c0_61] : memref<16x64xf32, #tpu.memory_space<vmem>>, vector<16x64xf32>
    %cst_62 = arith.constant dense<0.000000e+00> : vector<16x1xf32>
    %132 = tpu.matmul %131, %130, %cst_62 {dimension_numbers = #tpu.dot_dimension_numbers<[1], [0], [0], [1], [0, 0, 1, 1], [], []>} : vector<16x64xf32>, vector<64x1xf32>, vector<16x1xf32> -> vector<16x1xf32>
    %c0_63 = arith.constant 0 : index
    %c0_64 = arith.constant 0 : index
    %133 = vector.load %arg7[%c0_63, %c0_64] : memref<16x1xf32, #tpu.memory_space<vmem>>, vector<16x1xf32>
    %134 = arith.addf %132, %133 : vector<16x1xf32>
    %cst_65 = arith.constant 0.000000e+00 : f32
    %135 = vector.broadcast %cst_65 : f32 to vector<16x1xf32>
    %136 = arith.maximumf %134, %135 : vector<16x1xf32>
    %c0_66 = arith.constant 0 : index
    %c0_67 = arith.constant 0 : index
    %137 = vector.load %arg8[%c0_66, %c0_67] : memref<64x16xf32, #tpu.memory_space<vmem>>, vector<64x16xf32>
    %cst_68 = arith.constant dense<0.000000e+00> : vector<64x1xf32>
    %138 = tpu.matmul %137, %136, %cst_68 {dimension_numbers = #tpu.dot_dimension_numbers<[1], [0], [0], [1], [0, 0, 1, 1], [], []>} : vector<64x16xf32>, vector<16x1xf32>, vector<64x1xf32> -> vector<64x1xf32>
    %c0_69 = arith.constant 0 : index
    %c2_70 = arith.constant 2 : index
    %139 = vector.load %arg3[%c0_69, %c2_70] : memref<64x3xf32, #tpu.memory_space<vmem>>, vector<64x1xf32>
    %140 = arith.addf %138, %139 : vector<64x1xf32>
    %cst_71 = arith.constant 3.000000e+00 : f32
    %141 = vector.broadcast %cst_71 : f32 to vector<64x1xf32>
    %142 = arith.addf %140, %141 : vector<64x1xf32>
    %cst_72 = arith.constant 0.000000e+00 : f32
    %cst_73 = arith.constant 6.000000e+00 : f32
    %143 = vector.broadcast %cst_72 : f32 to vector<64x1xf32>
    %144 = arith.maximumf %143, %142 : vector<64x1xf32>
    %145 = vector.broadcast %cst_73 : f32 to vector<64x1xf32>
    %146 = arith.minimumf %145, %144 : vector<64x1xf32>
    %cst_74 = arith.constant 0.166666672 : f32
    %147 = vector.broadcast %cst_74 : f32 to vector<64x1xf32>
    %148 = arith.mulf %146, %147 : vector<64x1xf32>
    %149 = vector.broadcast %148 : vector<64x1xf32> to vector<64x256xf32>
    %150 = arith.mulf %126, %149 : vector<64x256xf32>
    %c0_75 = arith.constant 0 : index
    %c0_76 = arith.constant 0 : index
    %151 = vector.load %arg9[%c0_75, %c0_76] : memref<16x64xf32, #tpu.memory_space<vmem>>, vector<16x64xf32>
    %cst_77 = arith.constant dense<0.000000e+00> : vector<16x256xf32>
    %152 = tpu.matmul %151, %150, %cst_77 {dimension_numbers = #tpu.dot_dimension_numbers<[1], [0], [0], [1], [0, 0, 1, 1], [], []>} : vector<16x64xf32>, vector<64x256xf32>, vector<16x256xf32> -> vector<16x256xf32>
    %c0_78 = arith.constant 0 : index
    %c0_79 = arith.constant 0 : index
    %153 = vector.load %arg10[%c0_78, %c0_79] : memref<16x1xf32, #tpu.memory_space<vmem>>, vector<16x1xf32>
    %154 = vector.broadcast %153 : vector<16x1xf32> to vector<16x256xf32>
    %155 = arith.addf %152, %154 : vector<16x256xf32>
    %156 = arith.addf %155, %1 : vector<16x256xf32>
    %c0_80 = arith.constant 0 : index
    %c0_81 = arith.constant 0 : index
    %c0_82 = arith.constant 0 : index
    %157 = vector.load %arg11[%c0_80, %c0_81, %c0_82] : memref<1x16x256xf32, #tpu.memory_space<vmem>>, vector<1x16x256xf32>
    %158 = vector.shape_cast %157 : vector<1x16x256xf32> to vector<16x256xf32>
    %159 = vector.shape_cast %156 : vector<16x256xf32> to vector<1x16x256xf32>
    tpu.vector_store %arg11[%c0_80, %c0_81, %c0_82], %159 {strides = array<i32>} : memref<1x16x256xf32, #tpu.memory_space<vmem>>, vector<1x16x256xf32>,
    return
  }
  func.func @transform_0(%arg0: i32) -> (i32, i32, i32) {
    %c0_i32 = arith.constant 0 : i32
    %c0_i32_0 = arith.constant 0 : i32
    %c0_i32_1 = arith.constant 0 : i32
    return %arg0, %c0_i32, %c0_i32_0 : i32, i32, i32
  }
  func.func @transform_1(%arg0: i32) -> (i32, i32) {
    %c0_i32 = arith.constant 0 : i32
    %c0_i32_0 = arith.constant 0 : i32
    %c0_i32_1 = arith.constant 0 : i32
    return %c0_i32, %c0_i32_0 : i32, i32
  }
  func.func @transform_2(%arg0: i32) -> (i32, i32) {
    %c0_i32 = arith.constant 0 : i32
    %c0_i32_0 = arith.constant 0 : i32
    %c0_i32_1 = arith.constant 0 : i32
    return %c0_i32, %c0_i32_0 : i32, i32
  }
  func.func @transform_3(%arg0: i32) -> (i32, i32) {
    %c0_i32 = arith.constant 0 : i32
    %c0_i32_0 = arith.constant 0 : i32
    %c0_i32_1 = arith.constant 0 : i32
    return %c0_i32, %c0_i32_0 : i32, i32
  }
  func.func @transform_4(%arg0: i32) -> (i32, i32) {
    %c0_i32 = arith.constant 0 : i32
    %c0_i32_0 = arith.constant 0 : i32
    %c0_i32_1 = arith.constant 0 : i32
    return %c0_i32, %c0_i32_0 : i32, i32
  }
  func.func @transform_5(%arg0: i32) -> (i32, i32) {
    %c0_i32 = arith.constant 0 : i32
    %c0_i32_0 = arith.constant 0 : i32
    %c0_i32_1 = arith.constant 0 : i32
    return %c0_i32, %c0_i32_0 : i32, i32
  }
  func.func @transform_6(%arg0: i32) -> (i32, i32) {
    %c0_i32 = arith.constant 0 : i32
    %c0_i32_0 = arith.constant 0 : i32
    %c0_i32_1 = arith.constant 0 : i32
    return %c0_i32, %c0_i32_0 : i32, i32
  }
  func.func @transform_7(%arg0: i32) -> (i32, i32) {
    %c0_i32 = arith.constant 0 : i32
    %c0_i32_0 = arith.constant 0 : i32
    %c0_i32_1 = arith.constant 0 : i32
    return %c0_i32, %c0_i32_0 : i32, i32
  }
  func.func @transform_8(%arg0: i32) -> (i32, i32) {
    %c0_i32 = arith.constant 0 : i32
    %c0_i32_0 = arith.constant 0 : i32
    %c0_i32_1 = arith.constant 0 : i32
    return %c0_i32, %c0_i32_0 : i32, i32
  }
  func.func @transform_9(%arg0: i32) -> (i32, i32) {
    %c0_i32 = arith.constant 0 : i32
    %c0_i32_0 = arith.constant 0 : i32
    %c0_i32_1 = arith.constant 0 : i32
    return %c0_i32, %c0_i32_0 : i32, i32
  }
  func.func @transform_10(%arg0: i32) -> (i32, i32, i32) {
    %c0_i32 = arith.constant 0 : i32
    %c0_i32_0 = arith.constant 0 : i32
    %c0_i32_1 = arith.constant 0 : i32
    return %arg0, %c0_i32, %c0_i32_0 : i32, i32, i32
  }
}

</mosaic_0001>

<bundles_post_ra>
// kernel: inverted_residual_forward.1
= control target key start
LH: loop header
LB: loop body
LE: loop exit
PB: predicated region body
PF: predicated region fallthrough
CT: control target
= control target key end

     0   :  { %s2791_s13 = smov 0   ;;  %s5158_s0 = inlined_call_operand.vmem [shape: f32[2,16,256], index: 0, kind: input, shape index: {}]   ;;  %s5159_s1 = inlined_call_operand.vmem [shape: f32[64,16], index: 1, kind: input, shape index: {}]   ;;  %s5160_s2 = inlined_call_operand.vmem [shape: f32[64,3], index: 2, kind: input, shape index: {}]   ;;  %s5161_s3 = inlined_call_operand.vmem [shape: f32[64,9], index: 3, kind: input, shape index: {}]   ;;  %s5162_s4 = inlined_call_operand.vmem [shape: f32[9,256], index: 4, kind: input, shape index: {}]   ;;  %s5163_s5 = inlined_call_operand.vmem [shape: f32[16,64], index: 5, kind: input, shape index: {}]   ;;  %s5164_s6 = inlined_call_operand.vmem [shape: f32[16,1], index: 6, kind: input, shape index: {}]   ;;  %s5165_s7 = inlined_call_operand.vmem [shape: f32[64,16], index: 7, kind: input, shape index: {}]   ;;  %s5166_s8 = inlined_call_operand.vmem [shape: f32[16,64], index: 8, kind: input, shape index: {}]   ;;  %s5167_s9 = inlined_call_operand.vmem [shape: f32[16,1], index: 9, kind: input, shape index: {}]   ;;  %s5168_s10 = inlined_call_operand.vmem [shape: f32[2,16,256], index: 10, kind: output, shape index: {}]  }
   0x1 LB: > { %s2505_s14 = sadd.s32 4294967295, %s2715_s13   ;;  %p2509_p0 = scmp.ge.s32.totalorder %s2715_s13, 1  ;;  %s2715_s13 = sphi %s2791_s13, %s20_s13  }
   0x2   : > { %p312_p1 = scmp.lt.s32.totalorder %s2715_s13, 3 }
   0x4   : > { %p313_p2 = pnand %p2509_p0, %p312_p1 }
   0x6   : > { %316 = sbr.rel (%p313_p2) target bundleno = 1652 (0x674), region = 60 }
   0xb   : > { %v377_v0 = vld [vmem:[%s5160_s2 + $0x28] sm:$0xff]  ;;  %p350_p3 = scmp.lt.s32.totalorder %s2505_s14, 1  ;;  %v5170_v1 = vmov 0   ;;  %v5169_v2 = vmov 0.0   ;;  %v376_v3 = vld [vmem:[%s5160_s2 + $0x20] sm:$0xff]  ;;  %v2813_v4 = vld [vmem:[%s5161_s3 + $0x38] sm:$0xff] }
   0xc   : > { %2631 = vset.pattern.permute.xlu1 %v5170_v1  ;;  %509 = vmatprep.mubr.f32.mxu0 %v5169_v2  ;;  %v2719_v5 = vmov 2   ;;  %v374_v9 = vld [vmem:[%s5160_s2 + $0x10] sm:$0xff]  ;;  %v364_v11 = vld [vmem:[%s5159_s1] sm:$0xff]  ;;  %vm5293_vm0 = vcmask 130048   ;;  %v379_v14 = vld [vmem:[%s5160_s2 + $0x38] sm:$0xff]  ;;  %v5172_v20 = vmov 1  }
   0xd   : > { %407 = vperm.xlu1 %2631, %v377_v0   ;;  %s5814_s14 = smov (!%p350_p3, %s2505_s14), 1  ;;  %533 = vmatprep.mubr.f32.mxu1 %v5169_v2  ;;  %v368_v12 = vld [vmem:[%s5159_s1 + $0x20] sm:$0xff]  ;;  %v365_v15 = vld [vmem:[%s5159_s1 + $0x8] sm:$0xff]  ;;  %v2859_v17 = vld [vmem:[%s5160_s2 + $0x30] sm:$0xff]  ;;  %v5182_v29 = vmov 4   ;;  %v2722_v31 = vmov 3  }
   0xe   : > { %2633 = vset.pattern.permute.xlu0 %v2719_v5  ;;  %s2543_s21 = sshll.u32 %s5814_s14, 5  ;;  %v372_v13 = vld [vmem:[%s5160_s2] sm:$0xff]  ;;  %v369_v16 = vld [vmem:[%s5159_s1 + $0x28] sm:$0xff]  ;;  %v366_v18 = vld [vmem:[%s5159_s1 + $0x10] sm:$0xff]  ;;  %v5180_v32 = vmov 5   ;;  %v5174_v34 = vmov 6  }
   0xf   : > { %1033 = vperm.xlu0 %2633, %v2813_v4   ;;  %s2823_s24 = scalar_lea.vmem %s5158_s0, %s2543_s21  ;;  %v370_v19 = vld [vmem:[%s5159_s1 + $0x30] sm:$0xff]  ;;  %v375_v21 = vld [vmem:[%s5160_s2 + $0x18] sm:$0xff]  ;;  %v373_v25 = vld [vmem:[%s5160_s2 + $0x8] sm:$0xff]  ;;  %v5178_v35 = vmov 7   ;;  %v5176_v37 = vmov 8   ;;  %s2727_s17 = smov 15  }
  0x10   : > { %v363_v6 = vld [vmem:[%s2823_s24 + $0x18] sm:$0xff]  ;;  %v362_v7 = vld [vmem:[%s2823_s24 + $0x10] sm:$0xff]  ;;  %v361_v8 = vld [vmem:[%s2823_s24 + $0x8] sm:$0xff]  ;;  %s2728_s18 = smov 17   ;;  %s2729_s19 = smov 16  }
  0x11   : > { %402 = vperm.xlu1 %2631, %v376_v3   ;;  %473 = vmatprep.subr.mxu0 %v363_v6  ;;  %v360_v10 = vld [vmem:[%s2823_s24] sm:$0xff]  ;;  %v2882_v22 = vld [vmem:[%s5161_s3 + $0x30] sm:$0xff]  ;;  %v367_v23 = vld [vmem:[%s5159_s1 + $0x18] sm:$0xff]  ;;  %s2730_s20 = smov 1   ;;  %s2731_s22 = smov 127  }
  0x12   : > { %2600 = vmatprep.subr.mxu1 %v363_v6  ;;  %474 = vmatpush1.msra.mxu0 %v362_v7  ;;  %v371_v24 = vld [vmem:[%s5159_s1 + $0x38] sm:$0xff]  ;;  %v2900_v26 = vld [vmem:[%s5161_s3 + $0x28] sm:$0xff]  ;;  %v2910_v27 = vld [vmem:[%s5161_s3 + $0x20] sm:$0xff]  ;;  %s2732_s23 = smov 113   ;;  %s2733_s25 = smov 112  }
  0x13   : > { %2602 = vmatpush1.msra.mxu1 %v362_v7  ;;  %475 = vmatprep.subr.mxu0 %v361_v8  ;;  %v2922_v28 = vld [vmem:[%s5161_s3 + $0x8] sm:$0xff]  ;;  %v2930_v30 = vld [vmem:[%s5161_s3 + $0x18] sm:$0xff]  ;;  %v2945_v33 = vld [vmem:[%s5161_s3 + $0x10] sm:$0xff]  ;;  %s2734_s26 = smov 111   ;;  %s359_s16 = scalar_lea.vmem %s5168_s10, %s2543_s21 }
  0x14   : > { %2601 = vmatprep.subr.mxu1 %v361_v8  ;;  %476 = vmatpush1.msra.mxu0 %v360_v10  ;;  %v2969_v36 = vld [vmem:[%s5161_s3] sm:$0xff] }
  0x15   : > { %392 = vperm.xlu1 %2631, %v374_v9   ;;  %2603 = vmatpush1.msra.mxu1 %v360_v10 }
  0x16   : > { %2514 = vmatmul.mubr.msk.f32.vlgmr.msra.gmra.mxu0 %vm5293_vm0, %v364_v11  ;;  %2518 = vmatmul.mubr.msk.f32.vlgmr.msra.gmra.mxu1 %vm5293_vm0, %v368_v12 }
  0x17   : > { %515 = vmatprep.mubr.f32.mxu0 %v5169_v2  ;;  %539 = vmatprep.mubr.f32.mxu1 %v5169_v2 }
  0x18   : > { %2634 = vset.pattern.permute.xlu0 %v5170_v1 }
  0x19   : > { %382 = vperm.xlu1 %2631, %v372_v13   ;;  %417 = vperm.xlu0 %2634, %v379_v14  }
  0x1a   : > { %2515 = vmatmul.mubr.msk.f32.gmra.mxu0 %vm5293_vm0, %v365_v15  ;;  %2519 = vmatmul.mubr.msk.f32.gmra.mxu1 %vm5293_vm0, %v369_v16 }
  0x1b   : > { %521 = vmatprep.mubr.f32.mxu0 %v5169_v2  ;;  %545 = vmatprep.mubr.f32.mxu1 %v5169_v2 }
  0x1d   : > { %2632 = vset.pattern.permute.xlu1 %v5172_v20  ;;  %412 = vperm.xlu0 %2634, %v2859_v17  }
  0x1e   : > { %890 = vperm.xlu1 %2632, %v2813_v4   ;;  %2516 = vmatmul.mubr.msk.f32.gmra.mxu0 %vm5293_vm0, %v366_v18 }
  0x1f   : > { %2520 = vmatmul.mubr.msk.f32.gmra.mxu1 %vm5293_vm0, %v370_v19  ;;  %527 = vmatprep.mubr.f32.mxu0 %v5169_v2 }
  0x20   : > { %551 = vmatprep.mubr.f32.mxu1 %v5169_v2 }
  0x21   : > { %397 = vperm.xlu0 %2634, %v375_v21  }
  0x22   : > { %886 = vperm.xlu1 %2632, %v2882_v22   ;;  %2517 = vmatmul.mubr.msk.f32.gmra.mxu0 %vm5293_vm0, %v367_v23 }
  0x23   : > { %2521 = vmatmul.mubr.msk.f32.gmra.mxu1 %vm5293_vm0, %v371_v24  ;;  %2429 = vmatprep.mubr.f32.mxu0 %v5169_v2 }
  0x25   : > { %387 = vperm.xlu0 %2634, %v373_v25  }
  0x26   : > { %882 = vperm.xlu1 %2632, %v2900_v26  }
  0x29   : > { %763 = vperm.xlu0 %2634, %v2813_v4  }
  0x2a   : > { %2635 = vset.pattern.permute.xlu1 %v2719_v5 }
  0x2b   : > { %1029 = vperm.xlu1 %2635, %v2882_v22  }
  0x2d   : > { %758 = vperm.xlu0 %2634, %v2882_v22  }
  0x2f   : > { %2636 = vset.pattern.permute.xlu1 %v5172_v20 }
  0x30   : > { %878 = vperm.xlu1 %2636, %v2910_v27  }
  0x31   : > { %753 = vperm.xlu0 %2634, %v2900_v26  }
  0x34   : > { %2637 = vset.pattern.permute.xlu1 %v2719_v5 }
  0x35   : > { %1025 = vperm.xlu1 %2637, %v2900_v26   ;;  %748 = vperm.xlu0 %2634, %v2910_v27  }
  0x39   : > { %2638 = vset.pattern.permute.xlu1 %v5182_v29  ;;  %733 = vperm.xlu0 %2634, %v2922_v28  }
  0x3a   : > { %1240 = vperm.xlu1 %2638, %v2813_v4  }
  0x3d   : > { %2648 = vset.pattern.permute.xlu0 %v2722_v31 }
  0x3e   : > { %2639 = vset.pattern.permute.xlu1 %v5170_v1  ;;  %1176 = vperm.xlu0 %2648, %v2813_v4  }
  0x3f   : > { %743 = vperm.xlu1 %2639, %v2930_v30  }
  0x42   : > { %1172 = vperm.xlu0 %2648, %v2882_v22  }
  0x43   : > { %2640 = vset.pattern.permute.xlu1 %v2719_v5 }
  0x44   : > { %1021 = vperm.xlu1 %2640, %v2910_v27  }
  0x46   : > { %1160 = vperm.xlu0 %2648, %v2930_v30  }
  0x48   : > { %2641 = vset.pattern.permute.xlu1 %v2722_v31 }
  0x49   : > { %1168 = vperm.xlu1 %2641, %v2900_v26  }
  0x4d   : > { %2642 = vset.pattern.permute.xlu1 %v5180_v32 }
  0x4e   : > { %1383 = vperm.xlu1 %2642, %v2813_v4  }
  0x52   : > { %2643 = vset.pattern.permute.xlu1 %v5170_v1 }
  0x53   : > { %738 = vperm.xlu1 %2643, %v2945_v33  }
  0x57   : > { %2644 = vset.pattern.permute.xlu1 %v2719_v5 }
  0x58   : > { %1017 = vperm.xlu1 %2644, %v2930_v30  }
  0x5c   : > { %2645 = vset.pattern.permute.xlu1 %v2722_v31 }
  0x5d   : > { %1164 = vperm.xlu1 %2645, %v2910_v27  }
  0x61   : > { %2646 = vset.pattern.permute.xlu1 %v5180_v32 }
  0x62   : > { %1379 = vperm.xlu1 %2646, %v2882_v22  }
  0x66   : > { %2647 = vset.pattern.permute.xlu1 %v5174_v34 }
  0x67   : > { %1526 = vperm.xlu1 %2647, %v2813_v4  }
  0x6b   : > { %2649 = vset.pattern.permute.xlu1 %v5172_v20 }
  0x6c   : > { %866 = vperm.xlu1 %2649, %v2922_v28  }
  0x70   : > { %2650 = vset.pattern.permute.xlu1 %v2719_v5 }
  0x71   : > { %1013 = vperm.xlu1 %2650, %v2945_v33  }
  0x75   : > { %2651 = vset.pattern.permute.xlu1 %v5182_v29 }
  0x76   : > { %1228 = vperm.xlu1 %2651, %v2910_v27  }
  0x7a   : > { %2652 = vset.pattern.permute.xlu1 %v5180_v32 }
  0x7b   : > { %1375 = vperm.xlu1 %2652, %v2900_v26  }
  0x7f   : > { %2653 = vset.pattern.permute.xlu1 %v5178_v35 }
  0x80   : > { %1669 = vperm.xlu1 %2653, %v2813_v4  }
  0x84   : > { %2654 = vset.pattern.permute.xlu1 %v5170_v1 }
  0x85   : > { %728 = vperm.xlu1 %2654, %v2969_v36  }
  0x88   : > { %v408_v38 = vpop.permute.xlu1 %407 }
  0x89   : > { %2655 = vset.pattern.permute.xlu1 %v2719_v5 }
  0x8a   : > { %1009 = vperm.xlu1 %2655, %v2922_v28   ;;  %v2997_v47 = vpop.permute.xlu0 %1033 }
  0x8b   : > { %5357 = vst [vmem:[#allocation5_spill] sm:$0xff] %v2997_v47 }
  0x8c   : > { %v403_v39 = vpop.permute.xlu1 %402 }
  0x8e   : > { %2656 = vset.pattern.permute.xlu1 %v2722_v31 }
  0x8f   : > { %1156 = vperm.xlu1 %2656, %v2945_v33  }
  0x90   : > { %v2983_v40 = vpop.permute.xlu1 %392 }
  0x93   : > { %2657 = vset.pattern.permute.xlu1 %v5180_v32 }
  0x94   : > { %1371 = vperm.xlu1 %2657, %v2910_v27   ;;  %v2985_v41 = vpop.permute.xlu1 %382  ;;  %v3001_v49 = vpop.permute.xlu0 %417 }
  0x98   : > { %2658 = vset.pattern.permute.xlu1 %v5174_v34  ;;  %v413_v57 = vpop.permute.xlu0 %412 }
  0x99   : > { %1518 = vperm.xlu1 %2658, %v2900_v26   ;;  %v2987_v42 = vpop.permute.xlu1 %890 }
  0x9a   : > { %5354 = vst [vmem:[#allocation2_spill] sm:$0xff] %v2987_v42  ;;  %v5392_v42 = vmov 7  }
  0x9c   : > { %v3009_v6 = vpop.permute.xlu0 %397 }
  0x9d   : > { %2659 = vset.pattern.permute.xlu1 %v5176_v37  ;;  %v2989_v43 = vpop.permute.xlu1 %886 }
  0x9e   : > { %1812 = vperm.xlu1 %2659, %v2813_v4   ;;  %5355 = vst [vmem:[#allocation3_spill] sm:$0xff] %v2989_v43  ;;  %v5395_v43 = vmov 8  }
  0xa0   : > { %v388_v16 = vpop.permute.xlu0 %387 }
  0xa1   : > { %v2991_v44 = vpop.permute.xlu1 %882 }
  0xa2   : > { %2660 = vset.pattern.permute.xlu1 %v2719_v5 }
  0xa6   : > { %v2993_v45 = vpop.permute.xlu1 %1029 }
  0xa7   : > { %5356 = vst [vmem:[#allocation4_spill] sm:$0xff] %v2993_v45 }
  0xab   : > { %v2995_v46 = vpop.permute.xlu1 %878 }
  0xb0   : > { %v2999_v48 = vpop.permute.xlu1 %1025 }
  0xb5   : > { %v3003_v53 = vpop.permute.xlu1 %1240 }
  0xba   : > { %v3005_v0 = vpop.permute.xlu1 %743 }
  0xbb   : > { %5358 = vst [vmem:[#allocation6_spill] sm:$0xff] %v3005_v0 }
  0xbf   : > { %v3019_v12 = vpop.permute.xlu1 %1021 }
  0xc4   : > { %v3027_v24 = vpop.permute.xlu1 %1168 }
  0xd6   : > { %v535_v50 = vpop.f32.mrf.mxu1  ;;  %v3007_v3 = vpop.f32.mrf.mxu0 }
  0xd7   : > { %v536_v51 = vadd.f32 %v535_v50, %v403_v39 }
  0xd8   : > { %v537_v52 = vpop.f32.mrf.mxu1  ;;  %v3013_v11 = vpop.f32.mrf.mxu0 }
  0xd9   : > { %v566_v54 = vadd.f32 3.0, %v536_v51  ;;  %v538_v55 = vadd.f32 %v537_v52, %v403_v39 }
  0xda   : > { %v541_v56 = vpop.f32.mrf.mxu1  ;;  %v517_v18 = vpop.f32.mrf.mxu0 }
  0xdb   : > { %v582_v58 = vmax.f32 %v566_v54, 0.0  ;;  %v567_v59 = vadd.f32 3.0, %v538_v55  ;;  %v542_v62 = vadd.f32 %v541_v56, %v408_v38  ;;  %v518_v19 = vadd.f32 %v517_v18, %v388_v16  ;;  %v3037_v54 = vpop.permute.xlu1 %1383 }
  0xdc   : > { %v543_v63 = vpop.f32.mrf.mxu1  ;;  %v519_v31 = vpop.f32.mrf.mxu0  ;;  %5359 = vst [vmem:[#allocation7_spill] sm:$0xff] %v3037_v54 }
  0xdd   : > { %v598_v60 = vmin.f32 %v582_v58, 6.0  ;;  %v583_v61 = vmax.f32 %v567_v59, 0.0  ;;  %v568_v9 = vadd.f32 3.0, %v542_v62  ;;  %v544_v10 = vadd.f32 %v543_v63, %v408_v38 }
  0xde   : > { %v560_v25 = vadd.f32 3.0, %v518_v19  ;;  %v520_v39 = vadd.f32 %v519_v31, %v388_v16 }
  0xdf   : > { %v614_v4 = vmul.f32 %v598_v60, %v536_v51  ;;  %v599_v5 = vmin.f32 %v583_v61, 6.0  ;;  %v584_v14 = vmax.f32 %v568_v9, 0.0  ;;  %v569_v15 = vadd.f32 3.0, %v544_v10  ;;  %v547_v51 = vpop.f32.mrf.mxu1  ;;  %v3047_v9 = vpop.permute.xlu1 %738 }
  0xe0   : > { %v576_v52 = vmax.f32 %v560_v25, 0.0  ;;  %v561_v56 = vadd.f32 3.0, %v520_v39  ;;  %v548_v59 = vadd.f32 %v547_v51, %v413_v57  ;;  %5362 = vst [vmem:[#allocation10_spill] sm:$0xff] %v3047_v9 }
  0xe1   : > { %v3011_v7 = vmul.f32 0.16666667, %v614_v4  ;;  %v615_v8 = vmul.f32 %v599_v5, %v538_v55  ;;  %v600_v21 = vmin.f32 %v584_v14, 6.0  ;;  %v585_v23 = vmax.f32 %v569_v15, 0.0  ;;  %v549_v60 = vpop.f32.mrf.mxu1 }
  0xe2   : > { %v592_v61 = vmin.f32 %v576_v52, 6.0  ;;  %v570_v4 = vadd.f32 3.0, %v548_v59  ;;  %v550_v5 = vadd.f32 %v549_v60, %v413_v57 }
  0xe3   : > { %933 = vrot.lane.b32.xlu0 %v3011_v7, %s2727_s17  ;;  %654 = vrot.lane.b32.xlu1 %v3011_v7, %s2728_s18  ;;  %v3021_v13 = vmul.f32 0.16666667, %v615_v8  ;;  %v616_v38 = vmul.f32 %v600_v21, %v542_v62  ;;  %v601_v50 = vmin.f32 %v585_v23, 6.0  ;;  %v577_v62 = vmax.f32 %v561_v56, 0.0  ;;  %v523_v8 = vpop.f32.mrf.mxu0  ;;  %v3060_v23 = vpop.permute.xlu1 %1017 }
  0xe4   : > { %v586_v15 = vmax.f32 %v570_v4, 0.0  ;;  %v571_v16 = vadd.f32 3.0, %v550_v5  ;;  %v524_v21 = vadd.f32 %v523_v8, %v2983_v40  ;;  %5364 = vst [vmem:[#allocation12_spill] sm:$0xff] %v3060_v23  ;;  %v553_v4 = vpop.f32.mrf.mxu1 }
  0xe5   : > { %v3039_v55 = vmul.f32 0.16666667, %v616_v38  ;;  %v617_v58 = vmul.f32 %v601_v50, %v544_v10  ;;  %v608_v10 = vmul.f32 %v592_v61, %v518_v19  ;;  %v593_v14 = vmin.f32 %v577_v62, 6.0  ;;  %v525_v18 = vpop.f32.mrf.mxu0 }
  0xe6   : > { %v602_v31 = vmin.f32 %v586_v15, 6.0  ;;  %v526_v19 = vadd.f32 %v525_v18, %v2983_v40  ;;  %v587_v38 = vmax.f32 %v571_v16, 0.0  ;;  %v562_v50 = vadd.f32 3.0, %v524_v21 }
  0xe7   : > { %670 = vrot.lane.b32.xlu0 %v3021_v13, %s2728_s18  ;;  %790 = vrot.lane.b32.xlu1 %v3011_v7, %s2729_s19  ;;  %5360 = vst [vmem:[#allocation8_spill] sm:$0xff] %v3039_v55  ;;  %v3045_v63 = vmul.f32 0.16666667, %v617_v58  ;;  %v3057_v57 = vmul.f32 0.16666667, %v608_v10  ;;  %v609_v25 = vmul.f32 %v593_v14, %v520_v39  ;;  %v3069_v60 = vpop.permute.xlu1 %1164  ;;  %v554_v15 = vadd.f32 %v553_v4, %v3001_v49 }
  0xe8   : > { %v618_v52 = vmul.f32 %v602_v31, %v548_v59  ;;  %v563_v56 = vadd.f32 3.0, %v526_v19  ;;  %v603_v58 = vmin.f32 %v587_v38, 6.0  ;;  %v578_v40 = vmax.f32 %v562_v50, 0.0 }
  0xe9   : > { %5361 = vst [vmem:[#allocation9_spill] sm:$0xff] %v3045_v63  ;;  %5363 = vst [vmem:[#allocation11_spill] sm:$0xff] %v3057_v57  ;;  %v3067_v51 = vmul.f32 0.16666667, %v609_v25  ;;  %v572_v18 = vadd.f32 3.0, %v554_v15  ;;  %v529_v25 = vpop.f32.mrf.mxu0 }
  0xea   : > { %v3075_v39 = vmul.f32 0.16666667, %v618_v52  ;;  %v579_v61 = vmax.f32 %v563_v56, 0.0  ;;  %v619_v62 = vmul.f32 %v603_v58, %v550_v5  ;;  %v594_v59 = vmin.f32 %v578_v40, 6.0 }
  0xeb   : > { %806 = vrot.lane.b32.xlu0 %v3021_v13, %s2729_s19  ;;  %1076 = vrot.lane.b32.xlu1 %v3011_v7, %s2730_s20  ;;  %5365 = vst [vmem:[#allocation13_spill] sm:$0xff] %v3067_v51  ;;  %v3083_v14 = vpop.permute.xlu1 %1379  ;;  %v530_v52 = vadd.f32 %v529_v25, %v3009_v6  ;;  %v588_v56 = vmax.f32 %v572_v18, 0.0 }
  0xec   : > { %5366 = vst [vmem:[#allocation14_spill] sm:$0xff] %v3075_v39  ;;  %v595_v8 = vmin.f32 %v579_v61, 6.0  ;;  %v3081_v10 = vmul.f32 0.16666667, %v619_v62  ;;  %5368 = vst [vmem:[#allocation16_spill] sm:$0xff] %v3083_v14  ;;  %v610_v5 = vmul.f32 %v594_v59, %v524_v21  ;;  %v555_v62 = vpop.f32.mrf.mxu1 }
  0xed   : > { %v564_v21 = vadd.f32 3.0, %v530_v52 }
  0xee   : > { %5367 = vst [vmem:[#allocation15_spill] sm:$0xff] %v3081_v10  ;;  %v611_v16 = vmul.f32 %v595_v8, %v526_v19  ;;  %v3096_v38 = vmul.f32 0.16666667, %v610_v5  ;;  %v604_v19 = vmin.f32 %v588_v56, 6.0  ;;  %v556_v5 = vadd.f32 %v555_v62, %v3001_v49 }
  0xef   : > { %1092 = vrot.lane.b32.xlu0 %v3021_v13, %s2730_s20  ;;  %949 = vrot.lane.b32.xlu1 %v3021_v13, %s2727_s17  ;;  %v3090_v31 = vpop.permute.xlu1 %1526  ;;  %v580_v40 = vmax.f32 %v564_v21, 0.0  ;;  %v3134_v21 = vpop.permute.xlu0 %763 }
  0xf0   : > { %5369 = vst [vmem:[#allocation17_spill] sm:$0xff] %v3090_v31  ;;  %5370 = vst [vmem:[#allocation18_spill] sm:$0xff] %v3096_v38  ;;  %v3098_v50 = vmul.f32 0.16666667, %v611_v16  ;;  %v620_v61 = vmul.f32 %v604_v19, %v554_v15  ;;  %v573_v16 = vadd.f32 3.0, %v556_v5  ;;  %v531_v19 = vpop.f32.mrf.mxu0 }
  0xf1   : > { %v596_v59 = vmin.f32 %v580_v40, 6.0  ;;  %5375 = vst [vmem:[#allocation23_spill] sm:$0xff] %v3134_v21  ;;  %v532_v62 = vadd.f32 %v531_v19, %v3009_v6  ;;  %v512_v6 = vadd.f32 %v3007_v3, %v2985_v41 }
  0xf2   : > { %v3117_v8 = vmul.f32 0.16666667, %v620_v61  ;;  %v589_v56 = vmax.f32 %v573_v16, 0.0 }
  0xf3   : > { %1078 = vrot.lane.b32.xlu0 %v3039_v55, %s2730_s20  ;;  %656 = vrot.lane.b32.xlu1 %v3039_v55, %s2728_s18  ;;  %v3105_v58 = vpop.permute.xlu1 %866  ;;  %v612_v15 = vmul.f32 %v596_v59, %v530_v52  ;;  %v3146_v61 = vpop.permute.xlu0 %758  ;;  %v558_v19 = vadd.f32 3.0, %v512_v6 }
  0xf4   : > { %5371 = vst [vmem:[#allocation19_spill] sm:$0xff] %v3105_v58  ;;  %v605_v52 = vmin.f32 %v589_v56, 6.0  ;;  %5377 = vst [vmem:[#allocation25_spill] sm:$0xff] %v3146_v61 }
  0xf5   : > { %v3130_v25 = vmul.f32 0.16666667, %v612_v15  ;;  %v565_v15 = vadd.f32 3.0, %v532_v62  ;;  %v574_v3 = vmax.f32 %v558_v19, 0.0 }
  0xf6   : > { %v621_v59 = vmul.f32 %v605_v52, %v556_v5 }
  0xf7   : > { %672 = vrot.lane.b32.xlu0 %v3045_v63, %s2728_s18  ;;  %792 = vrot.lane.b32.xlu1 %v3039_v55, %s2729_s19  ;;  %v3111_v4 = vpop.permute.xlu1 %1013  ;;  %5373 = vst [vmem:[#allocation21_spill] sm:$0xff] %v3130_v25  ;;  %v3157_v2 = vpop.permute.xlu0 %753  ;;  %v581_v5 = vmax.f32 %v565_v15, 0.0  ;;  %v590_v37 = vmin.f32 %v574_v3, 6.0 }
  0xf8   : > { %5372 = vst [vmem:[#allocation20_spill] sm:$0xff] %v3111_v4  ;;  %v3153_v16 = vmul.f32 0.16666667, %v621_v59 }
  0xf9   : > { %v597_v1 = vmin.f32 %v581_v5, 6.0  ;;  %v606_v19 = vmul.f32 %v590_v37, %v512_v6 }
  0xfb   : > { %808 = vrot.lane.b32.xlu0 %v3045_v63, %s2729_s19  ;;  %935 = vrot.lane.b32.xlu1 %v3039_v55, %s2727_s17  ;;  %v3124_v18 = vpop.permute.xlu1 %1228  ;;  %v3171_v59 = vpop.permute.xlu0 %748  ;;  %v613_v15 = vmul.f32 %v597_v1, %v532_v62  ;;  %v3198_v35 = vmul.f32 0.16666667, %v606_v19 }
  0xfd   : > { %v3185_v5 = vmul.f32 0.16666667, %v613_v15  ;;  %5385 = vst [vmem:[#allocation33_spill] sm:$0xff] %v3198_v35 }
  0xff   : > { %951 = vrot.lane.b32.xlu0 %v3045_v63, %s2727_s17  ;;  %648 = vrot.lane.b32.xlu1 %v3057_v57, %s2728_s18  ;;  %v3132_v49 = vpop.permute.xlu1 %1375  ;;  %v3179_v34 = vpop.permute.xlu0 %733  ;;  %5382 = vst [vmem:[#allocation30_spill] sm:$0xff] %v3185_v5 }
 0x100   : > { %5374 = vst [vmem:[#allocation22_spill] sm:$0xff] %v3132_v49  ;;  %5381 = vst [vmem:[#allocation29_spill] sm:$0xff] %v3179_v34  ;;  %v5390_v49 = vmov 4  }
 0x103   : > { %664 = vrot.lane.b32.xlu0 %v3067_v51, %s2728_s18  ;;  %1094 = vrot.lane.b32.xlu1 %v3045_v63, %s2730_s20  ;;  %v3144_v40 = vpop.permute.xlu1 %1669  ;;  %v3191_v1 = vpop.permute.xlu0 %1176 }
 0x104   : > { %5376 = vst [vmem:[#allocation24_spill] sm:$0xff] %v3144_v40  ;;  %5383 = vst [vmem:[#allocation31_spill] sm:$0xff] %v3191_v1 }
 0x107   : > { %794 = vrot.lane.b32.xlu0 %v3075_v39, %s2729_s19  ;;  %658 = vrot.lane.b32.xlu1 %v3075_v39, %s2728_s18  ;;  %v3155_v56 = vpop.permute.xlu1 %728  ;;  %v3200_v3 = vpop.permute.xlu0 %1172 }
 0x108   : > { %5378 = vst [vmem:[#allocation26_spill] sm:$0xff] %v3155_v56  ;;  %5386 = vst [vmem:[#allocation34_spill] sm:$0xff] %v3200_v3 }
 0x10b   : > { %953 = vrot.lane.b32.xlu0 %v3081_v10, %s2727_s17  ;;  %937 = vrot.lane.b32.xlu1 %v3075_v39, %s2727_s17  ;;  %v3169_v52 = vpop.permute.xlu1 %1009  ;;  %v3212_v37 = vpop.permute.xlu0 %1160 }
 0x10c   : > { %5379 = vst [vmem:[#allocation27_spill] sm:$0xff] %v3169_v52  ;;  %5388 = vst [vmem:[#allocation36_spill] sm:$0xff] %v3212_v37 }
 0x10f   : > { %1096 = vrot.lane.b32.xlu0 %v3081_v10, %s2730_s20  ;;  %1080 = vrot.lane.b32.xlu1 %v3075_v39, %s2730_s20  ;;  %v3177_v20 = vpop.permute.xlu1 %1156 }
 0x110   : > { %5380 = vst [vmem:[#allocation28_spill] sm:$0xff] %v3177_v20 }
 0x113   : > { %666 = vrot.lane.b32.xlu0 %v3098_v50, %s2728_s18  ;;  %650 = vrot.lane.b32.xlu1 %v3096_v38, %s2728_s18  ;;  %v3193_v62 = vpop.permute.xlu1 %1371 }
 0x114   : > { %5384 = vst [vmem:[#allocation32_spill] sm:$0xff] %v3193_v62 }
 0x117   : > { %802 = vrot.lane.b32.xlu0 %v3098_v50, %s2729_s19  ;;  %786 = vrot.lane.b32.xlu1 %v3096_v38, %s2729_s19  ;;  %v3202_v15 = vpop.permute.xlu1 %1518 }
 0x118   : > { %5387 = vst [vmem:[#allocation35_spill] sm:$0xff] %v3202_v15  ;;  %v514_v15 = vadd.f32 %v3013_v11, %v2985_v41  ;;  %v5391_v41 = vmov 5  }
 0x11a   : > { %v559_v4 = vadd.f32 3.0, %v514_v15 }
 0x11b   : > { %1303 = vrot.lane.b32.xlu0 %v3081_v10, %s2731_s22  ;;  %1287 = vrot.lane.b32.xlu1 %v3075_v39, %s2731_s22  ;;  %v3214_v6 = vpop.permute.xlu1 %1812 }
 0x11c   : > { %5389 = vst [vmem:[#allocation37_spill] sm:$0xff] %v3214_v6  ;;  %v575_v11 = vmax.f32 %v559_v4, 0.0 }
 0x11e   : > { %v591_v47 = vmin.f32 %v575_v11, 6.0 }
 0x11f   : > { %796 = vrot.lane.b32.xlu0 %v3117_v8, %s2729_s19  ;;  %674 = vrot.lane.b32.xlu1 %v3081_v10, %s2728_s18 }
 0x120   : > { %v607_v4 = vmul.f32 %v591_v47, %v514_v15  ;;  %v5397_v47 = vmov 6  }
 0x122   : > { %v3298_v11 = vmul.f32 0.16666667, %v607_v4 }
 0x123   : > { %939 = vrot.lane.b32.xlu0 %v3117_v8, %s2727_s17  ;;  %810 = vrot.lane.b32.xlu1 %v3081_v10, %s2729_s19 }
 0x127   : > { %652 = vrot.lane.b32.xlu0 %v3130_v25, %s2728_s18  ;;  %660 = vrot.lane.b32.xlu1 %v3117_v8, %s2728_s18 }
 0x12b   : > { %788 = vrot.lane.b32.xlu0 %v3130_v25, %s2729_s19  ;;  %1082 = vrot.lane.b32.xlu1 %v3117_v8, %s2730_s20 }
 0x12f   : > { %1289 = vrot.lane.b32.xlu0 %v3117_v8, %s2731_s22  ;;  %931 = vrot.lane.b32.xlu1 %v3130_v25, %s2727_s17 }
 0x133   : > { %1098 = vrot.lane.b32.xlu0 %v3153_v16, %s2730_s20  ;;  %1432 = vrot.lane.b32.xlu1 %v3117_v8, %s2732_s23 }
 0x137   : > { %800 = vrot.lane.b32.xlu0 %v3067_v51, %s2729_s19  ;;  %676 = vrot.lane.b32.xlu1 %v3153_v16, %s2728_s18 }
 0x13b   : > { %945 = vrot.lane.b32.xlu0 %v3098_v50, %s2727_s17  ;;  %812 = vrot.lane.b32.xlu1 %v3153_v16, %s2729_s19 }
 0x13f   : > { %1301 = vrot.lane.b32.xlu0 %v3045_v63, %s2731_s22  ;;  %955 = vrot.lane.b32.xlu1 %v3153_v16, %s2727_s17 }
 0x143   : > { %1446 = vrot.lane.b32.xlu0 %v3081_v10, %s2732_s23  ;;  %668 = vrot.lane.b32.xlu1 %v3185_v5, %s2728_s18 }
 0x147   : > { %1152 = vperm.xlu0 %2648, %v2922_v28   ;;  %804 = vrot.lane.b32.xlu1 %v3185_v5, %s2729_s19 }
 0x14b   : > { %1305 = vrot.lane.b32.xlu1 %v3153_v16, %s2731_s22  ;;  %646 = vrot.lane.b32.xlu0 %v3198_v35, %s2728_s18 }
 0x14f   : > { %784 = vrot.lane.b32.xlu1 %v3057_v57, %s2729_s19  ;;  %782 = vrot.lane.b32.xlu0 %v3198_v35, %s2729_s19 }
 0x153   : > { %929 = vrot.lane.b32.xlu1 %v3096_v38, %s2727_s17  ;;  %927 = vrot.lane.b32.xlu0 %v3057_v57, %s2727_s17 }
 0x155   : > { %v3220_v19 = vpop.permute.xlu0 %933  ;;  %v3222_v32 = vpop.permute.xlu1 %654 }
 0x157   : > { %1074 = vrot.lane.b32.xlu1 %v3130_v25, %s2730_s20  ;;  %1072 = vrot.lane.b32.xlu0 %v3096_v38, %s2730_s20 }
 0x159   : > { %v3228_v29 = vpop.permute.xlu0 %670  ;;  %v3230_v20 = vpop.permute.xlu1 %790 }
 0x15b   : > { %1285 = vrot.lane.b32.xlu1 %v3039_v55, %s2731_s22  ;;  %1283 = vrot.lane.b32.xlu0 %v3011_v7, %s2731_s22 }
 0x15d   : > { %v3236_v6 = vpop.permute.xlu0 %806  ;;  %v3238_v56 = vpop.permute.xlu1 %1076 }
 0x15f   : > { %1430 = vrot.lane.b32.xlu1 %v3075_v39, %s2732_s23  ;;  %1428 = vrot.lane.b32.xlu0 %v3039_v55, %s2732_s23 }
 0x161   : > { %v3244_v52 = vpop.permute.xlu0 %1092  ;;  %v3246_v37 = vpop.permute.xlu1 %949 }
 0x163   : > { %1575 = vrot.lane.b32.xlu1 %v3117_v8, %s2733_s25  ;;  %1573 = vrot.lane.b32.xlu0 %v3075_v39, %s2733_s25 }
 0x165   : > { %v3252_v40 = vpop.permute.xlu0 %1078  ;;  %v3254_v31 = vpop.permute.xlu1 %656 }
 0x167   : > { %1005 = vperm.xlu1 %2660, %v2969_v36   ;;  %947 = vrot.lane.b32.xlu0 %v3185_v5, %s2727_s17 }
 0x169   : > { %v3261_v62 = vpop.permute.xlu0 %672  ;;  %v3263_v23 = vpop.permute.xlu1 %792 }
 0x16b   : > { %2661 = vset.pattern.permute.xlu1 %v5390_v49  ;;  %1448 = vrot.lane.b32.xlu0 %v3153_v16, %s2732_s23 }
 0x16c   : > { %1220 = vperm.xlu1 %2661, %v2945_v33  }
 0x16d   : > { %v3269_v58 = vpop.permute.xlu0 %808  ;;  %v3271_v54 = vpop.permute.xlu1 %935 }
 0x16f   : > { %1090 = vrot.lane.b32.xlu0 %v3185_v5, %s2730_s20 }
 0x170   : > { %2662 = vset.pattern.permute.xlu1 %v5391_v41 }
 0x171   : > { %v3276_v0 = vpop.permute.xlu0 %951  ;;  %1367 = vperm.xlu1 %2662, %v2930_v30   ;;  %v3279_v1 = vpop.permute.xlu1 %648 }
 0x173   : > { %1591 = vrot.lane.b32.xlu0 %v3153_v16, %s2733_s25 }
 0x175   : > { %v3283_v21 = vpop.permute.xlu0 %664  ;;  %2663 = vset.pattern.permute.xlu1 %v5392_v42  ;;  %v3286_v14 = vpop.permute.xlu1 %1094 }
 0x176   : > { %1661 = vperm.xlu1 %2663, %v2900_v26  }
 0x177   : > { %1718 = vrot.lane.b32.xlu0 %v3117_v8, %s2734_s26 }
 0x179   : > { %v3291_v61 = vpop.permute.xlu0 %794  ;;  %v3293_v9 = vpop.permute.xlu1 %658 }
 0x17a   : > { %5393 = vst [vmem:[#allocation38_spill] sm:$0xff] %v3291_v61  ;;  %5394 = vst [vmem:[#allocation39_spill] sm:$0xff] %v3293_v9  ;;  %2664 = vset.pattern.permute.xlu1 %v5395_v43 }
 0x17b   : > { %1808 = vperm.xlu1 %2664, %v2882_v22   ;;  %1148 = vperm.xlu0 %2648, %v2969_v36  }
 0x17d   : > { %v3300_v3 = vpop.permute.xlu0 %953  ;;  %v3302_v45 = vpop.permute.xlu1 %937 }
 0x17e   : > { %5396 = vst [vmem:[#allocation40_spill] sm:$0xff] %v3302_v45 }
 0x17f   : > { %662 = vrot.lane.b32.xlu1 %v3298_v11, %s2728_s18  ;;  %2665 = vset.pattern.permute.xlu0 %v5397_v47 }
 0x180   : > { %1522 = vperm.xlu0 %2665, %v2882_v22   ;;  %2666 = vset.pattern.permute.xlu1 %v5390_v49 }
 0x181   : > { %v3309_v15 = vpop.permute.xlu0 %1096  ;;  %v3311_v9 = vpop.permute.xlu1 %1080 }
 0x182   : > { %5398 = vst [vmem:[#allocation41_spill] sm:$0xff] %v3309_v15  ;;  %5399 = vst [vmem:[#allocation42_spill] sm:$0xff] %v3311_v9 }
 0x183   : > { %798 = vrot.lane.b32.xlu1 %v3298_v11, %s2729_s19 }
 0x184   : > { %1514 = vperm.xlu0 %2665, %v2910_v27  }
 0x185   : > { %v3316_v4 = vpop.permute.xlu0 %666  ;;  %v3318_v34 = vpop.permute.xlu1 %650 }
 0x186   : > { %5400 = vst [vmem:[#allocation43_spill] sm:$0xff] %v3316_v4  ;;  %5401 = vst [vmem:[#allocation44_spill] sm:$0xff] %v3318_v34 }
 0x187   : > { %943 = vrot.lane.b32.xlu1 %v3067_v51, %s2727_s17 }
 0x188   : > { %1510 = vperm.xlu0 %2665, %v2930_v30  }
 0x189   : > { %v3323_v61 = vpop.permute.xlu0 %802  ;;  %v3325_v45 = vpop.permute.xlu1 %786 }
 0x18a   : > { %5402 = vst [vmem:[#allocation45_spill] sm:$0xff] %v3323_v61  ;;  %5403 = vst [vmem:[#allocation46_spill] sm:$0xff] %v3325_v45 }
 0x18b   : > { %1088 = vrot.lane.b32.xlu1 %v3098_v50, %s2730_s20 }
 0x18c   : > { %2668 = vset.pattern.permute.xlu0 %v5390_v49 }
 0x18d   : > { %v3330_v9 = vpop.permute.xlu0 %1303  ;;  %v3332_v15 = vpop.permute.xlu1 %1287  ;;  %1236 = vperm.xlu0 %2668, %v2882_v22  }
 0x18e   : > { %5404 = vst [vmem:[#allocation47_spill] sm:$0xff] %v3330_v9  ;;  %5405 = vst [vmem:[#allocation48_spill] sm:$0xff] %v3332_v15 }
 0x18f   : > { %1299 = vrot.lane.b32.xlu1 %v3021_v13, %s2731_s22 }
 0x191   : > { %v3337_v4 = vpop.permute.xlu0 %796  ;;  %v3339_v34 = vpop.permute.xlu1 %674  ;;  %1232 = vperm.xlu0 %2668, %v2900_v26  }
 0x192   : > { %5406 = vst [vmem:[#allocation49_spill] sm:$0xff] %v3337_v4 }
 0x193   : > { %1444 = vrot.lane.b32.xlu1 %v3045_v63, %s2732_s23 }
 0x195   : > { %v3344_v45 = vpop.permute.xlu0 %939  ;;  %v3346_v49 = vpop.permute.xlu1 %810  ;;  %1224 = vperm.xlu0 %2668, %v2930_v30  }
 0x196   : > { %5407 = vst [vmem:[#allocation50_spill] sm:$0xff] %v3344_v45 }
 0x197   : > { %1589 = vrot.lane.b32.xlu1 %v3081_v10, %s2733_s25 }
 0x199   : > { %v3351_v61 = vpop.permute.xlu0 %652  ;;  %v3353_v15 = vpop.permute.xlu1 %660  ;;  %1070 = vrot.lane.b32.xlu0 %v3057_v57, %s2730_s20 }
 0x19a   : > { %5408 = vst [vmem:[#allocation51_spill] sm:$0xff] %v3351_v61  ;;  %5409 = vst [vmem:[#allocation52_spill] sm:$0xff] %v3353_v15 }
 0x19b   : > { %1734 = vrot.lane.b32.xlu1 %v3153_v16, %s2734_s26 }
 0x19d   : > { %v3359_v4 = vpop.permute.xlu0 %788  ;;  %v3361_v45 = vpop.permute.xlu1 %1082  ;;  %1281 = vrot.lane.b32.xlu0 %v3130_v25, %s2731_s22 }
 0x19e   : > { %5410 = vst [vmem:[#allocation53_spill] sm:$0xff] %v3359_v4  ;;  %5411 = vst [vmem:[#allocation54_spill] sm:$0xff] %v3361_v45 }
 0x19f   : > { %1216 = vperm.xlu1 %2666, %v2922_v28  }
 0x1a1   : > { %v3366_v9 = vpop.permute.xlu0 %1289  ;;  %v3368_v61 = vpop.permute.xlu1 %931  ;;  %1426 = vrot.lane.b32.xlu0 %v3011_v7, %s2732_s23 }
 0x1a2   : > { %5412 = vst [vmem:[#allocation55_spill] sm:$0xff] %v3366_v9  ;;  %5413 = vst [vmem:[#allocation56_spill] sm:$0xff] %v3368_v61 }
 0x1a3   : > { %2667 = vset.pattern.permute.xlu1 %v5391_v41 }
 0x1a4   : > { %1363 = vperm.xlu1 %2667, %v2945_v33  }
 0x1a5   : > { %v3374_v15 = vpop.permute.xlu1 %1432  ;;  %1571 = vrot.lane.b32.xlu0 %v3039_v55, %s2733_s25  ;;  %v3378_v4 = vpop.permute.xlu0 %1098 }
 0x1a6   : > { %5414 = vst [vmem:[#allocation57_spill] sm:$0xff] %v3374_v15  ;;  %5415 = vst [vmem:[#allocation58_spill] sm:$0xff] %v3378_v4 }
 0x1a8   : > { %2669 = vset.pattern.permute.xlu1 %v5392_v42 }
 0x1a9   : > { %v3381_v45 = vpop.permute.xlu1 %676  ;;  %1657 = vperm.xlu1 %2669, %v2910_v27   ;;  %1716 = vrot.lane.b32.xlu0 %v3075_v39, %s2734_s26  ;;  %v3386_v61 = vpop.permute.xlu0 %800 }
 0x1aa   : > { %5416 = vst [vmem:[#allocation59_spill] sm:$0xff] %v3381_v45  ;;  %5417 = vst [vmem:[#allocation60_spill] sm:$0xff] %v3386_v61 }
 0x1ad   : > { %v3388_v9 = vpop.permute.xlu1 %812  ;;  %2670 = vset.pattern.permute.xlu1 %v5395_v43  ;;  %1212 = vperm.xlu0 %2668, %v2969_v36   ;;  %v3397_v4 = vpop.permute.xlu0 %945 }
 0x1ae   : > { %1804 = vperm.xlu1 %2670, %v2900_v26   ;;  %5419 = vst [vmem:[#allocation62_spill] sm:$0xff] %v3397_v4 }
 0x1b1   : > { %v3393_v15 = vpop.permute.xlu1 %955  ;;  %1068 = vrot.lane.b32.xlu0 %v3198_v35, %s2730_s20  ;;  %v3409_v26 = vpop.permute.xlu0 %1301 }
 0x1b2   : > { %5418 = vst [vmem:[#allocation61_spill] sm:$0xff] %v3393_v15  ;;  %925 = vrot.lane.b32.xlu1 %v3198_v35, %s2727_s17  ;;  %2675 = vset.pattern.permute.xlu0 %v5391_v41  ;;  %5421 = vst [vmem:[#allocation64_spill] sm:$0xff] %v3409_v26 }
 0x1b3   : > { %2671 = vset.pattern.permute.xlu1 %v5391_v41 }
 0x1b5   : > { %v3403_v61 = vpop.permute.xlu1 %668  ;;  %1279 = vrot.lane.b32.xlu0 %v3096_v38, %s2731_s22  ;;  %v3421_v41 = vpop.permute.xlu0 %1446 }
 0x1b6   : > { %5420 = vst [vmem:[#allocation63_spill] sm:$0xff] %v3403_v61  ;;  %941 = vrot.lane.b32.xlu1 %v3298_v11, %s2727_s17  ;;  %5424 = vst [vmem:[#allocation67_spill] sm:$0xff] %v3421_v41 }
 0x1b9   : > { %v3411_v39 = vpop.permute.xlu1 %804  ;;  %1424 = vrot.lane.b32.xlu0 %v3130_v25, %s2732_s23 }
 0x1ba   : > { %5422 = vst [vmem:[#allocation65_spill] sm:$0xff] %v3411_v39  ;;  %1086 = vrot.lane.b32.xlu1 %v3067_v51, %s2730_s20 }
 0x1bd   : > { %v3417_v4 = vpop.permute.xlu1 %1305  ;;  %1569 = vrot.lane.b32.xlu0 %v3011_v7, %s2733_s25 }
 0x1be   : > { %5423 = vst [vmem:[#allocation66_spill] sm:$0xff] %v3417_v4  ;;  %1297 = vrot.lane.b32.xlu1 %v3185_v5, %s2731_s22 }
 0x1c1   : > { %v3425_v61 = vpop.permute.xlu1 %784  ;;  %1714 = vrot.lane.b32.xlu0 %v3039_v55, %s2734_s26 }
 0x1c2   : > { %5425 = vst [vmem:[#allocation68_spill] sm:$0xff] %v3425_v61  ;;  %v3429_v26 = vpop.permute.xlu0 %1152  ;;  %1442 = vrot.lane.b32.xlu1 %v3021_v13, %s2732_s23 }
 0x1c3   : > { %5426 = vst [vmem:[#allocation69_spill] sm:$0xff] %v3429_v26 }
 0x1c5   : > { %1355 = vperm.xlu0 %2675, %v2969_v36   ;;  %v3434_v39 = vpop.permute.xlu1 %929 }
 0x1c6   : > { %5427 = vst [vmem:[#allocation70_spill] sm:$0xff] %v3434_v39  ;;  %1587 = vrot.lane.b32.xlu1 %v3045_v63, %s2733_s25  ;;  %v3438_v4 = vpop.permute.xlu0 %646 }
 0x1c7   : > { %5428 = vst [vmem:[#allocation71_spill] sm:$0xff] %v3438_v4 }
 0x1c9   : > { %2676 = vset.pattern.permute.xlu0 %v5392_v42  ;;  %v3446_v55 = vpop.permute.xlu1 %1074 }
 0x1ca   : > { %1732 = vrot.lane.b32.xlu1 %v3081_v10, %s2734_s26  ;;  %1665 = vperm.xlu0 %2676, %v2882_v22   ;;  %v3444_v26 = vpop.permute.xlu0 %782  ;;  %5430 = vst [vmem:[#allocation73_spill] sm:$0xff] %v3446_v55  ;;  %v5437_v55 = vmov 1  }
 0x1cb   : > { %5429 = vst [vmem:[#allocation72_spill] sm:$0xff] %v3444_v26 }
 0x1cd   : > { %v3452_v61 = vpop.permute.xlu1 %1285 }
 0x1ce   : > { %1359 = vperm.xlu1 %2671, %v2922_v28   ;;  %1653 = vperm.xlu0 %2676, %v2930_v30   ;;  %v3450_v39 = vpop.permute.xlu0 %927  ;;  %5432 = vst [vmem:[#allocation75_spill] sm:$0xff] %v3452_v61 }
 0x1cf   : > { %5431 = vst [vmem:[#allocation74_spill] sm:$0xff] %v3450_v39 }
 0x1d1   : > { %v3465_v26 = vpop.permute.xlu1 %1430 }
 0x1d2   : > { %2672 = vset.pattern.permute.xlu1 %v5397_v47  ;;  %1293 = vrot.lane.b32.xlu0 %v3067_v51, %s2731_s22  ;;  %v3457_v4 = vpop.permute.xlu0 %1072  ;;  %5435 = vst [vmem:[#allocation78_spill] sm:$0xff] %v3465_v26 }
 0x1d3   : > { %5433 = vst [vmem:[#allocation76_spill] sm:$0xff] %v3457_v4  ;;  %1506 = vperm.xlu1 %2672, %v2945_v33  }
 0x1d5   : > { %v3474_v4 = vpop.permute.xlu1 %1575 }
 0x1d6   : > { %1438 = vrot.lane.b32.xlu0 %v3098_v50, %s2732_s23  ;;  %v3462_v22 = vpop.permute.xlu0 %1283  ;;  %5438 = vst [vmem:[#allocation80_spill] sm:$0xff] %v3474_v4 }
 0x1d7   : > { %5434 = vst [vmem:[#allocation77_spill] sm:$0xff] %v3462_v22  ;;  %2673 = vset.pattern.permute.xlu1 %v5395_v43 }
 0x1d8   : > { %1800 = vperm.xlu1 %2673, %v2910_v27  }
 0x1da   : > { %1583 = vrot.lane.b32.xlu0 %v3185_v5, %s2733_s25  ;;  %v3470_v39 = vpop.permute.xlu0 %1428 }
 0x1db   : > { %5436 = vst [vmem:[#allocation79_spill] sm:$0xff] %v3470_v39 }
 0x1dc   : > { %2674 = vset.pattern.permute.xlu1 %v5437_v55 }
 0x1dd   : > { %1872 = vperm.xlu1 %2674, %v2859_v17  }
 0x1de   : > { %1728 = vrot.lane.b32.xlu0 %v3021_v13, %s2734_s26  ;;  %v3478_v22 = vpop.permute.xlu0 %1573 }
 0x1df   : > { %5439 = vst [vmem:[#allocation81_spill] sm:$0xff] %v3478_v22 }
 0x1e1   : > { %1084 = vrot.lane.b32.xlu1 %v3298_v11, %s2730_s20  ;;  %s2735_s20 = smov 126  }
 0x1e2   : > { %v3482_v27 = vpop.permute.xlu1 %1005  ;;  %1645 = vperm.xlu0 %2676, %v2922_v28   ;;  %v3485_v61 = vpop.permute.xlu0 %947  ;;  %2677 = vset.pattern.permute.xlu1 %v5397_v47 }
 0x1e3   : > { %5440 = vst [vmem:[#allocation82_spill] sm:$0xff] %v3482_v27  ;;  %5441 = vst [vmem:[#allocation83_spill] sm:$0xff] %v3485_v61 }
 0x1e5   : > { %1295 = vrot.lane.b32.xlu1 %v3098_v50, %s2731_s22 }
 0x1e6   : > { %1275 = vrot.lane.b32.xlu0 %v3198_v35, %s2731_s22  ;;  %v3492_v17 = vpop.permute.xlu0 %1448 }
 0x1e7   : > { %5442 = vst [vmem:[#allocation84_spill] sm:$0xff] %v3492_v17  ;;  %v3494_v4 = vpop.permute.xlu1 %1220 }
 0x1e8   : > { %5443 = vst [vmem:[#allocation85_spill] sm:$0xff] %v3494_v4 }
 0x1e9   : > { %1440 = vrot.lane.b32.xlu1 %v3185_v5, %s2732_s23 }
 0x1ea   : > { %1420 = vrot.lane.b32.xlu0 %v3057_v57, %s2732_s23  ;;  %v3500_v27 = vpop.permute.xlu0 %1090 }
 0x1eb   : > { %5444 = vst [vmem:[#allocation86_spill] sm:$0xff] %v3500_v27 }
 0x1ec   : > { %v3502_v39 = vpop.permute.xlu1 %1367 }
 0x1ed   : > { %5445 = vst [vmem:[#allocation87_spill] sm:$0xff] %v3502_v39  ;;  %1585 = vrot.lane.b32.xlu1 %v3021_v13, %s2733_s25 }
 0x1ee   : > { %1565 = vrot.lane.b32.xlu0 %v3096_v38, %s2733_s25  ;;  %v3508_v61 = vpop.permute.xlu0 %1591 }
 0x1ef   : > { %5446 = vst [vmem:[#allocation88_spill] sm:$0xff] %v3508_v61 }
 0x1f1   : > { %v3510_v17 = vpop.permute.xlu1 %1661  ;;  %1730 = vrot.lane.b32.xlu1 %v3045_v63, %s2734_s26 }
 0x1f2   : > { %5447 = vst [vmem:[#allocation89_spill] sm:$0xff] %v3510_v17  ;;  %1710 = vrot.lane.b32.xlu0 %v3130_v25, %s2734_s26  ;;  %v3516_v4 = vpop.permute.xlu0 %1718 }
 0x1f3   : > { %5448 = vst [vmem:[#allocation90_spill] sm:$0xff] %v3516_v4 }
 0x1f5   : > { %1502 = vperm.xlu1 %2677, %v2922_v28   ;;  %v2689_v28 = vld [vmem:[%s5160_s2 + $0x28] sm:$0xff] }
 0x1f6   : > { %v3519_v39 = vpop.permute.xlu1 %1808  ;;  %1641 = vperm.xlu0 %2676, %v2969_v36   ;;  %v3522_v27 = vpop.permute.xlu0 %1148 }
 0x1f7   : > { %5449 = vst [vmem:[#allocation91_spill] sm:$0xff] %v3519_v39  ;;  %5450 = vst [vmem:[#allocation92_spill] sm:$0xff] %v3522_v27  ;;  %v5464_v39 = vmov 0  }
 0x1f9   : > { %2678 = vset.pattern.permute.xlu1 %v5392_v42 }
 0x1fa   : > { %v3525_v61 = vpop.permute.xlu1 %662  ;;  %1649 = vperm.xlu1 %2678, %v2945_v33   ;;  %2683 = vset.pattern.permute.xlu0 %v5395_v43 }
 0x1fb   : > { %5451 = vst [vmem:[#allocation93_spill] sm:$0xff] %v3525_v61  ;;  %1796 = vperm.xlu0 %2683, %v2930_v30   ;;  %v3530_v17 = vpop.permute.xlu0 %1522 }
 0x1fc   : > { %5452 = vst [vmem:[#allocation94_spill] sm:$0xff] %v3530_v17 }
 0x1fe   : > { %v3532_v4 = vpop.permute.xlu1 %798  ;;  %2679 = vset.pattern.permute.xlu1 %v5437_v55 }
 0x1ff   : > { %5453 = vst [vmem:[#allocation95_spill] sm:$0xff] %v3532_v4  ;;  %1868 = vperm.xlu1 %2679, %v2689_v28   ;;  %1563 = vrot.lane.b32.xlu0 %v3057_v57, %s2733_s25  ;;  %v3540_v42 = vpop.permute.xlu0 %1514 }
 0x200   : > { %5454 = vst [vmem:[#allocation96_spill] sm:$0xff] %v3540_v42 }
 0x202   : > { %v3542_v27 = vpop.permute.xlu1 %943 }
 0x203   : > { %5455 = vst [vmem:[#allocation97_spill] sm:$0xff] %v3542_v27  ;;  %1277 = vrot.lane.b32.xlu1 %v3057_v57, %s2731_s22  ;;  %1708 = vrot.lane.b32.xlu0 %v3096_v38, %s2734_s26  ;;  %v3548_v4 = vpop.permute.xlu0 %1510  ;;  %v678_v27 = vlaneseq }
 0x204   : > { %5456 = vst [vmem:[#allocation98_spill] sm:$0xff] %v3548_v4  ;;  %2680 = vset.pattern.permute.xlu1 %v5397_v47  ;;  %v697_v47 = vld [vmem:[%s5162_s4] ss:$8 sm:$0x3] }
 0x205   : > { %vm698_vm1 = vcmp.gt.f32.partialorder %v697_v47, 0.5  ;;  %v3596_v57 = vand.u32 127, %v678_v27 }
 0x206   : > { %v3551_v61 = vpop.permute.xlu1 %1088  ;;  %v699_v17 = vsel %vm698_vm1, 1, %v5464_v39 }
 0x207   : > { %5457 = vst [vmem:[#allocation99_spill] sm:$0xff] %v3551_v61  ;;  %1422 = vrot.lane.b32.xlu1 %v3096_v38, %s2732_s23  ;;  %1784 = vperm.xlu0 %2683, %v2969_v36   ;;  %v701_v61 = vshrl.u32 %v678_v27, 7  ;;  %v2522_v38 = vld [vmem:[%s5162_s4 + $0x1] ss:$8 sm:$0x3]  ;;  %vm5303_vm5 = vcmp.lt.s32.totalorder %v3596_v57, 16 }
 0x208   : > { %v3556_v28 = vpop.permute.xlu0 %1236  ;;  %vm833_vm2 = vcmp.gt.f32.partialorder %v2522_v38, 0.5  ;;  %vm5320_vm6 = vcmp.lt.s32.totalorder %v3596_v57, 17  ;;  %vm5308_vm8 = vcmp.lt.s32.totalorder %v3596_v57, 15  ;;  %vm5311_vm14 = vcmp.lt.s32.totalorder %v3596_v57, 1 }
 0x209   : > { %5458 = vst [vmem:[#allocation100_spill] sm:$0xff] %v3556_v28  ;;  %v3591_v47 = vsub.s32 1, %v701_v61  ;;  %vm5312_vm0 = vcmp.lt.s32.totalorder %v3596_v57, 112 }
 0x20a   : > { %v3558_v42 = vpop.permute.xlu1 %1299 }
 0x20b   : > { %5459 = vst [vmem:[#allocation101_spill] sm:$0xff] %v3558_v42  ;;  %1567 = vrot.lane.b32.xlu1 %v3130_v25, %s2733_s25  ;;  %2685 = vset.pattern.permute.xlu0 %v5437_v55  ;;  %v2523_v25 = vld [vmem:[%s5162_s4 + $0x2] ss:$8 sm:$0x3]  ;;  %v707_v41 = vrot.slane %v699_v17, %v3591_v47 }
 0x20c   : > { %v3563_v4 = vpop.permute.xlu0 %1232  ;;  %874 = vperm.xlu0 %2685, %v2930_v30   ;;  %v3582_v30 = vsub.s32 0, %v701_v61  ;;  %vm976_vm3 = vcmp.gt.f32.partialorder %v2523_v25, 0.5 }
 0x20d   : > { %5460 = vst [vmem:[#allocation102_spill] sm:$0xff] %v3563_v4  ;;  %vm3641_vm11 = vcmp.eq.s32.totalorder %v707_v41, 1  ;;  %v962_v41 = vsel %vm5308_vm8, %v3220_v19, %v3246_v37 }
 0x20e   : > { %v3572_v63 = vpop.permute.xlu1 %1444  ;;  %v703_v22 = vrot.slane %v699_v17, %v3582_v30  ;;  %v5468_v17 = vmov 0 }
 0x20f   : > { %5461 = vst [vmem:[#allocation103_spill] sm:$0xff] %v3572_v63  ;;  %1712 = vrot.lane.b32.xlu1 %v3011_v7, %s2734_s26  ;;  %v2524_v63 = vld [vmem:[%s5162_s4 + $0x3] ss:$8 sm:$0x3] }
 0x210   : > { %v3579_v4 = vpop.permute.xlu0 %1224  ;;  %870 = vperm.xlu0 %2685, %v2945_v33   ;;  %vm1119_vm4 = vcmp.gt.f32.partialorder %v2524_v63, 0.5  ;;  %vm3618_vm7 = vcmp.eq.s32.totalorder %v703_v22, 1  ;;  %v819_v22 = vsel %vm5303_vm5, %v3230_v20, %v3236_v6 }
 0x211   : > { %5462 = vst [vmem:[#allocation104_spill] sm:$0xff] %v3579_v4  ;;  %v834_v4 = vsel %vm833_vm2, 1, %v5464_v39  ;;  %v1120_v63 = vsel %vm1119_vm4, 1, %v5464_v39  ;;  %v5469_v17 = vsel %vm3618_vm7, 4294967295, %v5468_v17 }
 0x212   : > { %v3584_v42 = vpop.permute.xlu1 %1589  ;;  %v838_v25 = vrot.slane %v834_v4, %v3582_v30  ;;  %v842_v61 = vrot.slane %v834_v4, %v3591_v47  ;;  %v2690_v4 = vld [vmem:[%s5160_s2 + $0x38] sm:$0xff]  ;;  %v1128_v28 = vrot.slane %v1120_v63, %v3591_v47 }
 0x213   : > { %5463 = vst [vmem:[#allocation105_spill] sm:$0xff] %v3584_v42  ;;  %1498 = vperm.xlu1 %2680, %v2969_v36   ;;  %v977_v42 = vsel %vm976_vm3, 1, %v5464_v39 }
 0x214   : > { %v3594_v38 = vpop.permute.xlu0 %1070  ;;  %862 = vperm.xlu0 %2685, %v2969_v36   ;;  %v981_v27 = vrot.slane %v977_v42, %v3582_v30  ;;  %vm3625_vm9 = vcmp.eq.s32.totalorder %v838_v25, 1  ;;  %vm3629_vm10 = vcmp.eq.s32.totalorder %v842_v61, 1  ;;  %v685_v25 = vsel %vm5320_vm6, %v3222_v32, %v3228_v29 }
 0x215   : > { %5465 = vst [vmem:[#allocation106_spill] sm:$0xff] %v3594_v38  ;;  %v693_v61 = vsel %vm5320_vm6, %v3228_v29, %v3222_v32  ;;  %v970_v29 = vsel %vm5308_vm8, %v3246_v37, %v3220_v19  ;;  %v2691_v32 = vld [vmem:[%s5160_s2 + $0x18] sm:$0xff]  ;;  %v719_v19 = vsel %vm3641_vm11, %v685_v25, 0.0  ;;  %vm3715_vm1 = vcmp.eq.s32.totalorder %v1128_v28, 1 }
 0x216   : > { %v3601_v26 = vpop.permute.xlu1 %1734  ;;  %vm3657_vm12 = vcmp.eq.s32.totalorder %v981_v27, 1  ;;  %v718_v37 = vsel %vm3618_vm7, %v693_v61, 0.0  ;;  %v1251_v28 = vmul.f32 %v3124_v18, %v3011_v7 }
 0x217   : > { %5466 = vst [vmem:[#allocation107_spill] sm:$0xff] %v3601_v26  ;;  %2681 = vset.pattern.permute.xlu1 %v5395_v43  ;;  %v985_v26 = vrot.slane %v977_v42, %v3591_v47  ;;  %v827_v42 = vsel %vm5303_vm5, %v3236_v6, %v3230_v20  ;;  %v5480_v6 = vmov 0 }
 0x218   : > { %1792 = vperm.xlu1 %2681, %v2945_v33   ;;  %v3609_v36 = vpop.permute.xlu0 %1281  ;;  %1876 = vperm.xlu0 %2685, %v2690_v4   ;;  %v5475_v4 = vmov 0  ;;  %v853_v27 = vsel %vm3625_vm9, %v827_v42, 0.0  ;;  %v996_v42 = vsel %vm3657_vm12, %v970_v29, 0.0  ;;  %v775_v29 = vmul.f32 %v3171_v59, %v719_v19 }
 0x219   : > { %5467 = vst [vmem:[#allocation108_spill] sm:$0xff] %v3609_v36  ;;  %v5476_v4 = vsel %vm3641_vm11, 4294967295, %v5475_v4  ;;  %vm3661_vm13 = vcmp.eq.s32.totalorder %v985_v26, 1  ;;  %v2692_v26 = vld [vmem:[%s5160_s2 + $0x20] sm:$0xff]  ;;  %v901_v61 = vmul.f32 %v2995_v46, %v853_v27  ;;  %v1044_v27 = vmul.f32 %v3019_v12, %v996_v42 }
 0x21a   : > { %v3623_v33 = vpop.permute.xlu1 %1216  ;;  %v5481_v6 = vsel %vm3661_vm13, 4294967295, %v5480_v6  ;;  %v820_v42 = vsel %vm5303_vm5, %v3263_v23, %v3269_v58 }
 0x21b   : > { %5470 = vst [vmem:[#allocation109_spill] sm:$0xff] %v3623_v33  ;;  %v1124_v33 = vrot.slane %v1120_v63, %v3582_v30  ;;  %v997_v63 = vsel %vm3661_vm13, %v962_v41, 0.0  ;;  %v774_v41 = vmul.f32 %v3171_v59, %v718_v37 }
 0x21c   : > { %2682 = vset.pattern.permute.xlu1 %v5437_v55  ;;  %v3655_v10 = vpop.permute.xlu0 %1426  ;;  %1860 = vperm.xlu0 %2685, %v2691_v32   ;;  %v2525_v32 = vld [vmem:[%s5162_s4 + $0x5] ss:$8 sm:$0x3]  ;;  %v1045_v59 = vmul.f32 %v3019_v12, %v997_v63 }
 0x21d   : > { %5477 = vst [vmem:[#allocation110_spill] sm:$0xff] %v3655_v10  ;;  %1864 = vperm.xlu1 %2682, %v2692_v26   ;;  %v854_v10 = vsel %vm3629_vm10, %v819_v22, 0.0  ;;  %vm3702_vm15 = vcmp.eq.s32.totalorder %v1124_v33, 1  ;;  %v5484_v26 = vmov 0  ;;  %vm1326_vm2 = vcmp.gt.f32.partialorder %v2525_v32, 0.5 }
 0x21e   : > { %v902_v25 = vmul.f32 %v2995_v46, %v854_v10  ;;  %v5485_v26 = vsel %vm3702_vm15, 4294967295, %v5484_v26  ;;  %v5487_v46 = vmov 0  ;;  %v1105_v10 = vsel %vm5311_vm14, %v3238_v56, %v3244_v52 }
 0x21f   : > { %v3691_v15 = vpop.permute.xlu1 %1363  ;;  %5486 = vst [vmem:[#allocation113_spill] sm:$0xff] %v5485_v26  ;;  %v5488_v46 = vsel %vm3715_vm1, 4294967295, %v5487_v46  ;;  %v1113_v33 = vsel %vm5311_vm14, %v3244_v52, %v3238_v56  ;;  %v917_v32 = vadd.f32 %v901_v61, %v774_v41  ;;  %v3739_v45 = vsel %vm1326_vm2, 1, %v5464_v39  ;;  %v2527_v61 = vld [vmem:[%s5162_s4 + $0x7] ss:$8 sm:$0x3] }
 0x220   : > { %5482 = vst [vmem:[#allocation111_spill] sm:$0xff] %v3691_v15  ;;  %v3698_v22 = vpop.permute.xlu0 %1571  ;;  %v2526_v15 = vld [vmem:[%s5162_s4 + $0x6] ss:$8 sm:$0x3]  ;;  %1577 = vrot.lane.b32.xlu0 %v3298_v11, %s2733_s25  ;;  %v3743_v56 = vmul.f32 %v3003_v53, %v3117_v8  ;;  %v1139_v7 = vsel %vm3702_vm15, %v1113_v33, 0.0  ;;  %v1140_v12 = vsel %vm3715_vm1, %v1105_v10, 0.0  ;;  %v3759_v8 = vmul.f32 %v3003_v53, %v3153_v16 }
 0x221   : > { %5483 = vst [vmem:[#allocation112_spill] sm:$0xff] %v3698_v22  ;;  %1291 = vrot.lane.b32.xlu1 %v3298_v11, %s2731_s22  ;;  %vm1469_vm3 = vcmp.gt.f32.partialorder %v2526_v15, 0.5  ;;  %v918_v22 = vadd.f32 %v902_v25, %v775_v29  ;;  %v694_v53 = vsel %vm5320_vm6, %v3261_v62, %v3254_v31  ;;  %v971_v16 = vsel %vm5308_vm8, %v3276_v0, %v3271_v54  ;;  %v5552_v26 = vld [vmem:[#allocation63_spill] sm:$0xff] }
 0x222   : > { %2684 = vset.pattern.permute.xlu1 %v5395_v43  ;;  %v1252_v43 = vmul.f32 %v3124_v18, %v3021_v13  ;;  %v828_v13 = vsel %vm5303_vm5, %v3269_v58, %v3263_v23  ;;  %v1060_v18 = vadd.f32 %v1044_v27, %v917_v32  ;;  %v3767_v63 = vsel %vm1469_vm3, 1, %v5464_v39 }
 0x223   : > { %v1061_v52 = vadd.f32 %v1045_v59, %v918_v22  ;;  %v1331_v23 = vrot.slane %v3739_v45, %v3582_v30  ;;  %v1335_v58 = vrot.slane %v3739_v45, %v3591_v47  ;;  %v1187_v22 = vmul.f32 %v3069_v60, %v1139_v7 }
 0x224   : > { %v3734_v37 = vpop.permute.xlu1 %1657  ;;  %v3736_v19 = vpop.permute.xlu0 %1716  ;;  %1722 = vrot.lane.b32.xlu0 %v3067_v51, %s2734_s26  ;;  %v1188_v25 = vmul.f32 %v3069_v60, %v1140_v12  ;;  %v686_v41 = vsel %vm5320_vm6, %v3254_v31, %v3261_v62  ;;  %v855_v29 = vsel %vm3625_vm9, %v828_v13, 0.0  ;;  %v856_v33 = vsel %vm3629_vm10, %v820_v42, 0.0 }
 0x225   : > { %5489 = vst [vmem:[#allocation114_spill] sm:$0xff] %v3734_v37  ;;  %1436 = vrot.lane.b32.xlu1 %v3067_v51, %s2732_s23  ;;  %v963_v60 = vsel %vm5308_vm8, %v3271_v54, %v3276_v0  ;;  %vm1612_vm4 = vcmp.gt.f32.partialorder %v2527_v61, 0.5  ;;  %v1203_v62 = vadd.f32 %v1187_v22, %v1060_v18  ;;  %v720_v59 = vsel %vm3618_vm7, %v694_v53, 0.0 }
 0x226   : > { %v1204_v27 = vadd.f32 %v1188_v25, %v1061_v52  ;;  %v998_v32 = vsel %vm3657_vm12, %v971_v16, 0.0  ;;  %v721_v7 = vsel %vm3641_vm11, %v686_v41, 0.0  ;;  %v903_v12 = vmul.f32 %v2991_v44, %v855_v29 }
 0x227   : > { %v1114_v0 = vsel %vm5311_vm14, %v3286_v14, %v3252_v40  ;;  %v904_v18 = vmul.f32 %v2991_v44, %v856_v33  ;;  %v999_v52 = vsel %vm3661_vm13, %v963_v60, 0.0  ;;  %v1106_v42 = vsel %vm5311_vm14, %v3252_v40, %v3286_v14  ;;  %v2693_v44 = vld [vmem:[%s5160_s2] sm:$0xff] }
 0x228   : > { %v3784_v15 = vpop.permute.xlu0 %1212  ;;  %1704 = vrot.lane.b32.xlu0 %v3198_v35, %s2734_s26  ;;  %v3831_v61 = vsel %vm1612_vm4, 1, %v5464_v39  ;;  %v776_v16 = vmul.f32 %v3157_v2, %v720_v59  ;;  %v1046_v22 = vmul.f32 %v2999_v48, %v998_v32  ;;  %v682_v14 = vsel %vm5320_vm6, %v3279_v1, %v3283_v21 }
 0x229   : > { %5490 = vst [vmem:[#allocation115_spill] sm:$0xff] %v3784_v15  ;;  %v3796_v10 = vpop.permute.xlu1 %1804  ;;  %1581 = vrot.lane.b32.xlu1 %v3098_v50, %s2733_s25  ;;  %v690_v40 = vsel %vm5320_vm6, %v3283_v21, %v3279_v1  ;;  %v777_v25 = vmul.f32 %v3157_v2, %v721_v7  ;;  %v1141_v41 = vsel %vm3702_vm15, %v1114_v0, 0.0  ;;  %vm5301_vm2 = vcmp.lt.s32.totalorder %v3596_v57, 127  ;;  %v5494_v0 = vld [vmem:[#allocation40_spill] sm:$0xff] }
 0x22a   : > { %5491 = vst [vmem:[#allocation116_spill] sm:$0xff] %v3796_v10  ;;  %v3854_v29 = vadd.f32 %v1251_v28, %v1203_v62  ;;  %v3856_v33 = vadd.f32 %v1252_v43, %v1204_v27  ;;  %v919_v60 = vadd.f32 %v903_v12, %v776_v16  ;;  %v1047_v59 = vmul.f32 %v2999_v48, %v999_v52  ;;  %v2694_v48 = vld [vmem:[%s5161_s3 + $0x8] sm:$0xff]  ;;  %v5497_v16 = vld [vmem:[#allocation41_spill] sm:$0xff]  ;;  %v5508_v21 = vld [vmem:[#allocation4_spill] sm:$0xff] }
 0x22b   : > { %v1142_v32 = vsel %vm3715_vm1, %v1106_v42, 0.0  ;;  %v920_v2 = vadd.f32 %v904_v18, %v777_v25  ;;  %v712_v7 = vsel %vm3618_vm7, %v690_v40, 0.0  ;;  %v713_v28 = vsel %vm3641_vm11, %v682_v14, 0.0  ;;  %v5499_v25 = vld [vmem:[#allocation38_spill] sm:$0xff] }
 0x22c   : > { %v3821_v13 = vpop.permute.xlu0 %1068  ;;  %1848 = vperm.xlu0 %2685, %v2693_v44   ;;  %v1062_v27 = vadd.f32 %v1046_v22, %v919_v60  ;;  %v1189_v12 = vmul.f32 %v3027_v24, %v1141_v41  ;;  %v964_v18 = vsel %vm5308_vm8, %v5494_v0, %v3300_v3  ;;  %v972_v52 = vsel %vm5308_vm8, %v3300_v3, %v5494_v0  ;;  %v5498_v22 = vld [vmem:[#allocation42_spill] sm:$0xff]  ;;  %v5500_v41 = vld [vmem:[#allocation29_spill] sm:$0xff] }
 0x22d   : > { %1726 = vrot.lane.b32.xlu1 %v3185_v5, %s2734_s26  ;;  %v3835_v53 = vpop.permute.xlu1 %925  ;;  %vm3886_vm3 = vcmp.eq.s32.totalorder %v1331_v23, 1  ;;  %v1190_v44 = vmul.f32 %v3027_v24, %v1142_v32  ;;  %v1107_v14 = vsel %vm5311_vm14, %v5498_v22, %v5497_v16  ;;  %v1115_v40 = vsel %vm5311_vm14, %v5497_v16, %v5498_v22  ;;  %v5501_v32 = vld [vmem:[#allocation44_spill] sm:$0xff]  ;;  %v5525_v5 = vld [vmem:[#allocation59_spill] sm:$0xff] }
 0x22e   : > { %5492 = vst [vmem:[#allocation117_spill] sm:$0xff] %v3835_v53  ;;  %v829_v3 = vsel %vm5303_vm5, %v3346_v49, %v5499_v25  ;;  %v1063_v23 = vadd.f32 %v1047_v59, %v920_v2  ;;  %v3904_v60 = vmul.f32 %v5500_v41, %v712_v7  ;;  %v3907_v24 = vmul.f32 %v5500_v41, %v713_v28  ;;  %v5506_v7 = vld [vmem:[#allocation39_spill] sm:$0xff]  ;;  %v2528_v15 = vld [vmem:[%s5162_s4 + $0x10] ss:$8 sm:$0x3] }
 0x22f   : > { %vm3916_vm4 = vcmp.eq.s32.totalorder %v1335_v58, 1  ;;  %v1000_v59 = vsel %vm3657_vm12, %v972_v52, 0.0  ;;  %v1001_v2 = vsel %vm3661_vm13, %v964_v18, 0.0  ;;  %v695_v28 = vsel %vm5320_vm6, %v3339_v34, %v5506_v7 }
 0x230   : > { %v3863_v1 = vpop.permute.xlu0 %1279  ;;  %2687 = vset.pattern.permute.xlu0 %v5464_v39  ;;  %v821_v45 = vsel %vm5303_vm5, %v5499_v25, %v3346_v49  ;;  %v1143_v52 = vsel %vm3702_vm15, %v1115_v40, 0.0  ;;  %v1144_v18 = vsel %vm3715_vm1, %v1107_v14, 0.0  ;;  %v857_v43 = vsel %vm3625_vm9, %v829_v3, 0.0 }
 0x231   : > { %1788 = vperm.xlu1 %2684, %v2694_v48   ;;  %v3874_v62 = vpop.permute.xlu1 %941  ;;  %v5502_v48 = vld [vmem:[#allocation43_spill] sm:$0xff]  ;;  %v687_v40 = vsel %vm5320_vm6, %v5506_v7, %v3339_v34  ;;  %v3955_v25 = vadd.f32 %v1189_v12, %v1062_v27  ;;  %v3957_v14 = vadd.f32 %v1190_v44, %v1063_v23  ;;  %v1048_v54 = vmul.f32 %v5508_v21, %v1000_v59  ;;  %v5513_v23 = vld [vmem:[#allocation10_spill] sm:$0xff]  ;;  %v5516_v7 = vld [vmem:[#allocation48_spill] sm:$0xff] }
 0x232   : > { %5493 = vst [vmem:[#allocation118_spill] sm:$0xff] %v3874_v62  ;;  %v691_v0 = vsel %vm5320_vm6, %v5502_v48, %v5501_v32  ;;  %v683_v41 = vsel %vm5320_vm6, %v5501_v32, %v5502_v48  ;;  %v1049_v32 = vmul.f32 %v5508_v21, %v1001_v2  ;;  %v722_v3 = vsel %vm3618_vm7, %v695_v28, 0.0  ;;  %v5511_v12 = vld [vmem:[#allocation3_spill] sm:$0xff]  ;;  %v5524_v62 = vld [vmem:[#allocation52_spill] sm:$0xff] }
 0x233   : > { %v714_v49 = vsel %vm3618_vm7, %v691_v0, 0.0  ;;  %v5510_v0 = vld [vmem:[#allocation34_spill] sm:$0xff]  ;;  %v715_v27 = vsel %vm3641_vm11, %v683_v41, 0.0  ;;  %v905_v44 = vmul.f32 %v5511_v12, %v857_v43  ;;  %v5515_v2 = vld [vmem:[#allocation47_spill] sm:$0xff]  ;;  %v5543_v37 = vrot.slane %v3831_v61, %v3582_v30 }
 0x234   : > { %v3920_v22 = vpop.permute.xlu0 %1424  ;;  %v3968_v31 = vmul.f32 %v5510_v0, %v1143_v52  ;;  %v3971_v34 = vmul.f32 %v5510_v0, %v1144_v18  ;;  %v3982_v59 = vmul.f32 %v5513_v23, %v714_v49  ;;  %v1314_v28 = vsel %vm5301_vm2, %v5516_v7, %v5515_v2  ;;  %v5517_v52 = vld [vmem:[#allocation49_spill] sm:$0xff]  ;;  %v5519_v41 = vld [vmem:[#allocation46_spill] sm:$0xff] }
 0x235   : > { %5505 = vst [vmem:[#allocation40_spill] sm:$0xff] %v3920_v22  ;;  %1418 = vrot.lane.b32.xlu1 %v3198_v35, %s2732_s23  ;;  %v3936_v58 = vpop.permute.xlu1 %1086  ;;  %v830_v43 = vsel %vm5303_vm5, %v3388_v9, %v5517_v52  ;;  %v5518_v18 = vld [vmem:[#allocation45_spill] sm:$0xff]  ;;  %v1322_v53 = vsel %vm5301_vm2, %v5515_v2, %v5516_v7  ;;  %vm1755_vm2 = vcmp.gt.f32.partialorder %v2528_v15, 0.5 }
 0x236   : > { %5507 = vst [vmem:[#allocation41_spill] sm:$0xff] %v3936_v58  ;;  %2686 = vset.pattern.permute.xlu1 %v5437_v55  ;;  %v858_v55 = vsel %vm3629_vm10, %v821_v45, 0.0  ;;  %5514 = vst [vmem:[#allocation29_spill] sm:$0xff] %v3982_v59  ;;  %v723_v45 = vsel %vm3641_vm11, %v687_v40, 0.0  ;;  %v3998_v0 = vsel %vm5303_vm5, %v5519_v41, %v5518_v18  ;;  %v4004_v49 = vsel %vm5303_vm5, %v5518_v18, %v5519_v41  ;;  %v5522_v59 = vld [vmem:[#allocation25_spill] sm:$0xff] }
 0x237   : > { %5520 = vst [vmem:[#allocation44_spill] sm:$0xff] %v3998_v0  ;;  %5521 = vst [vmem:[#allocation43_spill] sm:$0xff] %v4004_v49  ;;  %v778_v22 = vmul.f32 %v5522_v59, %v722_v3  ;;  %v906_v40 = vmul.f32 %v5511_v12, %v858_v55  ;;  %v696_v18 = vsel %vm5320_vm6, %v5525_v5, %v5524_v62  ;;  %v5526_v3 = vld [vmem:[#allocation50_spill] sm:$0xff]  ;;  %v5527_v41 = vld [vmem:[#allocation61_spill] sm:$0xff]  ;;  %v859_v2 = vsel %vm3625_vm9, %v830_v43, 0.0 }
 0x238   : > { %v3965_v48 = vpop.permute.xlu0 %1569  ;;  %v973_v55 = vsel %vm5308_vm8, %v5527_v41, %v5526_v3  ;;  %v822_v58 = vsel %vm5303_vm5, %v5517_v52, %v3388_v9  ;;  %v5529_v9 = vld [vmem:[#allocation16_spill] sm:$0xff]  ;;  %v5530_v49 = vld [vmem:[#allocation2_spill] sm:$0xff]  ;;  %v5535_v0 = vld [vmem:[#allocation5_spill] sm:$0xff] }
 0x239   : > { %5509 = vst [vmem:[#allocation42_spill] sm:$0xff] %v3965_v48  ;;  %1434 = vrot.lane.b32.xlu1 %v3298_v11, %s2732_s23  ;;  %v3979_v21 = vpop.permute.xlu1 %1297  ;;  %v1002_v43 = vsel %vm3657_vm12, %v973_v55, 0.0  ;;  %v5533_v55 = vld [vmem:[#allocation58_spill] sm:$0xff]  ;;  %v5553_v48 = vld [vmem:[#allocation51_spill] sm:$0xff] }
 0x23a   : > { %5512 = vst [vmem:[#allocation38_spill] sm:$0xff] %v3979_v21  ;;  %v4012_v21 = vmul.f32 %v5513_v23, %v715_v27  ;;  %v1350_v27 = vsel %vm3886_vm3, %v1314_v28, 0.0  ;;  %v779_v23 = vmul.f32 %v5522_v59, %v723_v45  ;;  %v724_v45 = vsel %vm3618_vm7, %v696_v18, 0.0  ;;  %v5532_v18 = vld [vmem:[#allocation54_spill] sm:$0xff] }
 0x23b   : > { %v4054_v52 = vmul.f32 %v5529_v9, %v1350_v27  ;;  %v688_v28 = vsel %vm5320_vm6, %v5524_v62, %v5525_v5  ;;  %v1116_v27 = vsel %vm5311_vm14, %v5533_v55, %v5532_v18  ;;  %v1756_v62 = vsel %vm1755_vm2, 1, %v5464_v39 }
 0x23c   : > { %5523 = vst [vmem:[#allocation39_spill] sm:$0xff] %v4012_v21  ;;  %v4026_v12 = vpop.permute.xlu0 %1714  ;;  %v921_v21 = vadd.f32 %v905_v44, %v778_v22  ;;  %v1351_v44 = vsel %vm3916_vm4, %v1322_v53, 0.0  ;;  %v922_v59 = vadd.f32 %v906_v40, %v779_v23  ;;  %v907_v22 = vmul.f32 %v5530_v49, %v859_v2 }
 0x23d   : > { %5528 = vst [vmem:[#allocation4_spill] sm:$0xff] %v4026_v12  ;;  %1579 = vrot.lane.b32.xlu1 %v3067_v51, %s2733_s25  ;;  %v4035_v7 = vpop.permute.xlu1 %1442  ;;  %v965_v53 = vsel %vm5308_vm8, %v5526_v3, %v5527_v41  ;;  %v860_v23 = vsel %vm3629_vm10, %v822_v58, 0.0  ;;  %v5534_v41 = vld [vmem:[#allocation23_spill] sm:$0xff]  ;;  %v5536_v51 = vld [vmem:[#allocation112_spill] sm:$0xff]  ;;  %v1108_v15 = vsel %vm5311_vm14, %v5532_v18, %v5533_v55  ;;  %v725_v58 = vsel %vm3641_vm11, %v688_v28, 0.0 }
 0x23e   : > { %v1064_v5 = vadd.f32 %v1048_v54, %v921_v21  ;;  %v780_v2 = vmul.f32 %v5534_v41, %v724_v45  ;;  %v1003_v21 = vsel %vm3661_vm13, %v965_v53, 0.0  ;;  %v5537_v45 = vrot.slane %v3767_v63, %v3582_v30 }
 0x23f   : > { %v1065_v18 = vadd.f32 %v1049_v32, %v922_v59  ;;  %v1399_v28 = vmul.f32 %v5529_v9, %v1351_v44  ;;  %v908_v55 = vmul.f32 %v5530_v49, %v860_v23  ;;  %v1760_v12 = vrot.slane %v1756_v62, %v3582_v30  ;;  %v5549_v49 = vld [vmem:[#allocation14_spill] sm:$0xff]  ;;  %v5551_v9 = vld [vmem:[#allocation15_spill] sm:$0xff]  ;;  %v2695_v30 = vld [vmem:[%s5160_s2 + $0x10] sm:$0xff] }
 0x240   : > { %v4066_v40 = vpop.permute.xlu0 %1355  ;;  %vm4101_vm2 = vcmp.eq.s32.totalorder %v5537_v45, 1  ;;  %v923_v53 = vadd.f32 %v907_v22, %v780_v2  ;;  %v1145_v45 = vsel %vm3702_vm15, %v1116_v27, 0.0  ;;  %vm4120_vm14 = vcmp.eq.s32.totalorder %v5543_v37, 1  ;;  %v5550_v22 = vld [vmem:[#allocation100_spill] sm:$0xff] }
 0x241   : > { %5531 = vst [vmem:[#allocation34_spill] sm:$0xff] %v4066_v40  ;;  %1724 = vrot.lane.b32.xlu1 %v3098_v50, %s2734_s26  ;;  %v1588_v3 = vpop.permute.xlu1 %1587  ;;  %v1050_v40 = vmul.f32 %v5535_v0, %v1002_v43  ;;  %v5546_v32 = vrot.slane %v3831_v61, %v3591_v47  ;;  %v5547_v44 = vmov 0  ;;  %v1255_v59 = vmul.f32 %v5550_v22, %v5549_v49 }
 0x242   : > { %v4083_v10 = vsel %vm5312_vm0, %v5536_v51, %v1588_v3  ;;  %v4088_v54 = vsel %vm5312_vm0, %v1588_v3, %v5536_v51  ;;  %v5540_v51 = vrot.slane %v3767_v63, %v3591_v47  ;;  %v5544_v63 = vmov 0 }
 0x243   : > { %v5545_v63 = vsel %vm4120_vm14, 4294967295, %v5544_v63  ;;  %vm4127_vm0 = vcmp.eq.s32.totalorder %v5546_v32, 1  ;;  %v1256_v27 = vmul.f32 %v5550_v22, %v5551_v9  ;;  %v1764_v23 = vrot.slane %v1756_v62, %v3591_v47 }
 0x244   : > { %vm4108_vm8 = vcmp.eq.s32.totalorder %v5540_v51, 1  ;;  %v5548_v44 = vsel %vm4127_vm0, 4294967295, %v5547_v44  ;;  %v1146_v61 = vsel %vm3715_vm1, %v1108_v15, 0.0  ;;  %v781_v51 = vmul.f32 %v5534_v41, %v725_v58  ;;  %v5554_v15 = vld [vmem:[#allocation31_spill] sm:$0xff] }
 0x245   : > { %1856 = vperm.xlu1 %2686, %v2695_v30   ;;  %v1733_v37 = vpop.permute.xlu1 %1732  ;;  %v1666_v2 = vpop.permute.xlu0 %1665  ;;  %v1051_v32 = vmul.f32 %v5535_v0, %v1003_v21  ;;  %v1066_v49 = vadd.f32 %v1050_v40, %v923_v53  ;;  %v684_v47 = vsel %vm5320_vm6, %v5553_v48, %v5552_v26  ;;  %v692_v62 = vsel %vm5320_vm6, %v5552_v26, %v5553_v48 }
 0x246   : > { %v1207_v22 = vadd.f32 %v3968_v31, %v1064_v5  ;;  %v1208_v9 = vadd.f32 %v3971_v34, %v1065_v18  ;;  %v1193_v30 = vmul.f32 %v5554_v15, %v1145_v45  ;;  %v924_v41 = vadd.f32 %v908_v55, %v781_v51  ;;  %v5563_v18 = vld [vmem:[#allocation67_spill] sm:$0xff]  ;;  %v5564_v55 = vld [vmem:[#allocation78_spill] sm:$0xff] }
 0x247   : > { %vm4155_vm1 = vcmp.eq.s32.totalorder %v1760_v12, 1  ;;  %v5555_v0 = vmov 0  ;;  %v1194_v40 = vmul.f32 %v5554_v15, %v1146_v61  ;;  %vm4160_vm15 = vcmp.eq.s32.totalorder %v1764_v23, 1  ;;  %v5568_v23 = vld [vmem:[#allocation81_spill] sm:$0xff] }
 0x248   : > { %v5556_v0 = vsel %vm4155_vm1, 4294967295, %v5555_v0  ;;  %v1271_v58 = vadd.f32 %v1255_v59, %v1207_v22  ;;  %v1272_v21 = vadd.f32 %v1256_v27, %v1208_v9  ;;  %v5558_v53 = vmov 0  ;;  %v5567_v27 = vld [vmem:[#allocation105_spill] sm:$0xff]  ;;  %v5575_v22 = vld [vmem:[#allocation60_spill] sm:$0xff] }
 0x249   : > { %5557 = vst [vmem:[#allocation3_spill] sm:$0xff] %v5556_v0  ;;  %v5559_v53 = vsel %vm4160_vm15, 4294967295, %v5558_v53  ;;  %1561 = vrot.lane.b32.xlu1 %v3198_v35, %s2733_s25  ;;  %v4166_v26 = vpop.permute.xlu1 %1359  ;;  %v4168_v31 = vpop.permute.xlu0 %1653  ;;  %v1067_v48 = vadd.f32 %v1051_v32, %v924_v41  ;;  %v1209_v34 = vadd.f32 %v1193_v30, %v1066_v49  ;;  %v716_v12 = vsel %vm3618_vm7, %v692_v62, 0.0  ;;  %v5571_v32 = vld [vmem:[#allocation66_spill] sm:$0xff]  ;;  %v5572_v49 = vld [vmem:[#allocation55_spill] sm:$0xff]  ;;  %v5576_v9 = vld [vmem:[#allocation68_spill] sm:$0xff] }
 0x24a   : > { %5560 = vst [vmem:[#allocation10_spill] sm:$0xff] %v5559_v53  ;;  %5561 = vst [vmem:[#allocation47_spill] sm:$0xff] %v4166_v26  ;;  %v717_v5 = vsel %vm3641_vm11, %v684_v47, 0.0  ;;  %vm5565_vm6 = vcmp.lt.s32.totalorder %v3596_v57, 113  ;;  %vm5569_vm13 = vcmp.lt.s32.totalorder %v3596_v57, 112  ;;  %vm5573_vm11 = vcmp.lt.s32.totalorder %v3596_v57, 127 }
 0x24b   : > { %5562 = vst [vmem:[#allocation48_spill] sm:$0xff] %v4168_v31  ;;  %v1457_v45 = vsel %vm5565_vm6, %v5564_v55, %v5563_v18  ;;  %vm5566_vm5 = vmmov %vm5565_vm6  ;;  %v1600_v61 = vsel %vm5569_vm13, %v5568_v23, %v5567_v27  ;;  %v1315_v47 = vsel %vm5573_vm11, %v5572_v49, %v5571_v32  ;;  %v1414_v41 = vadd.f32 %v4054_v52, %v1271_v58  ;;  %v5584_v26 = vld [vmem:[#allocation6_spill] sm:$0xff] }
 0x24c   : > { %v1465_v59 = vsel %vm5566_vm5, %v5563_v18, %v5564_v55  ;;  %vm5570_vm7 = vmmov %vm5569_vm13  ;;  %vm5577_vm5 = vcmp.lt.s32.totalorder %v3596_v57, 16  ;;  %v1415_v18 = vadd.f32 %v1399_v28, %v1272_v21  ;;  %v1636_v28 = vsel %vm4120_vm14, %v1600_v61, 0.0 }
 0x24d   : > { %v1608_v51 = vsel %vm5570_vm7, %v5567_v27, %v5568_v23  ;;  %vm5574_vm6 = vmmov %vm5573_vm11  ;;  %v816_v15 = vsel %vm5577_vm5, %v5576_v9, %v5575_v22  ;;  %vm5579_vm7 = vcmp.lt.s32.totalorder %v3596_v57, 111  ;;  %v5581_v23 = vld [vmem:[#allocation11_spill] sm:$0xff]  ;;  %v1494_v52 = vsel %vm4108_vm8, %v1465_v59, 0.0 }
 0x24e   : > { %v1323_v62 = vsel %vm5574_vm6, %v5571_v32, %v5572_v49  ;;  %vm5578_vm13 = vmmov %vm5577_vm5  ;;  %v1743_v55 = vsel %vm5579_vm7, %v3736_v19, %v1733_v37  ;;  %1706 = vrot.lane.b32.xlu1 %v5581_v23, %s2734_s26  ;;  %v4215_v32 = vpop.permute.xlu0 %1293  ;;  %v1493_v49 = vsel %vm4101_vm2, %v1457_v45, 0.0  ;;  %v1637_v58 = vsel %vm4127_vm0, %v1608_v51, 0.0  ;;  %v4225_v21 = vpop.permute.xlu1 %1506 }
 0x24f   : > { %v824_v30 = vsel %vm5578_vm13, %v5575_v22, %v5576_v9  ;;  %vm5580_vm11 = vmmov %vm5579_vm7  ;;  %5582 = vst [vmem:[#allocation49_spill] sm:$0xff] %v4225_v21  ;;  %v1684_v9 = vmul.f32 %v1666_v2, %v1636_v28  ;;  %v1685_v31 = vmul.f32 %v1666_v2, %v1637_v58  ;;  %v1210_v35 = vadd.f32 %v1194_v40, %v1067_v48  ;;  %v2696_v2 = vld [vmem:[%s5160_s2 + $0x8] sm:$0xff] }
 0x250   : > { %v1751_v27 = vsel %vm5580_vm11, %v1733_v37, %v3736_v19  ;;  %v5583_v19 = vld [vmem:[#allocation94_spill] sm:$0xff]  ;;  %v4230_v45 = vmul.f32 %v5584_v26, %v716_v12  ;;  %v1779_v59 = vsel %vm4155_vm1, %v1743_v55, 0.0  ;;  %v1352_v51 = vsel %vm3886_vm3, %v1315_v47, 0.0  ;;  %v5587_v12 = vld [vmem:[#allocation53_spill] sm:$0xff]  ;;  %vm5589_vm6 = vmmov %vm5577_vm5 }
 0x251   : > { %v1541_v37 = vmul.f32 %v5583_v19, %v1493_v49  ;;  %v1542_v22 = vmul.f32 %v5583_v19, %v1494_v52  ;;  %v1780_v61 = vsel %vm4160_vm15, %v1751_v27, 0.0  ;;  %v1353_v49 = vsel %vm3916_vm4, %v1323_v62, 0.0  ;;  %v5588_v55 = vld [vmem:[#allocation65_spill] sm:$0xff] }
 0x252   : > { %5585 = vst [vmem:[#allocation45_spill] sm:$0xff] %v4230_v45  ;;  %1852 = vperm.xlu1 %2686, %v2696_v2   ;;  %v4243_v40 = vpop.permute.xlu0 %1438  ;;  %v4246_v48 = vmul.f32 %v5584_v26, %v717_v5  ;;  %v4252_v47 = vsel %vm5589_vm6, %v5588_v55, %v5587_v12  ;;  %v847_v62 = vsel %vm3625_vm9, %v824_v30, 0.0  ;;  %v4266_v5 = vsel %vm5577_vm5, %v5587_v12, %v5588_v55  ;;  %v5593_v30 = vld [vmem:[#allocation7_spill] sm:$0xff]  ;;  %v5594_v2 = vld [vmem:[#allocation62_spill] sm:$0xff]  ;;  %v5603_v55 = vld [vmem:[#allocation56_spill] sm:$0xff] }
 0x253   : > { %v1557_v21 = vadd.f32 %v1541_v37, %v1414_v41  ;;  %v1558_v52 = vadd.f32 %v1542_v22, %v1415_v18  ;;  %v848_v41 = vsel %vm3629_vm10, %v816_v15, 0.0  ;;  %v5590_v18 = vld [vmem:[#allocation91_spill] sm:$0xff]  ;;  %v4260_v26 = vpop.permute.xlu1 %1800  ;;  %5592 = vst [vmem:[#allocation52_spill] sm:$0xff] %v4266_v5  ;;  %v1273_v37 = vadd.f32 %v3743_v56, %v1209_v34 }
 0x254   : > { %5586 = vst [vmem:[#allocation46_spill] sm:$0xff] %v4246_v48  ;;  %v1827_v27 = vmul.f32 %v5590_v18, %v1779_v59  ;;  %v1828_v28 = vmul.f32 %v5590_v18, %v1780_v61  ;;  %5591 = vst [vmem:[#allocation25_spill] sm:$0xff] %v4260_v26  ;;  %v1400_v22 = vmul.f32 %v5593_v30, %v1352_v51  ;;  %v5595_v61 = vld [vmem:[#allocation70_spill] sm:$0xff]  ;;  %vm5596_vm13 = vcmp.lt.s32.totalorder %v3596_v57, 15  ;;  %v5599_v51 = vld [vmem:[#allocation64_spill] sm:$0xff] }
 0x255   : > { %v1700_v58 = vadd.f32 %v1684_v9, %v1557_v21  ;;  %v1701_v19 = vadd.f32 %v1685_v31, %v1558_v52  ;;  %v1401_v15 = vmul.f32 %v5593_v30, %v1353_v49  ;;  %v1274_v59 = vadd.f32 %v3759_v8, %v1210_v35  ;;  %vm5597_vm7 = vmmov %vm5596_vm13  ;;  %v5598_v35 = vld [vmem:[#allocation19_spill] sm:$0xff]  ;;  %v5635_v48 = vld [vmem:[#allocation57_spill] sm:$0xff] }
 0x256   : > { %v960_v31 = vsel %vm5596_vm13, %v5595_v61, %v5594_v2  ;;  %v968_v21 = vsel %vm5597_vm7, %v5594_v2, %v5595_v61  ;;  %1720 = vrot.lane.b32.xlu1 %v3298_v11, %s2734_s26  ;;  %v4282_v56 = vpop.permute.xlu0 %1583  ;;  %v895_v8 = vmul.f32 %v5598_v35, %v847_v62  ;;  %v896_v9 = vmul.f32 %v5598_v35, %v848_v41  ;;  %v5600_v49 = vld [vmem:[#allocation75_spill] sm:$0xff]  ;;  %vm5605_vm5 = vmmov %vm5597_vm7 }
 0x257   : > { %vm5601_vm11 = vcmp.lt.s32.totalorder %v3596_v57, 127  ;;  %2688 = vset.pattern.permute.xlu1 %v5464_v39  ;;  %v5604_v18 = vld [vmem:[#allocation83_spill] sm:$0xff]  ;;  %v1843_v62 = vadd.f32 %v1827_v27, %v1700_v58  ;;  %v1844_v2 = vadd.f32 %v1828_v28, %v1701_v19  ;;  %v4305_v61 = vadd.f32 %v1400_v22, %v1273_v37  ;;  %vm5608_vm7 = vmmov %vm5605_vm5 }
 0x258   : > { %v1313_v52 = vsel %vm5601_vm11, %v5600_v49, %v5599_v51  ;;  %vm5602_vm6 = vmmov %vm5601_vm11  ;;  %v969_v30 = vsel %vm5605_vm5, %v5604_v18, %v5603_v55  ;;  %v4307_v35 = vadd.f32 %v1401_v15, %v1274_v59  ;;  %vm5606_vm13 = vnez %v5481_v6 }
 0x259   : > { %v1321_v12 = vsel %vm5602_vm6, %v5599_v51, %v5600_v49  ;;  %v992_v51 = vsel %vm3657_vm12, %v968_v21, 0.0  ;;  %v993_v39 = vsel %vm5606_vm13, %v960_v31, 0.0  ;;  %v1873_v49 = vpop.permute.xlu1 %1872  ;;  %v1348_v34 = vsel %vm3886_vm3, %v1313_v52, 0.0  ;;  %v5609_v31 = vld [vmem:[#allocation101_spill] sm:$0xff]  ;;  %vm5611_vm11 = vmmov %vm5602_vm6 }
 0x25a   : > { %v1349_v27 = vsel %vm3916_vm4, %v1321_v12, 0.0  ;;  %v1891_v28 = vadd.f32 %v1873_v49, %v1843_v62  ;;  %v1892_v58 = vadd.f32 %v1873_v49, %v1844_v2  ;;  %v4317_v19 = vpop.permute.xlu0 %1728  ;;  %v4320_v37 = vadd.f32 %v895_v8, %v3904_v60  ;;  %v5610_v21 = vld [vmem:[#allocation77_spill] sm:$0xff] }
 0x25b   : > { %5607 = vst [vmem:[#allocation59_spill] sm:$0xff] %v4317_v19  ;;  %v4323_v22 = vadd.f32 %v896_v9, %v3907_v24  ;;  %v961_v15 = vsel %vm5608_vm7, %v5603_v55, %v5604_v18  ;;  %v994_v59 = vsel %vm3657_vm12, %v969_v30, 0.0  ;;  %v1312_v52 = vsel %vm5611_vm11, %v5610_v21, %v5609_v31  ;;  %v5612_v9 = vld [vmem:[#allocation20_spill] sm:$0xff]  ;;  %v5615_v18 = vld [vmem:[#allocation22_spill] sm:$0xff]  ;;  %v5625_v19 = vld [vmem:[#allocation79_spill] sm:$0xff] }
 0x25c   : > { %v1320_v60 = vsel %vm5602_vm6, %v5609_v31, %v5610_v21  ;;  %v1907_v24 = vadd.f32 3.0, %v1891_v28  ;;  %v1908_v8 = vadd.f32 3.0, %v1892_v58  ;;  %v4340_v12 = vmul.f32 %v5612_v9, %v992_v51 }
 0x25d   : > { %v4343_v55 = vmul.f32 %v5612_v9, %v993_v39  ;;  %v1396_v30 = vmul.f32 %v5615_v18, %v1348_v34  ;;  %v1397_v62 = vmul.f32 %v5615_v18, %v1349_v27  ;;  %v1085_v2 = vpop.permute.xlu1 %1084  ;;  %vm5616_vm5 = vcmp.lt.s32.totalorder %v3596_v57, 1  ;;  %v5619_v39 = vld [vmem:[#allocation12_spill] sm:$0xff]  ;;  %v5622_v9 = vld [vmem:[#allocation102_spill] sm:$0xff] }
 0x25e   : > { %5613 = vst [vmem:[#allocation50_spill] sm:$0xff] %v4340_v12  ;;  %v1923_v49 = vmax.f32 %v1907_v24, 0.0  ;;  %v1924_v41 = vmax.f32 %v1908_v8, 0.0  ;;  %v4350_v26 = vsel %vm5616_vm5, %v3821_v13, %v1085_v2  ;;  %vm5617_vm7 = vmmov %vm5616_vm5  ;;  %v4357_v31 = vpop.permute.xlu0 %1645  ;;  %v995_v34 = vsel %vm5606_vm13, %v961_v15, 0.0  ;;  %v5621_v8 = vld [vmem:[#allocation8_spill] sm:$0xff]  ;;  %v5624_v12 = vld [vmem:[#allocation103_spill] sm:$0xff] }
 0x25f   : > { %5614 = vst [vmem:[#allocation61_spill] sm:$0xff] %v4343_v55  ;;  %v4355_v51 = vsel %vm5617_vm7, %v1085_v2, %v3821_v13  ;;  %5618 = vst [vmem:[#allocation16_spill] sm:$0xff] %v4357_v31  ;;  %v4362_v27 = vmul.f32 %v5619_v39, %v994_v59  ;;  %v1346_v21 = vsel %vm3886_vm3, %v1312_v52, 0.0  ;;  %v1347_v24 = vsel %vm3916_vm4, %v1320_v60, 0.0  ;;  %v5623_v55 = vld [vmem:[#allocation9_spill] sm:$0xff]  ;;  %v5628_v52 = vld [vmem:[#allocation110_spill] sm:$0xff] }
 0x260   : > { %v1253_v18 = vmul.f32 %v5622_v9, %v5621_v8  ;;  %v1254_v13 = vmul.f32 %v5622_v9, %v5623_v55  ;;  %v1939_v2 = vmin.f32 %v1923_v49, 6.0  ;;  %v1940_v31 = vmin.f32 %v1924_v41, 6.0 }
 0x261   : > { %5620 = vst [vmem:[#allocation2_spill] sm:$0xff] %v4362_v27  ;;  %vm5626_vm11 = vcmp.lt.s32.totalorder %v3596_v57, 113  ;;  %v1296_v55 = vpop.permute.xlu1 %1295  ;;  %v5634_v27 = vld [vmem:[#allocation84_spill] sm:$0xff] }
 0x262   : > { %v1456_v15 = vsel %vm5626_vm11, %v5625_v19, %v5624_v12  ;;  %vm5627_vm6 = vmmov %vm5626_vm11  ;;  %v1955_v49 = vmul.f32 %v1939_v2, %v1891_v28  ;;  %v1956_v8 = vmul.f32 %v1940_v31, %v1892_v58  ;;  %vm5631_vm11 = vcmp.lt.s32.totalorder %v3596_v57, 127  ;;  %v5637_v58 = vld [vmem:[#allocation32_spill] sm:$0xff] }
 0x263   : > { %v1464_v59 = vsel %vm5627_vm6, %v5624_v12, %v5625_v19  ;;  %vm5629_vm5 = vmmov %vm5627_vm6  ;;  %v4391_v9 = vsel %vm5631_vm11, %v3863_v1, %v1296_v55  ;;  %v4398_v12 = vpop.permute.xlu0 %1275  ;;  %v1394_v31 = vmul.f32 %v5637_v58, %v1346_v21  ;;  %v1395_v2 = vmul.f32 %v5637_v58, %v1347_v24 }
 0x264   : > { %v1455_v60 = vsel %vm5629_vm5, %v5628_v52, %v4035_v7  ;;  %vm5630_vm7 = vmmov %vm5629_vm5  ;;  %5633 = vst [vmem:[#allocation54_spill] sm:$0xff] %v4398_v12  ;;  %v4416_v12 = vmul.f32 0.16666667, %v1956_v8  ;;  %v1269_v45 = vadd.f32 %v1253_v18, %v3955_v25  ;;  %v1270_v5 = vadd.f32 %v1254_v13, %v3957_v14  ;;  %v5641_v18 = vld [vmem:[#allocation18_spill] sm:$0xff]  ;;  %v5642_v13 = vld [vmem:[#allocation85_spill] sm:$0xff] }
 0x265   : > { %v1463_v41 = vsel %vm5630_vm7, %v4035_v7, %v5628_v52  ;;  %vm5632_vm6 = vmmov %vm5631_vm11  ;;  %v1458_v7 = vsel %vm5629_vm5, %v5635_v48, %v5634_v27  ;;  %v4424_v21 = vpop.permute.xlu1 %1440  ;;  %v4427_v24 = vmul.f32 %v5619_v39, %v995_v34  ;;  %v5645_v34 = vld [vmem:[#allocation96_spill] sm:$0xff]  ;;  %v1410_v8 = vadd.f32 %v1394_v31, %v3854_v29  ;;  %v5648_v31 = vld [vmem:[#allocation42_spill] sm:$0xff] }
 0x266   : > { %v4396_v19 = vsel %vm5632_vm6, %v1296_v55, %v3863_v1  ;;  %vm5636_vm7 = vmmov %vm5629_vm5  ;;  %v1489_v1 = vsel %vm4101_vm2, %v1455_v60, 0.0  ;;  %v1490_v52 = vsel %vm4108_vm8, %v1463_v41, 0.0  ;;  %v4414_v55 = vmul.f32 0.16666667, %v1955_v49  ;;  %5639 = vst [vmem:[#allocation23_spill] sm:$0xff] %v4416_v12 }
 0x267   : > { %v1466_v28 = vsel %vm5636_vm7, %v5634_v27, %v5635_v48  ;;  %v1491_v48 = vsel %vm4101_vm2, %v1456_v15, 0.0  ;;  %v1492_v27 = vsel %vm4108_vm8, %v1464_v59, 0.0  ;;  %v1495_v60 = vsel %vm4101_vm2, %v1458_v7, 0.0  ;;  %v4433_v25 = vpop.permute.xlu0 %1420 }
 0x268   : > { %5638 = vst [vmem:[#allocation58_spill] sm:$0xff] %v4414_v55  ;;  %v1496_v41 = vsel %vm4108_vm8, %v1466_v28, 0.0  ;;  %5640 = vst [vmem:[#allocation5_spill] sm:$0xff] %v4433_v25  ;;  %v1993_v14 = vadd.f32 %v4416_v12, %v4414_v55  ;;  %v4439_v15 = vmul.f32 %v5642_v13, %v5641_v18  ;;  %v4443_v59 = vmul.f32 %v5642_v13, %v3098_v50  ;;  %v5646_v28 = vld [vmem:[#allocation35_spill] sm:$0xff]  ;;  %v5647_v13 = vld [vmem:[#allocation17_spill] sm:$0xff] }
 0x269   : > { %v1537_v39 = vmul.f32 %v5645_v34, %v1489_v1  ;;  %v1538_v49 = vmul.f32 %v5645_v34, %v1490_v52  ;;  %v1411_v7 = vadd.f32 %v1395_v2, %v3856_v33  ;;  %v1539_v58 = vmul.f32 %v5646_v28, %v1491_v48  ;;  %v1586_v52 = vpop.permute.xlu1 %1585  ;;  %v5652_v48 = vld [vmem:[#allocation89_spill] sm:$0xff] }
 0x26a   : > { %5643 = vst [vmem:[#allocation112_spill] sm:$0xff] %v4439_v15  ;;  %5644 = vst [vmem:[#allocation14_spill] sm:$0xff] %v4443_v59  ;;  %v1540_v12 = vmul.f32 %v5646_v28, %v1492_v27  ;;  %1994 = vadd.xlane.f32.xlu0 %v1993_v14  ;;  %v1412_v55 = vadd.f32 %v1396_v30, %v1269_v45  ;;  %v1413_v18 = vadd.f32 %v1397_v62, %v1270_v5  ;;  %v5654_v28 = vld [vmem:[#allocation88_spill] sm:$0xff] }
 0x26b   : > { %v1634_v50 = vsel %vm4120_vm14, %v4083_v10, 0.0  ;;  %v1635_v1 = vsel %vm4127_vm0, %v4088_v54, 0.0  ;;  %v1543_v29 = vmul.f32 %v5647_v13, %v1495_v60  ;;  %v1544_v33 = vmul.f32 %v5647_v13, %v1496_v41  ;;  %v4465_v5 = vpop.permute.xlu0 %1565  ;;  %v5653_v41 = vld [vmem:[#allocation114_spill] sm:$0xff] }
 0x26c   : > { %vm5649_vm11 = vcmp.lt.s32.totalorder %v3596_v57, 112  ;;  %5651 = vst [vmem:[#allocation100_spill] sm:$0xff] %v4465_v5  ;;  %v1553_v10 = vadd.f32 %v1537_v39, %v1410_v8  ;;  %v1554_v30 = vadd.f32 %v1538_v49, %v1411_v7  ;;  %v1682_v27 = vmul.f32 %v5652_v48, %v1634_v50  ;;  %v5658_v50 = vld [vmem:[#allocation4_spill] sm:$0xff] }
 0x26d   : > { %v1598_v2 = vsel %vm5649_vm11, %v5648_v31, %v1586_v52  ;;  %vm5650_vm6 = vmmov %vm5649_vm11  ;;  %v1683_v60 = vmul.f32 %v5652_v48, %v1635_v1  ;;  %v1555_v8 = vadd.f32 %v1539_v58, %v1412_v55  ;;  %v1556_v7 = vadd.f32 %v1540_v12, %v1413_v18  ;;  %v1731_v13 = vpop.permute.xlu1 %1730  ;;  %v5663_v48 = vld [vmem:[#allocation73_spill] sm:$0xff] }
 0x26e   : > { %v1606_v45 = vsel %vm5650_vm6, %v1586_v52, %v5648_v31  ;;  %v1632_v54 = vsel %vm4120_vm14, %v1598_v2, 0.0  ;;  %v5655_v52 = vld [vmem:[#allocation80_spill] sm:$0xff]  ;;  %vm5656_vm5 = vmmov %vm5650_vm6  ;;  %vm5659_vm11 = vcmp.lt.s32.totalorder %v3596_v57, 111 }
 0x26f   : > { %v1633_v62 = vsel %vm4127_vm0, %v1606_v45, 0.0  ;;  %v1680_v14 = vmul.f32 %v5653_v41, %v1632_v54  ;;  %v1601_v39 = vsel %vm5656_vm5, %v5655_v52, %v5654_v28  ;;  %vm5657_vm7 = vmmov %vm5656_vm5  ;;  %v1742_v1 = vsel %vm5659_vm11, %v5658_v50, %v1731_v13  ;;  %v4489_v2 = vpop.permute.xlu0 %1710 }
 0x270   : > { %v1681_v34 = vmul.f32 %v5653_v41, %v1633_v62  ;;  %v1609_v49 = vsel %vm5657_vm7, %v5654_v28, %v5655_v52  ;;  %vm5660_vm6 = vmmov %vm5659_vm11  ;;  %5661 = vst [vmem:[#allocation15_spill] sm:$0xff] %v4489_v2  ;;  %v5662_v62 = vld [vmem:[#allocation86_spill] sm:$0xff]  ;;  %vm5664_vm5 = vcmp.lt.s32.totalorder %v3596_v57, 1  ;;  %v1777_v58 = vsel %vm4155_vm1, %v1742_v1, 0.0  ;;  %v5694_v2 = vld [vmem:[#allocation76_spill] sm:$0xff] }
 0x271   : > { %v1750_v31 = vsel %vm5660_vm6, %v1731_v13, %v5658_v50  ;;  %v4491_v45 = vadd.f32 %v1680_v14, %v1553_v10  ;;  %v1104_v12 = vsel %vm5664_vm5, %v5663_v48, %v5662_v62  ;;  %vm5665_vm7 = vmmov %vm5664_vm5  ;;  %v5666_v10 = vld [vmem:[#allocation116_spill] sm:$0xff]  ;;  %v1698_v14 = vadd.f32 %v1682_v27, %v1555_v8  ;;  %v4515_v1 = vpop.permute.xlu1 %1502  ;;  %v5673_v27 = vld [vmem:[#allocation113_spill] sm:$0xff] }
 0x272   : > { %v4493_v54 = vadd.f32 %v1681_v34, %v1554_v30  ;;  %v1112_v55 = vsel %vm5665_vm7, %v5662_v62, %v5663_v48  ;;  %v1778_v18 = vsel %vm4160_vm15, %v1750_v31, 0.0  ;;  %v1825_v41 = vmul.f32 %v5666_v10, %v1777_v58  ;;  %5667 = vst [vmem:[#allocation63_spill] sm:$0xff] %v4515_v1  ;;  %v5668_v62 = vld [vmem:[#allocation97_spill] sm:$0xff]  ;;  %v5669_v31 = vld [vmem:[#allocation74_spill] sm:$0xff]  ;;  %v5677_v8 = vld [vmem:[#allocation71_spill] sm:$0xff] }
 0x273   : > { %v1826_v30 = vmul.f32 %v5666_v10, %v1778_v18  ;;  %v1699_v34 = vadd.f32 %v1683_v60, %v1556_v7  ;;  %v1559_v28 = vadd.f32 %v1543_v29, %v4305_v61  ;;  %v1560_v52 = vadd.f32 %v1544_v33, %v4307_v35  ;;  %v4525_v29 = vpop.permute.xlu0 %1641  ;;  %v5680_v18 = vld [vmem:[#allocation24_spill] sm:$0xff]  ;;  %v5704_v1 = vld [vmem:[#allocation26_spill] sm:$0xff] }
 0x274   : > { %v1638_v13 = vsel %vm4120_vm14, %v1601_v39, 0.0  ;;  %v1639_v50 = vsel %vm4127_vm0, %v1609_v49, 0.0  ;;  %vm5670_vm11 = vcmp.lt.s32.totalorder %v3596_v57, 15  ;;  %5672 = vst [vmem:[#allocation51_spill] sm:$0xff] %v4525_v29  ;;  %v4527_v35 = vadd.f32 %v1825_v41, %v1698_v14  ;;  %v5676_v49 = vld [vmem:[#allocation93_spill] sm:$0xff]  ;;  %v5682_v14 = vld [vmem:[#allocation106_spill] sm:$0xff] }
 0x275   : > { %v959_v48 = vsel %vm5670_vm11, %v5669_v31, %v5668_v62  ;;  %vm5671_vm6 = vmmov %vm5670_vm11  ;;  %v4529_v33 = vadd.f32 %v1826_v30, %v1699_v34  ;;  %vm5674_vm5 = vnez %v5673_v27  ;;  %vm5675_vm7 = vnez %v5488_v46  ;;  %v5681_v30 = vld [vmem:[#allocation41_spill] sm:$0xff]  ;;  %v5693_v29 = vld [vmem:[#allocation99_spill] sm:$0xff] }
 0x276   : > { %v967_v61 = vsel %vm5671_vm6, %v5668_v62, %v5669_v31  ;;  %v1137_v60 = vsel %vm5674_vm5, %v1112_v55, 0.0  ;;  %v1138_v39 = vsel %vm5675_vm7, %v1104_v12, 0.0  ;;  %vm5678_vm11 = vcmp.lt.s32.totalorder %v3596_v57, 17  ;;  %v5685_v31 = vld [vmem:[#allocation107_spill] sm:$0xff] }
 0x277   : > { %v681_v7 = vsel %vm5678_vm11, %v5677_v8, %v5676_v49  ;;  %vm5679_vm6 = vmmov %vm5678_vm11  ;;  %v1686_v10 = vmul.f32 %v5680_v18, %v1638_v13  ;;  %v1687_v41 = vmul.f32 %v5680_v18, %v1639_v50  ;;  %vm5683_vm0 = vcmp.lt.s32.totalorder %v3596_v57, 1  ;;  %v5686_v13 = vld [vmem:[#allocation90_spill] sm:$0xff] }
 0x278   : > { %v689_v58 = vsel %vm5679_vm6, %v5676_v49, %v5677_v8  ;;  %v1102_v55 = vsel %vm5683_vm0, %v5682_v14, %v5681_v30  ;;  %vm5684_vm14 = vmmov %vm5683_vm0  ;;  %v990_v34 = vsel %vm3657_vm12, %v967_v61, 0.0  ;;  %v991_v62 = vsel %vm5606_vm13, %v959_v48, 0.0  ;;  %v5689_v8 = vld [vmem:[#allocation36_spill] sm:$0xff] }
 0x279   : > { %v1110_v12 = vsel %vm5684_vm14, %v5681_v30, %v5682_v14  ;;  %vm5687_vm11 = vcmp.lt.s32.totalorder %v3596_v57, 111  ;;  %v4566_v18 = vmul.f32 %v5689_v8, %v1137_v60  ;;  %v4569_v30 = vmul.f32 %v5689_v8, %v1138_v39  ;;  %v4575_v14 = vpop.permute.xlu1 %1649 }
 0x27a   : > { %v1744_v50 = vsel %vm5687_vm11, %v5686_v13, %v5685_v31  ;;  %vm5688_vm0 = vmmov %vm5687_vm11  ;;  %vm5690_vm14 = vnez %v5469_v17  ;;  %vm5691_vm6 = vnez %v5476_v4  ;;  %5692 = vst [vmem:[#allocation31_spill] sm:$0xff] %v4575_v14  ;;  %vm5695_vm11 = vcmp.lt.s32.totalorder %v3596_v57, 1  ;;  %v4589_v4 = vpop.permute.xlu0 %1796  ;;  %v5699_v14 = vld [vmem:[#allocation95_spill] sm:$0xff] }
 0x27b   : > { %v1752_v49 = vsel %vm5688_vm0, %v5685_v31, %v5686_v13  ;;  %v710_v61 = vsel %vm5690_vm14, %v689_v58, 0.0  ;;  %v711_v48 = vsel %vm5691_vm6, %v681_v7, 0.0  ;;  %v1103_v5 = vsel %vm5695_vm11, %v5694_v2, %v5693_v29  ;;  %vm5696_vm0 = vmmov %vm5695_vm11  ;;  %5697 = vst [vmem:[#allocation67_spill] sm:$0xff] %v4589_v4  ;;  %v5698_v7 = vld [vmem:[#allocation27_spill] sm:$0xff] }
 0x27c   : > { %v1111_v60 = vsel %vm5696_vm0, %v5693_v29, %v5694_v2  ;;  %v1133_v39 = vsel %vm5674_vm5, %v1110_v12, 0.0  ;;  %v1134_v17 = vsel %vm5675_vm7, %v1102_v55, 0.0  ;;  %v1038_v58 = vmul.f32 %v5698_v7, %v990_v34  ;;  %v5700_v2 = vld [vmem:[#allocation72_spill] sm:$0xff] }
 0x27d   : > { %v1039_v31 = vmul.f32 %v5698_v7, %v991_v62  ;;  %v1781_v13 = vsel %vm4155_vm1, %v1744_v50, 0.0  ;;  %v1782_v8 = vsel %vm4160_vm15, %v1752_v49, 0.0  ;;  %vm5701_vm14 = vcmp.lt.s32.totalorder %v3596_v57, 16  ;;  %v5703_v49 = vld [vmem:[#allocation69_spill] sm:$0xff] }
 0x27e   : > { %v4601_v29 = vsel %vm5701_vm14, %v5700_v2, %v5699_v14  ;;  %vm5702_vm6 = vmmov %vm5701_vm14  ;;  %v1702_v12 = vadd.f32 %v1686_v10, %v1559_v28  ;;  %v1703_v34 = vadd.f32 %v1687_v41, %v1560_v52  ;;  %v1135_v62 = vsel %vm5674_vm5, %v1111_v60, 0.0  ;;  %v1869_v52 = vpop.permute.xlu1 %1868  ;;  %v4623_v10 = vpop.permute.xlu0 %1563 }
 0x27f   : > { %v4607_v55 = vsel %vm5702_vm6, %v5699_v14, %v5700_v2  ;;  %v1136_v50 = vsel %vm5675_vm7, %v1103_v5, 0.0  ;;  %v1181_v7 = vmul.f32 %v5703_v49, %v1133_v39  ;;  %v1182_v4 = vmul.f32 %v5703_v49, %v1134_v17  ;;  %v5705_v14 = vld [vmem:[#allocation37_spill] sm:$0xff]  ;;  %5706 = vst [vmem:[#allocation78_spill] sm:$0xff] %v4623_v10 }
 0x280   : > { %v4616_v25 = vmul.f32 %v5704_v1, %v710_v61  ;;  %v4619_v59 = vmul.f32 %v5704_v1, %v711_v48  ;;  %v1829_v2 = vmul.f32 %v5705_v14, %v1781_v13  ;;  %v1830_v28 = vmul.f32 %v5705_v14, %v1782_v8  ;;  %v5707_v61 = vld [vmem:[#allocation28_spill] sm:$0xff]  ;;  %v5710_v17 = vld [vmem:[#allocation21_spill] sm:$0xff] }
 0x281   : > { %v1054_v41 = vadd.f32 %v1038_v58, %v4320_v37  ;;  %v1055_v5 = vadd.f32 %v1039_v31, %v4323_v22  ;;  %v4634_v48 = vmul.f32 %v5707_v61, %v1135_v62  ;;  %v4637_v39 = vmul.f32 %v5707_v61, %v1136_v50  ;;  %v5711_v13 = vld [vmem:[#allocation104_spill] sm:$0xff]  ;;  %v5712_v37 = vld [vmem:[#allocation30_spill] sm:$0xff]  ;;  %v5714_v31 = vld [vmem:[#allocation117_spill] sm:$0xff] }
 0x282   : > { %v4641_v8 = vmul.f32 %v5711_v13, %v5710_v17  ;;  %v4645_v22 = vmul.f32 %v5711_v13, %v5712_v37  ;;  %v5713_v58 = vld [vmem:[#allocation118_spill] sm:$0xff]  ;;  %vm5715_vm11 = vcmp.lt.s32.totalorder %v3596_v57, 15  ;;  %v5717_v61 = vld [vmem:[#allocation109_spill] sm:$0xff]  ;;  %v1278_v13 = vpop.permute.xlu1 %1277  ;;  %v4659_v37 = vpop.permute.xlu0 %1708  ;;  %v4661_v10 = vadd.f32 %v1829_v2, %v1702_v12 }
 0x283   : > { %5708 = vst [vmem:[#allocation105_spill] sm:$0xff] %v4634_v48  ;;  %5709 = vst [vmem:[#allocation81_spill] sm:$0xff] %v4637_v39  ;;  %v958_v49 = vsel %vm5715_vm11, %v5714_v31, %v5713_v58  ;;  %v1197_v50 = vadd.f32 %v1181_v7, %v1054_v41  ;;  %v1198_v14 = vadd.f32 %v1182_v4, %v1055_v5  ;;  %v5718_v1 = vld [vmem:[#allocation13_spill] sm:$0xff]  ;;  %v5720_v39 = vld [vmem:[#allocation38_spill] sm:$0xff]  ;;  %vm5722_vm14 = vcmp.lt.s32.totalorder %v3596_v57, 127 }
 0x284   : > { %vm5716_vm0 = vmmov %vm5715_vm11  ;;  %v1245_v17 = vmul.f32 %v5717_v61, %v5581_v23  ;;  %v1246_v60 = vmul.f32 %v5717_v61, %v5718_v1  ;;  %5719 = vst [vmem:[#allocation66_spill] sm:$0xff] %v4659_v37  ;;  %v4663_v15 = vadd.f32 %v1830_v28, %v1703_v34  ;;  %v5721_v48 = vld [vmem:[#allocation108_spill] sm:$0xff]  ;;  %v989_v7 = vsel %vm5606_vm13, %v958_v49, 0.0  ;;  %v5726_v1 = vld [vmem:[#allocation47_spill] sm:$0xff] }
 0x285   : > { %v966_v62 = vsel %vm5716_vm0, %v5713_v58, %v5714_v31  ;;  %v1311_v58 = vsel %vm5722_vm14, %v5721_v48, %v5720_v39  ;;  %vm5723_vm6 = vmmov %vm5722_vm14  ;;  %v5727_v31 = vld [vmem:[#allocation33_spill] sm:$0xff]  ;;  %vm5738_vm14 = vnez %v5545_v63  ;;  %v5798_v63 = vld [vmem:[#allocation51_spill] sm:$0xff] }
 0x286   : > { %v1319_v23 = vsel %vm5723_vm6, %v5720_v39, %v5721_v48  ;;  %vm5724_vm11 = vmmov %vm5723_vm6  ;;  %v988_v34 = vsel %vm3657_vm12, %v966_v62, 0.0  ;;  %v1261_v41 = vadd.f32 %v1245_v17, %v1197_v50  ;;  %v1262_v5 = vadd.f32 %v1246_v60, %v1198_v14  ;;  %v1423_v62 = vpop.permute.xlu1 %1422  ;;  %v5759_v37 = vld [vmem:[#allocation29_spill] sm:$0xff] }
 0x287   : > { %v1309_v4 = vsel %vm5724_vm11, %v1278_v13, %v4215_v32  ;;  %vm5725_vm0 = vmmov %vm5723_vm6  ;;  %v1344_v6 = vsel %vm3886_vm3, %v1311_v58, 0.0  ;;  %v1345_v49 = vsel %vm3916_vm4, %v1319_v23, 0.0  ;;  %v1131_v60 = vsel %vm5674_vm5, %v4355_v51, 0.0 }
 0x288   : > { %v1317_v12 = vsel %vm5725_vm0, %v4215_v32, %v1278_v13  ;;  %v1340_v2 = vsel %vm3886_vm3, %v1309_v4, 0.0  ;;  %v5728_v32 = vld [vmem:[#allocation115_spill] sm:$0xff]  ;;  %v1132_v50 = vsel %vm5675_vm7, %v4350_v26, 0.0  ;;  %v5730_v13 = vld [vmem:[#allocation82_spill] sm:$0xff]  ;;  %vm5731_vm12 = vcmp.lt.s32.totalorder %v3596_v57, 113 }
 0x289   : > { %v1341_v28 = vsel %vm3916_vm4, %v1317_v12, 0.0  ;;  %v1388_v48 = vmul.f32 %v5726_v1, %v1340_v2  ;;  %v4691_v61 = vmul.f32 %v5728_v32, %v5727_v31  ;;  %v4695_v20 = vmul.f32 %v5728_v32, %v3298_v11  ;;  %v4711_v11 = vpop.permute.xlu0 %1784  ;;  %vm5732_vm13 = vmmov %vm5731_vm12  ;;  %v5733_v26 = vld [vmem:[#allocation87_spill] sm:$0xff] }
 0x28a   : > { %v1389_v39 = vmul.f32 %v5726_v1, %v1341_v28  ;;  %5729 = vst [vmem:[#allocation55_spill] sm:$0xff] %v4711_v11  ;;  %v4714_v58 = vmul.f32 %v5730_v13, %v988_v34  ;;  %v4717_v23 = vmul.f32 %v5730_v13, %v989_v7  ;;  %v1453_v51 = vsel %vm5731_vm12, %v1423_v62, %v4243_v40  ;;  %v5734_v7 = vld [vmem:[#allocation92_spill] sm:$0xff]  ;;  %v1568_v1 = vpop.permute.xlu1 %1567  ;;  %vm5746_vm11 = vmmov %vm5731_vm12 }
 0x28b   : > { %v4707_v14 = vadd.f32 %v1388_v48, %v1261_v41  ;;  %v1461_v46 = vsel %vm5732_vm13, %v4243_v40, %v1423_v62  ;;  %v4726_v27 = vmul.f32 %v5733_v26, %v1344_v6  ;;  %v4729_v4 = vmul.f32 %v5733_v26, %v1345_v49  ;;  %v5735_v41 = vld [vmem:[#allocation49_spill] sm:$0xff]  ;;  %vm5747_vm0 = vmmov %vm5746_vm11 }
 0x28c   : > { %v4709_v17 = vadd.f32 %v1389_v39, %v1262_v5  ;;  %v1485_v12 = vsel %vm4101_vm2, %v1453_v51, 0.0  ;;  %v1486_v34 = vsel %vm4108_vm8, %v1461_v46, 0.0  ;;  %v4736_v2 = vmul.f32 %v5734_v7, %v1131_v60  ;;  %v5740_v60 = vld [vmem:[#allocation48_spill] sm:$0xff]  ;;  %v5744_v46 = vld [vmem:[#allocation111_spill] sm:$0xff] }
 0x28d   : > { %v4739_v28 = vmul.f32 %v5734_v7, %v1132_v50  ;;  %v4742_v40 = vmul.f32 %v5735_v41, %v1485_v12  ;;  %v4745_v5 = vmul.f32 %v5735_v41, %v1486_v34  ;;  %v1342_v48 = vsel %vm3886_vm3, %v4391_v9, 0.0  ;;  %v875_v62 = vpop.permute.xlu0 %874  ;;  %v5745_v34 = vld [vmem:[#allocation40_spill] sm:$0xff] }
 0x28e   : > { %v1343_v39 = vsel %vm3916_vm4, %v4396_v19, 0.0  ;;  %vm5736_vm5 = vcmp.lt.s32.totalorder %v3596_v57, 112  ;;  %v4760_v6 = vadd.f32 %v1869_v52, %v4527_v35  ;;  %v4763_v49 = vadd.f32 %v1869_v52, %v4529_v33  ;;  %v5742_v33 = vld [vmem:[#allocation52_spill] sm:$0xff]  ;;  %v1713_v41 = vpop.permute.xlu1 %1712 }
 0x28f   : > { %v1597_v31 = vsel %vm5736_vm5, %v1568_v1, %v4282_v56  ;;  %vm5737_vm7 = vmmov %vm5736_vm5  ;;  %vm5739_vm6 = vnez %v5548_v44  ;;  %v5743_v52 = vsel %vm3629_vm10, %v5742_v33, 0.0  ;;  %v4784_v26 = vmul.f32 %v5744_v46, %v1342_v48  ;;  %v5750_v48 = vld [vmem:[#allocation59_spill] sm:$0xff]  ;;  %v5753_v33 = vld [vmem:[#allocation2_spill] sm:$0xff] }
 0x290   : > { %v1605_v32 = vsel %vm5737_vm7, %v4282_v56, %v1568_v1  ;;  %v1630_v9 = vsel %vm5738_vm14, %v1597_v31, 0.0  ;;  %v5741_v56 = vsel %vm3625_vm9, %v4252_v47, 0.0  ;;  %v900_v51 = vmul.f32 %v875_v62, %v5743_v52  ;;  %v5748_v1 = vld [vmem:[#allocation45_spill] sm:$0xff]  ;;  %vm5775_vm5 = vmmov %vm5747_vm0 }
 0x291   : > { %v1631_v19 = vsel %vm5739_vm6, %v1605_v32, 0.0  ;;  %v4770_v50 = vmul.f32 %v5740_v60, %v1630_v9  ;;  %v899_v35 = vmul.f32 %v875_v62, %v5741_v56  ;;  %v4787_v12 = vmul.f32 %v5744_v46, %v1343_v39  ;;  %v5749_v32 = vld [vmem:[#allocation46_spill] sm:$0xff]  ;;  %v5754_v46 = vld [vmem:[#allocation25_spill] sm:$0xff]  ;;  %vm5776_vm7 = vmmov %vm5747_vm0 }
 0x292   : > { %v4773_v13 = vmul.f32 %v5740_v60, %v1631_v19  ;;  %v1454_v7 = vsel %vm5746_vm11, %v5745_v34, %v4424_v21  ;;  %v1462_v47 = vsel %vm5747_vm0, %v4424_v21, %v5745_v34  ;;  %v916_v9 = vadd.f32 %v900_v51, %v5749_v32 }
 0x293   : > { %v915_v31 = vadd.f32 %v899_v35, %v5748_v1  ;;  %vm5751_vm12 = vcmp.lt.s32.totalorder %v3596_v57, 111  ;;  %v1905_v62 = vadd.f32 3.0, %v4760_v6  ;;  %v1906_v60 = vadd.f32 3.0, %v4763_v49  ;;  %v871_v35 = vpop.permute.xlu0 %870 }
 0x294   : > { %v1741_v39 = vsel %vm5751_vm12, %v1713_v41, %v5750_v48  ;;  %vm5752_vm13 = vmmov %vm5751_vm12  ;;  %v1059_v51 = vadd.f32 %v4427_v24, %v916_v9  ;;  %v1488_v32 = vsel %vm4108_vm8, %v1462_v47, 0.0  ;;  %v4827_v9 = vpop.permute.xlu1 %1498 }
 0x295   : > { %v1749_v19 = vsel %vm5752_vm13, %v5750_v48, %v1713_v41  ;;  %v1775_v21 = vsel %vm4155_vm1, %v1741_v39, 0.0  ;;  %v1058_v52 = vadd.f32 %v5753_v33, %v915_v31  ;;  %v1487_v41 = vsel %vm4101_vm2, %v1454_v7, 0.0  ;;  %v5755_v48 = vld [vmem:[#allocation43_spill] sm:$0xff]  ;;  %v5757_v31 = vld [vmem:[#allocation44_spill] sm:$0xff]  ;;  %vm5783_vm11 = vmmov %vm5751_vm12 }
 0x296   : > { %v1776_v56 = vsel %vm4160_vm15, %v1749_v19, 0.0  ;;  %v1823_v34 = vmul.f32 %v5754_v46, %v1775_v21  ;;  %v5756_v39 = vsel %vm3625_vm9, %v5755_v48, 0.0  ;;  %v5758_v33 = vsel %vm3629_vm10, %v5757_v31, 0.0  ;;  %vm5784_vm0 = vmmov %vm5783_vm11 }
 0x297   : > { %v1824_v1 = vmul.f32 %v5754_v46, %v1776_v56  ;;  %v897_v19 = vmul.f32 %v871_v35, %v5756_v39  ;;  %v898_v24 = vmul.f32 %v871_v35, %v5758_v33  ;;  %v1201_v21 = vadd.f32 %v4566_v18, %v1058_v52  ;;  %v5760_v39 = vld [vmem:[#allocation39_spill] sm:$0xff]  ;;  %v863_v0 = vpop.permute.xlu0 %862  ;;  %v5764_v52 = vld [vmem:[#allocation50_spill] sm:$0xff]  ;;  %v5767_v33 = vld [vmem:[#allocation81_spill] sm:$0xff] }
 0x298   : > { %v1202_v56 = vadd.f32 %v4569_v30, %v1059_v51  ;;  %v1839_v7 = vadd.f32 %v1823_v34, %v4491_v45  ;;  %v1921_v46 = vmax.f32 %v1905_v62, 0.0  ;;  %v1922_v11 = vmax.f32 %v1906_v60, 0.0  ;;  %v5763_v62 = vld [vmem:[#allocation98_spill] sm:$0xff]  ;;  %v5765_v34 = vld [vmem:[#allocation61_spill] sm:$0xff] }
 0x299   : > { %v1840_v47 = vadd.f32 %v1824_v1, %v4493_v54  ;;  %v913_v48 = vadd.f32 %v897_v19, %v5759_v37  ;;  %v914_v53 = vadd.f32 %v898_v24, %v5760_v39  ;;  %v1265_v31 = vadd.f32 %v4641_v8, %v1201_v21  ;;  %v4851_v1 = vpop.permute.xlu1 %1792  ;;  %v5766_v19 = vld [vmem:[#allocation105_spill] sm:$0xff] }
 0x29a   : > { %v1266_v35 = vadd.f32 %v4645_v22, %v1202_v56  ;;  %v5761_v18 = vsel %vm3625_vm9, %v4607_v55, 0.0  ;;  %v5762_v45 = vsel %vm3629_vm10, %v4601_v29, 0.0  ;;  %v1535_v60 = vmul.f32 %v5763_v62, %v1487_v41  ;;  %v5768_v56 = vld [vmem:[#allocation112_spill] sm:$0xff] }
 0x29b   : > { %v893_v30 = vmul.f32 %v863_v0, %v5761_v18  ;;  %v894_v54 = vmul.f32 %v863_v0, %v5762_v45  ;;  %v1536_v37 = vmul.f32 %v5763_v62, %v1488_v32  ;;  %v1056_v51 = vadd.f32 %v5764_v52, %v913_v48  ;;  %v1877_v24 = vpop.permute.xlu0 %1876 }
 0x29c   : > { %v1057_v8 = vadd.f32 %v5765_v34, %v914_v53  ;;  %v1408_v55 = vadd.f32 %v4726_v27, %v1265_v31  ;;  %v1409_v38 = vadd.f32 %v4729_v4, %v1266_v35  ;;  %v1937_v29 = vmin.f32 %v1921_v46, 6.0  ;;  %v5769_v27 = vld [vmem:[#allocation14_spill] sm:$0xff] }
 0x29d   : > { %v909_v22 = vadd.f32 %v893_v30, %v4616_v25  ;;  %v910_v36 = vadd.f32 %v894_v54, %v4619_v59  ;;  %v1938_v0 = vmin.f32 %v1922_v11, 6.0  ;;  %v1199_v41 = vadd.f32 %v5766_v19, %v1056_v51  ;;  %v1865_v30 = vpop.permute.xlu1 %1864 }
 0x29e   : > { %v1200_v32 = vadd.f32 %v5767_v33, %v1057_v8  ;;  %v1893_v25 = vadd.f32 %v1877_v24, %v4661_v10  ;;  %v1894_v59 = vadd.f32 %v1877_v24, %v4663_v15  ;;  %v1551_v4 = vadd.f32 %v1535_v60, %v1408_v55 }
 0x29f   : > { %v1052_v21 = vadd.f32 %v4714_v58, %v909_v22  ;;  %v1053_v53 = vadd.f32 %v4717_v23, %v910_v36  ;;  %v1263_v48 = vadd.f32 %v5768_v56, %v1199_v41  ;;  %v1552_v46 = vadd.f32 %v1536_v37, %v1409_v38 }
 0x2a0   : > { %v1264_v39 = vadd.f32 %v5769_v27, %v1200_v32  ;;  %v1909_v35 = vadd.f32 3.0, %v1893_v25  ;;  %v1910_v18 = vadd.f32 3.0, %v1894_v59  ;;  %v4866_v58 = vadd.f32 %v4770_v50, %v1551_v4  ;;  %v5773_v32 = vld [vmem:[#allocation34_spill] sm:$0xff] }
 0x2a1   : > { %v1195_v11 = vadd.f32 %v4736_v2, %v1052_v21  ;;  %v1196_v31 = vadd.f32 %v4739_v28, %v1053_v53  ;;  %v4869_v10 = vadd.f32 %v4773_v13, %v1552_v46  ;;  %v1406_v15 = vadd.f32 %v4784_v26, %v1263_v48  ;;  %v1292_v8 = vpop.permute.xlu1 %1291 }
 0x2a2   : > { %v1407_v23 = vadd.f32 %v4787_v12, %v1264_v39  ;;  %v1925_v45 = vmax.f32 %v1909_v35, 0.0  ;;  %v1926_v54 = vmax.f32 %v1910_v18, 0.0  ;;  %v1887_v62 = vadd.f32 %v1865_v30, %v1839_v7 }
 0x2a3   : > { %v1888_v60 = vadd.f32 %v1865_v30, %v1840_v47  ;;  %v1259_v2 = vadd.f32 %v4691_v61, %v1195_v11  ;;  %v1260_v28 = vadd.f32 %v4695_v20, %v1196_v31  ;;  %v1549_v37 = vadd.f32 %v4742_v40, %v1406_v15  ;;  %v5770_v61 = vld [vmem:[#allocation54_spill] sm:$0xff]  ;;  %v5777_v31 = vld [vmem:[#allocation63_spill] sm:$0xff]  ;;  %v5778_v30 = vld [vmem:[#allocation100_spill] sm:$0xff] }
 0x2a4   : > { %v1550_v50 = vadd.f32 %v4745_v5, %v1407_v23  ;;  %v1941_v52 = vmin.f32 %v1925_v45, 6.0  ;;  %v1942_v51 = vmin.f32 %v1926_v54, 6.0  ;;  %v1903_v13 = vadd.f32 3.0, %v1887_v62 }
 0x2a5   : > { %v1904_v34 = vadd.f32 3.0, %v1888_v60  ;;  %v1953_v26 = vmul.f32 %v1937_v29, %v4760_v6  ;;  %v1954_v47 = vmul.f32 %v1938_v0, %v4763_v49  ;;  %vm5771_vm9 = vcmp.lt.s32.totalorder %v3596_v57, 127  ;;  %v1437_v0 = vpop.permute.xlu1 %1436 }
 0x2a6   : > { %v1957_v12 = vmul.f32 %v1941_v52, %v1893_v25  ;;  %v1958_v22 = vmul.f32 %v1942_v51, %v1894_v59  ;;  %v1919_v36 = vmax.f32 %v1903_v13, 0.0  ;;  %v1308_v20 = vsel %vm5771_vm9, %v5770_v61, %v1292_v8  ;;  %vm5772_vm10 = vmmov %vm5771_vm9  ;;  %v5774_v25 = vld [vmem:[#allocation5_spill] sm:$0xff]  ;;  %v5781_v52 = vld [vmem:[#allocation31_spill] sm:$0xff] }
 0x2a7   : > { %v1920_v7 = vmax.f32 %v1904_v34, 0.0  ;;  %v1316_v40 = vsel %vm5772_vm10, %v1292_v8, %v5770_v61  ;;  %v4889_v29 = vmul.f32 0.16666667, %v1953_v26  ;;  %v1338_v19 = vsel %vm3886_vm3, %v1308_v20, 0.0  ;;  %v5782_v26 = vld [vmem:[#allocation15_spill] sm:$0xff]  ;;  %vm5793_vm9 = vmmov %vm5784_vm0 }
 0x2a8   : > { %v4885_v5 = vmul.f32 0.16666667, %v1957_v12  ;;  %v4887_v55 = vmul.f32 0.16666667, %v1958_v22  ;;  %v1935_v6 = vmin.f32 %v1919_v36, 6.0  ;;  %v1339_v49 = vsel %vm3916_vm4, %v1316_v40, 0.0  ;;  %vm5794_vm10 = vmmov %vm5784_vm0 }
 0x2a9   : > { %v1936_v38 = vmin.f32 %v1920_v7, 6.0  ;;  %v1386_v24 = vmul.f32 %v5773_v32, %v1338_v19  ;;  %v1387_v21 = vmul.f32 %v5773_v32, %v1339_v49  ;;  %v4897_v53 = vmul.f32 0.16666667, %v1954_v47  ;;  %v1582_v11 = vpop.permute.xlu1 %1581  ;;  %v5787_v61 = vld [vmem:[#allocation67_spill] sm:$0xff]  ;;  %v1861_v49 = vpop.permute.xlu0 %1860 }
 0x2aa   : > { %v1951_v41 = vmul.f32 %v1935_v6, %v1887_v62  ;;  %v1452_v59 = vsel %vm5775_vm5, %v5774_v25, %v1437_v0  ;;  %v1460_v42 = vsel %vm5776_vm7, %v1437_v0, %v5774_v25  ;;  %v1996_v16 = vadd.f32 %v4887_v55, %v4885_v5  ;;  %vm5795_vm7 = vmmov %vm5775_vm5 }
 0x2ab   : > { %v1952_v33 = vmul.f32 %v1936_v38, %v1888_v60  ;;  %v4911_v27 = vadd.f32 %v1386_v24, %v1259_v2  ;;  %v4913_v39 = vadd.f32 %v1387_v21, %v1260_v28  ;;  %v1483_v4 = vsel %vm4101_vm2, %v1452_v59, 0.0 }
 0x2ac   : > { %v4907_v56 = vmul.f32 0.16666667, %v1951_v41  ;;  %v1484_v46 = vsel %vm4108_vm8, %v1460_v42, 0.0  ;;  %1997 = vadd.xlane.f32.xlu1 %v1996_v16  ;;  %v1531_v35 = vmul.f32 %v5777_v31, %v1483_v4  ;;  %vm5779_vm3 = vcmp.lt.s32.totalorder %v3596_v57, 112 }
 0x2ad   : > { %v4909_v48 = vmul.f32 0.16666667, %v1952_v33  ;;  %v1532_v18 = vmul.f32 %v5777_v31, %v1484_v46  ;;  %v1596_v15 = vsel %vm5779_vm3, %v5778_v30, %v1582_v11  ;;  %vm5780_vm4 = vmmov %vm5779_vm3  ;;  %v1990_v62 = vadd.f32 %v4897_v53, %v4889_v29  ;;  %v1727_v34 = vpop.permute.xlu1 %1726  ;;  %v5788_v46 = vld [vmem:[#allocation78_spill] sm:$0xff] }
 0x2ae   : > { %v1604_v23 = vsel %vm5780_vm4, %v1582_v11, %v5778_v30  ;;  %v1628_v45 = vsel %vm5738_vm14, %v1596_v15, 0.0  ;;  %v1547_v2 = vadd.f32 %v1531_v35, %v4707_v14  ;;  %v1740_v8 = vsel %vm5783_vm11, %v5782_v26, %v1727_v34  ;;  %vm5789_vm12 = vmmov %vm5779_vm3  ;;  %v5791_v30 = vld [vmem:[#allocation16_spill] sm:$0xff] }
 0x2af   : > { %v1629_v54 = vsel %vm5739_vm6, %v1604_v23, 0.0  ;;  %v1987_v60 = vadd.f32 %v4909_v48, %v4907_v56  ;;  %v1548_v28 = vadd.f32 %v1532_v18, %v4709_v17  ;;  %v1676_v51 = vmul.f32 %v5781_v52, %v1628_v45  ;;  %vm5790_vm13 = vmmov %vm5779_vm3 }
 0x2b0   : > { %v1677_v13 = vmul.f32 %v5781_v52, %v1629_v54  ;;  %1991 = vadd.xlane.f32.xlu1 %v1990_v62  ;;  %v1748_v12 = vsel %vm5784_vm0, %v1727_v34, %v5782_v26  ;;  %v1773_v17 = vsel %vm4155_vm1, %v1740_v8, 0.0  ;;  %v5792_v62 = vld [vmem:[#allocation66_spill] sm:$0xff]  ;;  %vm5796_vm4 = vmmov %vm5779_vm3 }
 0x2b1   : > { %1988 = vadd.xlane.f32.xlu0 %v1987_v60  ;;  %v1692_v22 = vadd.f32 %v1676_v51, %v1549_v37  ;;  %v1774_v47 = vsel %vm4160_vm15, %v1748_v12, 0.0  ;;  %v1821_v20 = vmul.f32 %v5787_v61, %v1773_v17  ;;  %v4951_v6 = vpop.permute.xlu1 %1788  ;;  %vm5797_vm11 = vmmov %vm5784_vm0 }
 0x2b2   : > { %v1693_v36 = vadd.f32 %v1677_v13, %v1550_v50  ;;  %v1822_v40 = vmul.f32 %v5787_v61, %v1774_v47 }
 0x2b3   : > { %v1837_v38 = vadd.f32 %v1821_v20, %v4866_v58  ;;  %v1578_v20 = vpop.permute.xlu0 %1577 }
 0x2b4   : > { %v1838_v19 = vadd.f32 %v1822_v40, %v4869_v10 }
 0x2b5   : > { %v1885_v0 = vadd.f32 %v1861_v49, %v1837_v38  ;;  %v1419_v50 = vpop.permute.xlu1 %1418 }
 0x2b6   : > { %v1886_v37 = vadd.f32 %v1861_v49, %v1838_v19 }
 0x2b7   : > { %v1901_v41 = vadd.f32 3.0, %v1885_v0 }
 0x2b8   : > { %v1902_v33 = vadd.f32 3.0, %v1886_v37 }
 0x2b9   : > { %v1917_v32 = vmax.f32 %v1901_v41, 0.0  ;;  %v1435_v21 = vpop.permute.xlu1 %1434 }
 0x2ba   : > { %v1918_v24 = vmax.f32 %v1902_v33, 0.0  ;;  %v1451_v49 = vsel %vm5775_vm5, %v1419_v50, %v1435_v21 }
 0x2bb   : > { %v1933_v25 = vmin.f32 %v1917_v32, 6.0  ;;  %v1723_v32 = vpop.permute.xlu0 %1722 }
 0x2bc   : > { %v1934_v59 = vmin.f32 %v1918_v24, 6.0 }
 0x2bd   : > { %v1949_v42 = vmul.f32 %v1933_v25, %v1885_v0  ;;  %v1580_v4 = vpop.permute.xlu1 %1579  ;;  %v1459_v0 = vsel %vm5795_vm7, %v1435_v21, %v1419_v50  ;;  %v1481_v25 = vsel %vm4101_vm2, %v1451_v49, 0.0  ;;  %vm5800_vm2 = vmmov %vm5784_vm0 }
 0x2be   : > { %v1950_v16 = vmul.f32 %v1934_v59, %v1886_v37  ;;  %v1595_v58 = vsel %vm5789_vm12, %v5788_v46, %v1580_v4  ;;  %v1603_v10 = vsel %vm5790_vm13, %v1580_v4, %v5788_v46  ;;  %v1482_v59 = vsel %vm4108_vm8, %v1459_v0, 0.0  ;;  %vm5799_vm8 = vmmov %vm5784_vm0 }
 0x2bf   : > { %v1626_v11 = vsel %vm5738_vm14, %v1595_v58, 0.0  ;;  %v1627_v31 = vsel %vm5739_vm6, %v1603_v10, 0.0  ;;  %v4965_v35 = vmul.f32 0.16666667, %v1949_v42 }
 0x2c0   : > { %v4967_v18 = vmul.f32 0.16666667, %v1950_v16  ;;  %v1674_v15 = vmul.f32 %v5791_v30, %v1626_v11  ;;  %v1675_v23 = vmul.f32 %v5791_v30, %v1627_v31  ;;  %v1529_v31 = vmul.f32 %v4827_v9, %v1481_v25 }
 0x2c1   : > { %v1725_v45 = vpop.permute.xlu1 %1724  ;;  %v1530_v30 = vmul.f32 %v4827_v9, %v1482_v59 }
 0x2c2   : > { %v1984_v54 = vadd.f32 %v4967_v18, %v4965_v35  ;;  %v1739_v60 = vsel %vm5793_vm9, %v5792_v62, %v1725_v45  ;;  %v1747_v52 = vsel %vm5794_vm10, %v1725_v45, %v5792_v62  ;;  %v1690_v51 = vadd.f32 %v1674_v15, %v1547_v2 }
 0x2c3   : > { %v1691_v13 = vadd.f32 %v1675_v23, %v1548_v28  ;;  %v1771_v34 = vsel %vm4155_vm1, %v1739_v60, 0.0  ;;  %v1772_v26 = vsel %vm4160_vm15, %v1747_v52, 0.0  ;;  %v1705_v52 = vpop.permute.xlu0 %1704  ;;  %v1546_v9 = vadd.f32 %v1530_v30, %v4913_v39 }
 0x2c4   : > { %1985 = vadd.xlane.f32.xlu1 %v1984_v54  ;;  %v1819_v8 = vmul.f32 %v4851_v1, %v1771_v34  ;;  %v1820_v12 = vmul.f32 %v4851_v1, %v1772_v26 }
 0x2c5   : > { %v1857_v17 = vpop.permute.xlu1 %1856 }
 0x2c6   : > { %v1835_v47 = vadd.f32 %v1819_v8, %v1692_v22  ;;  %v1836_v61 = vadd.f32 %v1820_v12, %v1693_v36  ;;  %v1545_v8 = vadd.f32 %v1529_v31, %v4911_v27  ;;  %v5801_v27 = vld [vmem:[#allocation55_spill] sm:$0xff] }
 0x2c7   : > { %v1849_v49 = vpop.permute.xlu0 %1848 }
 0x2c8   : > { %v1883_v40 = vadd.f32 %v1857_v17, %v1835_v47  ;;  %v1884_v38 = vadd.f32 %v1857_v17, %v1836_v61 }
 0x2c9   : > { %v1562_v19 = vpop.permute.xlu1 %1561 }
 0x2ca   : > { %v1899_v2 = vadd.f32 3.0, %v1883_v40  ;;  %v1900_v28 = vadd.f32 3.0, %v1884_v38  ;;  %v1594_v22 = vsel %vm5779_vm3, %v1562_v19, %v1578_v20  ;;  %v1602_v36 = vsel %vm5796_vm4, %v1578_v20, %v1562_v19 }
 0x2cb   : > { %v1624_v43 = vsel %vm5738_vm14, %v1594_v22, 0.0  ;;  %v1625_v3 = vsel %vm5739_vm6, %v1602_v36, 0.0 }
 0x2cc   : > { %v1915_v37 = vmax.f32 %v1899_v2, 0.0  ;;  %v1916_v41 = vmax.f32 %v1900_v28, 0.0  ;;  %v1672_v62 = vmul.f32 %v5798_v63, %v1624_v43  ;;  %v1673_v44 = vmul.f32 %v5798_v63, %v1625_v3  ;;  %v2008_v3 = vld [vmem:[%s5163_s5] sm:$0xff] }
 0x2cd   : > { %v1707_v33 = vpop.permute.xlu1 %1706 }
 0x2ce   : > { %v1931_v1 = vmin.f32 %v1915_v37, 6.0  ;;  %v1932_v24 = vmin.f32 %v1916_v41, 6.0  ;;  %v1738_v50 = vsel %vm5797_vm11, %v1707_v33, %v1723_v32  ;;  %v1746_v21 = vsel %vm5784_vm0, %v1723_v32, %v1707_v33 }
 0x2cf   : > { %v1769_v4 = vsel %vm4155_vm1, %v1738_v50, 0.0  ;;  %v1770_v46 = vsel %vm4160_vm15, %v1746_v21, 0.0  ;;  %v1688_v20 = vadd.f32 %v1672_v62, %v1545_v8 }
 0x2d0   : > { %v1947_v42 = vmul.f32 %v1931_v1, %v1883_v40  ;;  %v1948_v16 = vmul.f32 %v1932_v24, %v1884_v38  ;;  %v1817_v58 = vmul.f32 %v4951_v6, %v1769_v4  ;;  %v1818_v10 = vmul.f32 %v4951_v6, %v1770_v46 }
 0x2d1   : > { %v1853_v11 = vpop.permute.xlu1 %1852  ;;  %v1689_v40 = vadd.f32 %v1673_v44, %v1546_v9  ;;  %v2009_v9 = vld [vmem:[%s5163_s5 + $0x8] sm:$0xff] }
 0x2d2   : > { %v5013_v15 = vmul.f32 0.16666667, %v1947_v42  ;;  %v5015_v23 = vmul.f32 0.16666667, %v1948_v16  ;;  %v1833_v45 = vadd.f32 %v1817_v58, %v1690_v51  ;;  %v1834_v54 = vadd.f32 %v1818_v10, %v1691_v13 }
 0x2d4   : > { %v1981_v60 = vadd.f32 %v5015_v23, %v5013_v15  ;;  %v1881_v6 = vadd.f32 %v1853_v11, %v1833_v45  ;;  %v1882_v34 = vadd.f32 %v1853_v11, %v1834_v54 }
 0x2d5   : > { %v1721_v26 = vpop.permute.xlu1 %1720 }
 0x2d6   : > { %v1737_v12 = vsel %vm5799_vm8, %v1705_v52, %v1721_v26  ;;  %v1745_v51 = vsel %vm5800_vm2, %v1721_v26, %v1705_v52  ;;  %1982 = vadd.xlane.f32.xlu0 %v1981_v60  ;;  %v1897_v13 = vadd.f32 3.0, %v1881_v6  ;;  %v1898_v17 = vadd.f32 3.0, %v1882_v34 }
 0x2d7   : > { %v1767_v47 = vsel %vm4155_vm1, %v1737_v12, 0.0  ;;  %v1768_v61 = vsel %vm4160_vm15, %v1745_v51, 0.0  ;;  %vm2012_vm15 = vcmask 523264   ;;  %v2096_v12 = vld [vmem:[%s5165_s7] sm:$0xff]  ;;  %vm5802_vm1 = vcmask 130048   ;;  %v2697_v51 = vld [vmem:[%s5160_s2 + $0x38] sm:$0xff] }
 0x2d8   : > { %v1815_v38 = vmul.f32 %v5801_v27, %v1767_v47  ;;  %v1816_v39 = vmul.f32 %v5801_v27, %v1768_v61  ;;  %v1913_v19 = vmax.f32 %v1897_v13, 0.0  ;;  %v1914_v2 = vmax.f32 %v1898_v17, 0.0  ;;  %2581 = vmatprep.mubr.msk.f32.mxu1 %vm2012_vm15, %v2008_v3  ;;  %v2698_v13 = vld [vmem:[%s5160_s2 + $0x30] sm:$0xff]  ;;  %v2699_v17 = vld [vmem:[%s5160_s2 + $0x28] sm:$0xff]  ;;  %v2700_v47 = vld [vmem:[%s5160_s2 + $0x18] sm:$0xff] }
 0x2d9   : > { %v2701_v61 = vld [vmem:[%s5160_s2 + $0x20] sm:$0xff]  ;;  %vm5803_vm14 = vmmov %vm5802_vm1 }
 0x2da   : > { %v1831_v28 = vadd.f32 %v1815_v38, %v1688_v20  ;;  %v1832_v57 = vadd.f32 %v1816_v39, %v1689_v40  ;;  %v1929_v0 = vmin.f32 %v1913_v19, 6.0  ;;  %v1930_v37 = vmin.f32 %v1914_v2, 6.0  ;;  %v2702_v20 = vld [vmem:[%s5160_s2 + $0x8] sm:$0xff]  ;;  %v2703_v40 = vld [vmem:[%s5160_s2 + $0x10] sm:$0xff]  ;;  %v2704_v27 = vld [vmem:[%s5160_s2] sm:$0xff] }
 0x2db   : > { %v2011_v38 = vld [vmem:[%s5164_s6 + $0x8] sm:$0xff]  ;;  %v2010_v19 = vld [vmem:[%s5164_s6] sm:$0xff]  ;;  %vm5804_vm6 = vmmov %vm5802_vm1 }
 0x2dc   : > { %v1879_v41 = vadd.f32 %v1849_v49, %v1831_v28  ;;  %v1880_v33 = vadd.f32 %v1849_v49, %v1832_v57  ;;  %v1945_v14 = vmul.f32 %v1929_v0, %v1881_v6  ;;  %v1946_v32 = vmul.f32 %v1930_v37, %v1882_v34  ;;  %v2097_v37 = vld [vmem:[%s5165_s7 + $0x8] sm:$0xff]  ;;  %vm5805_vm12 = vmmov %vm5802_vm1 }
 0x2dd   : > { %vm5806_vm13 = vmmov %vm5802_vm1 }
 0x2de   : > { %v1895_v1 = vadd.f32 3.0, %v1879_v41  ;;  %v1896_v7 = vadd.f32 3.0, %v1880_v33  ;;  %v5033_v24 = vmul.f32 0.16666667, %v1945_v14  ;;  %v5035_v22 = vmul.f32 0.16666667, %v1946_v32  ;;  %vm5807_vm9 = vmmov %vm5802_vm1 }
 0x2df   : > { %v2100_v14 = vld [vmem:[%s5165_s7 + $0x20] sm:$0xff]  ;;  %v2101_v32 = vld [vmem:[%s5165_s7 + $0x28] sm:$0xff]  ;;  %vm5808_vm10 = vmmov %vm5802_vm1 }
 0x2e0   : > { %v1911_v36 = vmax.f32 %v1895_v1, 0.0  ;;  %v1912_v25 = vmax.f32 %v1896_v7, 0.0  ;;  %v1978_v59 = vadd.f32 %v5035_v22, %v5033_v24  ;;  %v2102_v1 = vld [vmem:[%s5165_s7 + $0x30] sm:$0xff]  ;;  %v2103_v7 = vld [vmem:[%s5165_s7 + $0x38] sm:$0xff]  ;;  %vm5809_vm5 = vmmov %vm5802_vm1 }
 0x2e2   : > { %v1927_v50 = vmin.f32 %v1911_v36, 6.0  ;;  %v1928_v21 = vmin.f32 %v1912_v25, 6.0  ;;  %1979 = vadd.xlane.f32.xlu1 %v1978_v59 }
 0x2e4   : > { %v1943_v42 = vmul.f32 %v1927_v50, %v1879_v41  ;;  %v1944_v16 = vmul.f32 %v1928_v21, %v1880_v33  ;;  %v2098_v41 = vld [vmem:[%s5165_s7 + $0x10] sm:$0xff]  ;;  %v2099_v33 = vld [vmem:[%s5165_s7 + $0x18] sm:$0xff] }
 0x2e6   : > { %v5039_v4 = vmul.f32 0.16666667, %v1943_v42  ;;  %v5041_v46 = vmul.f32 0.16666667, %v1944_v16 }
 0x2e8   : > { %v1975_v43 = vadd.f32 %v5041_v46, %v5039_v4 }
 0x2ea   : > { %1976 = vadd.xlane.f32.xlu0 %v1975_v43 }
 0x2f3   : > { %v1995_v58 = vpop.xlane.xlu0 %1994  ;;  %2118 = vrot.lane.b32.xlu1 %v2697_v51, %s2735_s20 }
 0x2f4   : > { %v2006_v31 = vmul.f32 0.00390625, %v1995_v58 }
 0x2f7   : > { %2114 = vrot.lane.b32.xlu1 %v2699_v17, %s2735_s20 }
 0x2fb   : > { %2112 = vrot.lane.b32.xlu1 %v2701_v61, %s2735_s20 }
 0x2ff   : > { %2108 = vrot.lane.b32.xlu1 %v2703_v40, %s2735_s20 }
 0x300   : > { %2116 = vrot.lane.b32.xlu0 %v2698_v13, %s2735_s20 }
 0x303   : > { %2104 = vrot.lane.b32.xlu1 %v2704_v27, %s2735_s20 }
 0x304   : > { %2110 = vrot.lane.b32.xlu0 %v2700_v47, %s2735_s20 }
 0x308   : > { %2106 = vrot.lane.b32.xlu0 %v2702_v20, %s2735_s20 }
 0x335   : > { %v1998_v10 = vpop.xlane.xlu1 %1997 }
 0x336   : > { %v2007_v11 = vmul.f32 0.00390625, %v1998_v10 }
 0x338   : > { %2565 = vmatprep.subr.mxu1 %v2007_v11 }
 0x339   : > { %2566 = vmatpush3.msra.mxu1 %v2007_v11  ;;  %v1992_v30 = vpop.xlane.xlu1 %1991 }
 0x33a   : > { %v1989_v45 = vpop.xlane.xlu0 %1988  ;;  %v2005_v54 = vmul.f32 0.00390625, %v1992_v30  ;;  %2567 = vmatprep.subr.mxu1 %v2006_v31 }
 0x33b   : > { %v2004_v63 = vmul.f32 0.00390625, %v1989_v45  ;;  %2568 = vmatpush3.msra.mxu1 %v2006_v31 }
 0x33c   : > { %2569 = vmatprep.subr.mxu1 %v2005_v54 }
 0x33d   : > { %2570 = vmatpush3.msra.mxu1 %v2005_v54 }
 0x33e   : > { %2571 = vmatprep.subr.mxu1 %v2004_v63 }
 0x33f   : > { %2572 = vmatpush3.msra.mxu1 %v2004_v63 }
 0x34d   : > { %v1986_v62 = vpop.xlane.xlu1 %1985 }
 0x34e   : > { %v2003_v44 = vmul.f32 0.00390625, %v1986_v62 }
 0x350   : > { %2573 = vmatprep.subr.mxu1 %v2003_v44 }
 0x351   : > { %2574 = vmatpush3.msra.mxu1 %v2003_v44 }
 0x35f   : > { %v1983_v60 = vpop.xlane.xlu0 %1982 }
 0x360   : > { %v2002_v52 = vmul.f32 0.00390625, %v1983_v60 }
 0x362   : > { %2575 = vmatprep.subr.mxu1 %v2002_v52 }
 0x363   : > { %2576 = vmatpush3.msra.mxu1 %v2002_v52 }
 0x36b   : > { %v1980_v6 = vpop.xlane.xlu1 %1979 }
 0x36c   : > { %v2001_v34 = vmul.f32 0.00390625, %v1980_v6 }
 0x36e   : > { %2577 = vmatprep.subr.mxu1 %v2001_v34 }
 0x36f   : > { %2578 = vmatpush3.msra.mxu1 %v2001_v34  ;;  %v2119_v36 = vpop.permute.xlu1 %2118 }
 0x373   : > { %v1977_v26 = vpop.xlane.xlu0 %1976  ;;  %v2115_v25 = vpop.permute.xlu1 %2114 }
 0x374   : > { %v2000_v8 = vmul.f32 0.00390625, %v1977_v26 }
 0x376   : > { %2579 = vmatprep.subr.mxu1 %v2000_v8 }
 0x377   : > { %2580 = vmatpush3.msra.mxu1 %v2000_v8  ;;  %v2113_v50 = vpop.permute.xlu1 %2112  ;;  %v2117_v42 = vpop.permute.xlu0 %2116 }
 0x378   : > { %2582 = vmatmul.mubr.msk.f32.vlgmr.msra.gmra.mxu1 %vm2012_vm15, %v2009_v9 }
 0x379   : > { %2588 = vmatprep.mubr.msk.f32.mxu1 %vm5802_vm1, %v2096_v12 }
 0x37b   : > { %v2109_v3 = vpop.permute.xlu1 %2108  ;;  %v2111_v10 = vpop.permute.xlu0 %2110 }
 0x37f   : > { %v2105_v54 = vpop.permute.xlu1 %2104  ;;  %v2107_v52 = vpop.permute.xlu0 %2106 }
 0x438   : > { %v2583_v39 = vpop.f32.mrf.mxu1 }
 0x439   : > { %v2091_v2 = vadd.f32 %v2583_v39, %v2011_v38 }
 0x43a   : > { %v2085_v28 = vpop.f32.mrf.mxu1 }
 0x43b   : > { %v2095_v57 = vmax.f32 %v2091_v2, 0.0  ;;  %v2086_v49 = vadd.f32 %v2085_v28, %v2010_v19 }
 0x43d   : > { %v2094_v0 = vmax.f32 %v2086_v49, 0.0  ;;  %2584 = vmatprep.subr.mxu1 %v2095_v57 }
 0x43e   : > { %2585 = vmatpush3.msra.mxu1 %v2095_v57 }
 0x43f   : > { %2586 = vmatprep.subr.mxu1 %v2094_v0 }
 0x440   : > { %2587 = vmatpush3.msra.mxu1 %v2094_v0 }
 0x441   : > { %2589 = vmatmul.mubr.msk.f32.vlgmr.msra.gmra.mxu1 %vm5803_vm14, %v2097_v37 }
 0x442   : > { %2591 = vmatprep.mubr.msk.f32.mxu1 %vm5804_vm6, %v2098_v41 }
 0x445   : > { %2592 = vmatmul.mubr.msk.f32.gmra.mxu1 %vm5805_vm12, %v2099_v33 }
 0x446   : > { %2594 = vmatprep.mubr.msk.f32.mxu1 %vm5806_vm13, %v2100_v14 }
 0x449   : > { %2595 = vmatmul.mubr.msk.f32.gmra.mxu1 %vm5807_vm9, %v2101_v32 }
 0x44a   : > { %2597 = vmatprep.mubr.msk.f32.mxu1 %vm5808_vm10, %v2102_v1 }
 0x44d   : > { %2598 = vmatmul.mubr.msk.f32.gmra.mxu1 %vm5809_vm5, %v2103_v7 }
 0x501   : > { %v2590_v59 = vpop.f32.mrf.mxu1 }
 0x502   : > { %v2224_v47 = vadd.f32 %v2590_v59, %v2107_v52 }
 0x503   : > { %v2218_v21 = vpop.f32.mrf.mxu1 }
 0x504   : > { %v2219_v9 = vadd.f32 %v2218_v21, %v2105_v54  ;;  %v2258_v57 = vadd.f32 3.0, %v2224_v47 }
 0x505   : > { %v2593_v16 = vpop.f32.mrf.mxu1 }
 0x506   : > { %v2234_v6 = vadd.f32 %v2593_v16, %v2111_v10  ;;  %v2257_v38 = vadd.f32 3.0, %v2219_v9  ;;  %v2266_v32 = vmax.f32 %v2258_v57, 0.0  ;;  %v2348_v16 = vld [vmem:[%s5167_s9 + $0x8] sm:$0xff] }
 0x507   : > { %v2228_v43 = vpop.f32.mrf.mxu1 }
 0x508   : > { %v2229_v63 = vadd.f32 %v2228_v43, %v2109_v3  ;;  %v2260_v61 = vadd.f32 3.0, %v2234_v6  ;;  %v2265_v41 = vmax.f32 %v2257_v38, 0.0  ;;  %v2274_v59 = vmin.f32 %v2266_v32, 6.0  ;;  %v2347_v43 = vld [vmem:[%s5167_s9] sm:$0xff] }
 0x509   : > { %v2596_v58 = vpop.f32.mrf.mxu1 }
 0x50a   : > { %v2244_v31 = vadd.f32 %v2596_v58, %v2115_v25  ;;  %v2259_v12 = vadd.f32 3.0, %v2229_v63  ;;  %v2268_v49 = vmax.f32 %v2260_v61, 0.0 }
 0x50b   : > { %v2238_v11 = vpop.f32.mrf.mxu1 }
 0x50c   : > { %v2239_v30 = vadd.f32 %v2238_v11, %v2113_v50  ;;  %v2262_v34 = vadd.f32 3.0, %v2244_v31  ;;  %v2267_v39 = vmax.f32 %v2259_v12, 0.0  ;;  %v2276_v1 = vmin.f32 %v2268_v49, 6.0  ;;  %v5810_v31 = vld [vmem:[#allocation58_spill] sm:$0xff] }
 0x50d   : > { %v2599_v45 = vpop.f32.mrf.mxu1 }
 0x50e   : > { %v2261_v62 = vadd.f32 3.0, %v2239_v30  ;;  %v2254_v44 = vadd.f32 %v2599_v45, %v2119_v36  ;;  %v2270_v20 = vmax.f32 %v2262_v34, 0.0  ;;  %v2275_v33 = vmin.f32 %v2267_v39, 6.0  ;;  %v5811_v45 = vld [vmem:[#allocation23_spill] sm:$0xff]  ;;  %v2707_v39 = vld [vmem:[%s2823_s24 + $0x10] sm:$0xff] }
 0x50f   : > { %v2248_v60 = vpop.f32.mrf.mxu1  ;;  %v2273_v36 = vmin.f32 %v2265_v41, 6.0  ;;  %v2284_v50 = vmul.f32 0.16666667, %v2276_v1 }
 0x510   : > { %v2264_v26 = vadd.f32 3.0, %v2254_v44  ;;  %v2249_v8 = vadd.f32 %v2248_v60, %v2117_v42  ;;  %v2269_v51 = vmax.f32 %v2261_v62, 0.0  ;;  %v2278_v0 = vmin.f32 %v2270_v20, 6.0  ;;  %v2706_v20 = vld [vmem:[%s2823_s24 + $0x8] sm:$0xff] }
 0x511   : > { %v2283_v25 = vmul.f32 0.16666667, %v2275_v33  ;;  %v2281_v21 = vmul.f32 0.16666667, %v2273_v36  ;;  %v2282_v42 = vmul.f32 0.16666667, %v2274_v59 }
 0x512   : > { %v2272_v13 = vmax.f32 %v2264_v26, 0.0  ;;  %v2263_v17 = vadd.f32 3.0, %v2249_v8  ;;  %v2277_v19 = vmin.f32 %v2269_v51, 6.0  ;;  %v2286_v7 = vmul.f32 0.16666667, %v2278_v0  ;;  %v2705_v51 = vld [vmem:[%s2823_s24] sm:$0xff] }
 0x514   : > { %v2280_v40 = vmin.f32 %v2272_v13, 6.0  ;;  %v2271_v27 = vmax.f32 %v2263_v17, 0.0  ;;  %v2285_v14 = vmul.f32 0.16666667, %v2277_v19 }
 0x516   : > { %v2288_v2 = vmul.f32 0.16666667, %v2280_v40  ;;  %v2279_v28 = vmin.f32 %v2271_v27, 6.0 }
 0x518   : > { %v2287_v37 = vmul.f32 0.16666667, %v2279_v28  ;;  %2326 = vperm.xlu0 %2687, %v2288_v2   ;;  %v2708_v28 = vld [vmem:[%s2823_s24 + $0x18] sm:$0xff] }
 0x51a   : > { %2321 = vperm.xlu1 %2688, %v2287_v37  }
 0x51c   : > { %2311 = vperm.xlu0 %2687, %v2285_v14  }
 0x51e   : > { %2316 = vperm.xlu1 %2688, %v2286_v7  }
 0x520   : > { %2301 = vperm.xlu0 %2687, %v2283_v25  }
 0x522   : > { %2306 = vperm.xlu1 %2688, %v2284_v50  }
 0x524   : > { %2291 = vperm.xlu0 %2687, %v2281_v21  }
 0x526   : > { %2296 = vperm.xlu1 %2688, %v2282_v42  }
 0x528   : > { %2356 = vperm.xlu0 %2687, %v2348_v16  }
 0x52a   : > { %2351 = vperm.xlu1 %2688, %v2347_v43  }
 0x593   : > { %v2327_v3 = vpop.permute.xlu0 %2326 }
 0x594   : > { %v2343_v58 = vmul.f32 %v2327_v3, %v4885_v5  ;;  %v2344_v10 = vmul.f32 %v2327_v3, %v4887_v55 }
 0x595   : > { %v2322_v11 = vpop.permute.xlu1 %2321 }
 0x596   : > { %v2341_v30 = vmul.f32 %v2322_v11, %v5810_v31  ;;  %v2342_v54 = vmul.f32 %v2322_v11, %v5811_v45  ;;  %2381 = vmatprep.subr.mxu0 %v2344_v10 }
 0x597   : > { %2382 = vmatpush1.msra.mxu0 %v2343_v58  ;;  %v2312_v63 = vpop.permute.xlu0 %2311 }
 0x598   : > { %2383 = vmatprep.subr.mxu0 %v2342_v54  ;;  %v2338_v5 = vmul.f32 %v2312_v63, %v4909_v48  ;;  %v2337_v55 = vmul.f32 %v2312_v63, %v4907_v56 }
 0x599   : > { %v2317_v62 = vpop.permute.xlu1 %2316  ;;  %2384 = vmatpush1.msra.mxu0 %v2341_v30 }
 0x59a   : > { %v2339_v44 = vmul.f32 %v2317_v62, %v4889_v29  ;;  %v2340_v60 = vmul.f32 %v2317_v62, %v4897_v53 }
 0x59b   : > { %v2302_v52 = vpop.permute.xlu0 %2301 }
 0x59c   : > { %2385 = vmatprep.subr.mxu0 %v2340_v60  ;;  %v2334_v8 = vmul.f32 %v2302_v52, %v5015_v23  ;;  %v2333_v29 = vmul.f32 %v2302_v52, %v5013_v15  ;;  %v2345_v15 = vld [vmem:[%s5166_s8] sm:$0xff]  ;;  %v5812_v23 = vmov 0.0  }
 0x59d   : > { %v2307_v6 = vpop.permute.xlu1 %2306  ;;  %2386 = vmatpush1.msra.mxu0 %v2339_v44 }
 0x59e   : > { %v2335_v34 = vmul.f32 %v2307_v6, %v4965_v35  ;;  %v2336_v26 = vmul.f32 %v2307_v6, %v4967_v18  ;;  %2387 = vmatprep.subr.mxu0 %v2338_v5 }
 0x59f   : > { %2388 = vmatpush1.msra.mxu0 %v2337_v55  ;;  %v2292_v53 = vpop.permute.xlu0 %2291 }
 0x5a0   : > { %2389 = vmatprep.subr.mxu0 %v2336_v26  ;;  %v2330_v35 = vmul.f32 %v2292_v53, %v5041_v46  ;;  %v2329_v18 = vmul.f32 %v2292_v53, %v5039_v4 }
 0x5a1   : > { %v2297_v9 = vpop.permute.xlu1 %2296  ;;  %2390 = vmatpush1.msra.mxu0 %v2335_v34 }
 0x5a2   : > { %v2331_v48 = vmul.f32 %v2297_v9, %v5033_v24  ;;  %v2332_v56 = vmul.f32 %v2297_v9, %v5035_v22  ;;  %2391 = vmatprep.subr.mxu0 %v2334_v8  ;;  %v2346_v24 = vld [vmem:[%s5166_s8 + $0x8] sm:$0xff] }
 0x5a3   : > { %2392 = vmatpush1.msra.mxu0 %v2333_v29  ;;  %v2357_v47 = vpop.permute.xlu0 %2356 }
 0x5a4   : > { %2393 = vmatprep.subr.mxu0 %v2332_v56 }
 0x5a5   : > { %2394 = vmatpush1.msra.mxu0 %v2331_v48  ;;  %v2352_v22 = vpop.permute.xlu1 %2351 }
 0x5a6   : > { %2395 = vmatprep.subr.mxu0 %v2330_v35 }
 0x5a7   : > { %2396 = vmatpush1.msra.mxu0 %v2329_v18 }
 0x5a8   : > { %2539 = vmatmul.mubr.msk.f32.vlgmr.msra.gmra.mxu0 %vm2012_vm15, %v2345_v15 }
 0x5a9   : > { %2435 = vmatprep.mubr.f32.mxu0 %v5812_v23 }
 0x5ac   : > { %2540 = vmatmul.mubr.msk.f32.gmra.mxu0 %vm2012_vm15, %v2346_v24 }
 0x668   : > { %v2431_v4 = vpop.f32.mrf.mxu0 }
 0x669   : > { %v2432_v46 = vadd.f32 %v2431_v4, %v2352_v22 }
 0x66a   : > { %v2433_v12 = vpop.f32.mrf.mxu0 }
 0x66b   : > { %v2442_v13 = vadd.f32 %v2705_v51, %v2432_v46  ;;  %v2434_v17 = vadd.f32 %v2433_v12, %v2352_v22 }
 0x66c   : > { %v2437_v61 = vpop.f32.mrf.mxu0 }
 0x66d   : > { %2446 = vst [vmem:[%s359_s16] sm:$0xff] %v2442_v13  ;;  %v2443_v40 = vadd.f32 %v2706_v20, %v2434_v17  ;;  %v2438_v27 = vadd.f32 %v2437_v61, %v2357_v47 }
 0x66e   : > { %v2439_v38 = vpop.f32.mrf.mxu0 }
 0x66f   : > { %2447 = vst [vmem:[%s359_s16 + $0x8] sm:$0xff] %v2443_v40  ;;  %v2444_v19 = vadd.f32 %v2707_v39, %v2438_v27  ;;  %v2440_v2 = vadd.f32 %v2439_v38, %v2357_v47 }
 0x671   : > { %2448 = vst [vmem:[%s359_s16 + $0x10] sm:$0xff] %v2444_v19  ;;  %v2445_v57 = vadd.f32 %v2708_v28, %v2440_v2 }
 0x673   : > { %2449 = vst [vmem:[%s359_s16 + $0x18] sm:$0xff] %v2445_v57 }
 0x674 PF: > { %s20_s13 = sadd.s32 1, %s2715_s13  }
 0x675   : > { %p17_p4 = scmp.ge.s32.totalorder %s20_s13, 4  }
 0x677   :  { %19 = sbr.rel (!%p17_p4) target bundleno = 1 (0x1), region = 97 }

</bundles_post_ra>
